<compile_context>
chip_gen: v6e
topology: v6e:2x2x1
jax: 0.10.0
libtpu: 0.0.40
codegen_flags: <defaults>
</compile_context>

<pallas_src>
import functools

import jax
import jax.numpy as jnp
from jax.experimental import pallas as pl
from jax.experimental.pallas import tpu as pltpu


# ----------------------------------------------------------------------------
# Fused Pallas kernel: one grid step = one (batch, row-tile) window.
# ----------------------------------------------------------------------------
def csp1_fused_kernel(x_ref,
                      w_up_ref, s_up_ref, b_up_ref,
                      w_r1_ref, s_r1_ref, b_r1_ref,
                      w_r2_ref, s_r2_ref, b_r2_ref,
                      w_bot_ref, bias_bot_ref,
                      s_tie_u_ref, b_tie_u_ref,
                      s_tie_b_ref, b_tie_b_ref,
                      w_tie_u_ref, w_tie_b_ref,
                      o_ref,
                      pad_ref,
                      *, H, W, TH, TH_ext, halo, n_rep, mm_dtype):
    C1 = x_ref.shape[-1]
    C_ = w_up_ref.shape[-1]
    f32 = jnp.float32
    pdt = pad_ref.dtype

    def mm(a, w):
        # MXU matmul: operands in mm_dtype, accumulation always f32.
        return jnp.dot(a.astype(mm_dtype), w, preferred_element_type=f32)

    def silu_affine(acc, s_ref, b_ref):
        y = acc * s_ref[...] + b_ref[...]          # folded BN (f32)
        return y * jax.nn.sigmoid(y)               # SiLU (f32, EUP)

    def leaky_affine(v, s_ref, b_ref):
        z = v * s_ref[...] + b_ref[...]
        return jnp.where(z > 0, z, 0.01 * z)       # LeakyReLU(0.01)

    # Row window with an n_rep-row recomputed halo, clamped to the image so
    # the zero border of pad_ref is only "real" padding at true image edges.
    h0 = pl.program_id(1) * TH
    start = jnp.minimum(jnp.maximum(h0 - halo, 0), H - TH_ext)
    out_off = h0 - start            # output rows sit at [out_off, out_off+TH)

    # Hoisted weight loads (already cast to mm_dtype host-side).
    w_up = w_up_ref[...]
    w_r1 = w_r1_ref[...]
    w_r2 = [w_r2_ref[i] for i in range(9)]         # per-tap (C_, C_)
    w_bot = w_bot_ref[...]
    w_tie_u = w_tie_u_ref[...]
    w_tie_b = w_tie_b_ref[...]

    x_win = x_ref[pl.ds(start, TH_ext), :, :].reshape(TH_ext * W, C1)
    x_out = x_ref[pl.ds(h0, TH), :, :].reshape(TH * W, C1)

    # ---- up: CBL(c1, c_, 1x1) over the full halo window (feeds the chain) ---
    u_full = silu_affine(mm(x_win, w_up), s_up_ref, b_up_ref)   # (TH_ext*W, C_)

    # Zero only the 4 halo border strips; the interior is rewritten each rep.
    pad_ref[0:1, :, :] = jnp.zeros((1, W + 2, C_), pdt)
    pad_ref[TH_ext + 1:TH_ext + 2, :, :] = jnp.zeros((1, W + 2, C_), pdt)
    pad_ref[:, 0:1, :] = jnp.zeros((TH_ext + 2, 1, C_), pdt)
    pad_ref[:, W + 1:W + 2, :] = jnp.zeros((TH_ext + 2, 1, C_), pdt)

    # ---- ResUnit_n: n reps of the SAME (1x1 CBL -> 3x3 CBL) module (the
    #      PyTorch module reuses one res_unit), shortcut added ONCE at the end.
    y = u_full
    for r in range(n_rep):                          # static unroll
        t = silu_affine(mm(y, w_r1), s_r1_ref, b_r1_ref)        # (TH_ext*W, C_)
        pad_ref[1:TH_ext + 1, 1:W + 1, :] = (
            t.reshape(TH_ext, W, C_).astype(pdt))
        last = (r == n_rep - 1)
        rows = TH if last else TH_ext               # last rep: output rows only
        row0 = out_off if last else 0
        # 3x3 conv = 9 shifted-view matmuls accumulated in f32 (no im2col buf).
        acc = jnp.zeros((rows * W, C_), f32)
        for idx in range(9):
            dy, dx = divmod(idx, 3)
            view = pad_ref[pl.ds(row0 + dy, rows), pl.ds(dx, W), :]
            acc = acc + mm(view.reshape(rows * W, C_), w_r2[idx])
        y = silu_affine(acc, s_r2_ref, b_r2_ref)

    # Residual at the output rows (cheap 1x1 recompute instead of a dynamic
    # value slice of u_full).
    u_rows = silu_affine(mm(x_out, w_up), s_up_ref, b_up_ref)   # (TH*W, C_)
    up_out = u_rows + y

    # ---- bottom: Conv2d(c1, c_, 1x1, bias=True) ------------------------------
    bot = mm(x_out, w_bot) + bias_bot_ref[...]

    # ---- tie: BN(2c_) -> LeakyReLU -> 1x1 conv, split so no concat is built --
    out = (mm(leaky_affine(up_out, s_tie_u_ref, b_tie_u_ref), w_tie_u)
           + mm(leaky_affine(bot, s_tie_b_ref, b_tie_b_ref), w_tie_b))

    o_ref[...] = out.astype(o_ref.dtype)            # (TH*W, C2) lane-major


# ----------------------------------------------------------------------------
# Wrapper
# ----------------------------------------------------------------------------
def csp1_forward(x_nchw, p, n_rep=1, mm_dtype=jnp.bfloat16, row_tile=8):
    # NCHW at the module boundary (PyTorch), NHWC inside.  x only feeds 1x1
    # matmuls, so it can be pre-cast to mm_dtype (halves input DMA for bf16).
    x = jnp.transpose(x_nchw, (0, 2, 3, 1)).astype(mm_dtype)
    N, H, W, C1 = x.shape
    C_ = p["w_up"].shape[1]
    C2 = p["w_tie"].shape[1]
    M = H * W

    halo = n_rep
    TH = row_tile if (0 < row_tile < H and H % row_tile == 0) else H
    if (TH * W) % 8 != 0:                 # keep the output tile sublane-aligned
        TH = H
    TH_ext = min(TH + 2 * halo, H)
    HT = H // TH

    wq = lambda a: a.astype(mm_dtype)
    row = lambda v: v.reshape(1, -1).astype(jnp.float32)

    args = [
        x,
        wq(p["w_up"]), row(p["s_up"]), row(p["b_up"]),
        wq(p["w_r1"]), row(p["s_r1"]), row(p["b_r1"]),
        wq(p["w_r2_hwio"].reshape(9, C_, C_)), row(p["s_r2"]), row(p["b_r2"]),
        wq(p["w_bot"]), row(p["bias_bot"]),
        row(p["s_tie"][:C_]), row(p["b_tie"][:C_]),
        row(p["s_tie"][C_:]), row(p["b_tie"][C_:]),
        wq(p["w_tie"][:C_]), wq(p["w_tie"][C_:]),
    ]

    def w_spec(a):
        return pl.BlockSpec(a.shape, lambda n, h, nd=a.ndim: (0,) * nd)

    in_specs = ([pl.BlockSpec((None, H, W, C1), lambda n, h: (n, 0, 0, 0))]
                + [w_spec(a) for a in args[1:]])
    # NOTE: for production use C2 (and C_) should be multiples of 128 so the
    # output store is lane-dense; the toy C2=8 is unavoidably masked.
    out_spec = pl.BlockSpec((None, TH * W, C2), lambda n, h: (n, h, 0))

    flops_per_img = 2 * M * (2 * C1 * C_                     # up + bottom 1x1
                             + n_rep * (C_ * C_ + 9 * C_ * C_)  # r1 + 3x3
                             + 2 * C_ * C2)                  # tie (two halves)
    weight_bytes = sum(int(a.size) * a.dtype.itemsize for a in args[1:])
    cost = pl.CostEstimate(
        flops=int(N * flops_per_img),
        transcendentals=int(N * M * C_ * (1 + 2 * n_rep)),
        bytes_accessed=int(N * M * C1 * x.dtype.itemsize     # input (mm_dtype)
                           + 4 * N * M * C2                  # output (f32)
                           + weight_bytes))                  # weights once

    out = pl.pallas_call(
        functools.partial(csp1_fused_kernel, H=H, W=W, TH=TH, TH_ext=TH_ext,
                          halo=halo, n_rep=n_rep, mm_dtype=mm_dtype),
        grid=(N, HT),
        in_specs=in_specs,
        out_specs=out_spec,
        out_shape=jax.ShapeDtypeStruct((N, M, C2), jnp.float32),
        scratch_shapes=[
            pltpu.VMEM((TH_ext + 2, W + 2, C_), mm_dtype),   # zero-padded halo
        ],
        compiler_params=pltpu.CompilerParams(
            dimension_semantics=("parallel", "parallel"),
            vmem_limit_bytes=56 * 1024 * 1024),
        cost_estimate=cost,
    )(*args)
    out = out.reshape(N, H, W, C2)
    return jnp.transpose(out, (0, 3, 1, 2)).astype(jnp.float32)   # back to NCHW


# ----------------------------------------------------------------------------
# Parameter construction (deterministic, synthetic) + pure-JAX reference
# ----------------------------------------------------------------------------
def fold_bn(gamma, beta, mean, var, eps=1e-5):
    scale = gamma / jnp.sqrt(var + eps)
    shift = beta - mean * scale
    return scale, shift


def make_params(c1, c2, key):
    c_ = c2 // 2
    ks = jax.random.split(key, 16)

    def w(k, shape, s=0.1):
        return s * jax.random.normal(k, shape, jnp.float32)

    def bn(k, c):
        k1, k2, k3, k4 = jax.random.split(k, 4)
        gamma = 1.0 + 0.1 * jax.random.normal(k1, (c,), jnp.float32)
        beta = 0.1 * jax.random.normal(k2, (c,), jnp.float32)
        mean = 0.1 * jax.random.normal(k3, (c,), jnp.float32)
        var = 0.5 + jax.random.uniform(k4, (c,), jnp.float32)
        return fold_bn(gamma, beta, mean, var)

    p = {}
    p["w_up"] = w(ks[0], (c1, c_))
    p["s_up"], p["b_up"] = bn(ks[1], c_)
    p["w_r1"] = w(ks[2], (c_, c_))
    p["s_r1"], p["b_r1"] = bn(ks[3], c_)
    p["w_r2_hwio"] = w(ks[4], (3, 3, c_, c_))
    p["s_r2"], p["b_r2"] = bn(ks[5], c_)
    p["w_bot"] = w(ks[6], (c1, c_))
    p["bias_bot"] = w(ks[7], (c_,))
    p["s_tie"], p["b_tie"] = bn(ks[8], 2 * c_)
    p["w_tie"] = w(ks[9], (2 * c_, c2))
    return p


def ref_forward(x_nchw, p, n_rep=1):
    """Pure-JAX reference (same math, lax.conv for the 3x3)."""
    x = jnp.transpose(x_nchw, (0, 2, 3, 1)).astype(jnp.float32)

    def silu(v):
        return v * jax.nn.sigmoid(v)

    def pw(v, w):
        return jnp.einsum("nhwc,cd->nhwd", v, w,
                          preferred_element_type=jnp.float32)

    u = silu(pw(x, p["w_up"]) * p["s_up"] + p["b_up"])
    y = u
    for _ in range(n_rep):
        t = silu(pw(y, p["w_r1"]) * p["s_r1"] + p["b_r1"])
        c = jax.lax.conv_general_dilated(
            t, p["w_r2_hwio"], (1, 1), ((1, 1), (1, 1)),
            dimension_numbers=("NHWC", "HWIO", "NHWC"),
            preferred_element_type=jnp.float32)
        y = silu(c * p["s_r2"] + p["b_r2"])
    y = u + y

    bot = pw(x, p["w_bot"]) + p["bias_bot"]
    total = jnp.concatenate([y, bot], axis=-1)
    t = total * p["s_tie"] + p["b_tie"]
    t = jnp.where(t > 0, t, 0.01 * t)
    out = pw(t, p["w_tie"])
    return jnp.transpose(out, (0, 3, 1, 2))


# ----------------------------------------------------------------------------
if __name__ == "__main__":
    # CSP1_n(c1=4, c2=8, k=1, s=1, n=1, e=[1.0, 1.0]) -> c_ = 4
    C1, C2, N_REP = 4, 8, 1
    N, H, W = 2, 16, 16

    key = jax.random.PRNGKey(0)
    kx, kp = jax.random.split(key)
    x = jax.random.normal(kx, (N, C1, H, W), jnp.float32)   # NCHW, PyTorch-style
    params = make_params(C1, C2, kp)

    ref = jax.block_until_ready(ref_forward(x, params, n_rep=N_REP))

    # f32 matmul operands: tight check of the fused kernel + row-tile halo.
    out = jax.block_until_ready(
        csp1_forward(x, params, n_rep=N_REP, mm_dtype=jnp.float32))
    assert out.shape == (N, C2, H, W), out.shape
    assert jnp.allclose(out, ref, atol=1e-2, rtol=1e-2), (
        float(jnp.max(jnp.abs(out - ref))))

    # bf16 matmul operands (default on all generations; f32 accumulation and
    # f32 elementwise); looser tolerance.
    out_bf16 = jax.block_until_ready(csp1_forward(x, params, n_rep=N_REP))
    assert jnp.allclose(out_bf16, ref, atol=5e-2, rtol=5e-2), (
        float(jnp.max(jnp.abs(out_bf16 - ref))))

    # Multi-rep halo (n_rep=2; the PyTorch module reuses the same res_unit
    # weights for every repetition, so the same params apply).
    ref2 = jax.block_until_ready(ref_forward(x, params, n_rep=2))
    out2 = jax.block_until_ready(
        csp1_forward(x, params, n_rep=2, mm_dtype=jnp.float32))
    assert jnp.allclose(out2, ref2, atol=1e-2, rtol=1e-2), (
        float(jnp.max(jnp.abs(out2 - ref2))))

    print("KERNEL_OK")
</pallas_src>

<mosaic_0001>
module attributes {stable_mosaic.version = 11 : i64} {
  func.func @csp1_fused_kernel(%arg0: i32, %arg1: i32, %arg2: memref<1x16x16x4xf32, #tpu.memory_space<vmem>>, %arg3: memref<4x4xf32, #tpu.memory_space<vmem>>, %arg4: memref<1x4xf32, #tpu.memory_space<vmem>>, %arg5: memref<1x4xf32, #tpu.memory_space<vmem>>, %arg6: memref<4x4xf32, #tpu.memory_space<vmem>>, %arg7: memref<1x4xf32, #tpu.memory_space<vmem>>, %arg8: memref<1x4xf32, #tpu.memory_space<vmem>>, %arg9: memref<9x4x4xf32, #tpu.memory_space<vmem>>, %arg10: memref<1x4xf32, #tpu.memory_space<vmem>>, %arg11: memref<1x4xf32, #tpu.memory_space<vmem>>, %arg12: memref<4x4xf32, #tpu.memory_space<vmem>>, %arg13: memref<1x4xf32, #tpu.memory_space<vmem>>, %arg14: memref<1x4xf32, #tpu.memory_space<vmem>>, %arg15: memref<1x4xf32, #tpu.memory_space<vmem>>, %arg16: memref<1x4xf32, #tpu.memory_space<vmem>>, %arg17: memref<1x4xf32, #tpu.memory_space<vmem>>, %arg18: memref<4x8xf32, #tpu.memory_space<vmem>>, %arg19: memref<4x8xf32, #tpu.memory_space<vmem>>, %arg20: memref<1x128x8xf32, #tpu.memory_space<vmem>>, %arg21: memref<12x18x4xf32, #tpu.memory_space<vmem>>) attributes {dimension_semantics = [#tpu.dimension_semantics<parallel>, #tpu.dimension_semantics<parallel>], iteration_bounds = array<i64: 2, 2>, scalar_prefetch = 0 : i64, scratch_operands = 1 : i64, tpu.core_type = #tpu.core_type<tc>, window_params = [{transform_indices = @transform_0, window_bounds = array<i64: 1, 16, 16, 4>}, {pipeline_mode = #tpu.pipeline_mode<synchronous>, transform_indices = @transform_1, window_bounds = array<i64: 4, 4>}, {pipeline_mode = #tpu.pipeline_mode<synchronous>, transform_indices = @transform_2, window_bounds = array<i64: 1, 4>}, {pipeline_mode = #tpu.pipeline_mode<synchronous>, transform_indices = @transform_3, window_bounds = array<i64: 1, 4>}, {pipeline_mode = #tpu.pipeline_mode<synchronous>, transform_indices = @transform_4, window_bounds = array<i64: 4, 4>}, {pipeline_mode = #tpu.pipeline_mode<synchronous>, transform_indices = @transform_5, window_bounds = array<i64: 1, 4>}, {pipeline_mode = #tpu.pipeline_mode<synchronous>, transform_indices = @transform_6, window_bounds = array<i64: 1, 4>}, {pipeline_mode = #tpu.pipeline_mode<synchronous>, transform_indices = @transform_7, window_bounds = array<i64: 9, 4, 4>}, {pipeline_mode = #tpu.pipeline_mode<synchronous>, transform_indices = @transform_8, window_bounds = array<i64: 1, 4>}, {pipeline_mode = #tpu.pipeline_mode<synchronous>, transform_indices = @transform_9, window_bounds = array<i64: 1, 4>}, {pipeline_mode = #tpu.pipeline_mode<synchronous>, transform_indices = @transform_10, window_bounds = array<i64: 4, 4>}, {pipeline_mode = #tpu.pipeline_mode<synchronous>, transform_indices = @transform_11, window_bounds = array<i64: 1, 4>}, {pipeline_mode = #tpu.pipeline_mode<synchronous>, transform_indices = @transform_12, window_bounds = array<i64: 1, 4>}, {pipeline_mode = #tpu.pipeline_mode<synchronous>, transform_indices = @transform_13, window_bounds = array<i64: 1, 4>}, {pipeline_mode = #tpu.pipeline_mode<synchronous>, transform_indices = @transform_14, window_bounds = array<i64: 1, 4>}, {pipeline_mode = #tpu.pipeline_mode<synchronous>, transform_indices = @transform_15, window_bounds = array<i64: 1, 4>}, {pipeline_mode = #tpu.pipeline_mode<synchronous>, transform_indices = @transform_16, window_bounds = array<i64: 4, 8>}, {pipeline_mode = #tpu.pipeline_mode<synchronous>, transform_indices = @transform_17, window_bounds = array<i64: 4, 8>}, {transform_indices = @transform_18, window_bounds = array<i64: 1, 128, 8>}]} {
    %c8_i32 = arith.constant 8 : i32
    %0 = arith.muli %arg1, %c8_i32 : i32
    %c1_i32 = arith.constant 1 : i32
    %1 = arith.subi %0, %c1_i32 : i32
    %c0_i32 = arith.constant 0 : i32
    %2 = arith.maxsi %1, %c0_i32 : i32
    %c6_i32 = arith.constant 6 : i32
    %3 = arith.minsi %2, %c6_i32 : i32
    %4 = arith.subi %0, %3 : i32
    %c0 = arith.constant 0 : index
    %c0_0 = arith.constant 0 : index
    %5 = vector.load %arg3[%c0, %c0_0] : memref<4x4xf32, #tpu.memory_space<vmem>>, vector<4x4xf32>
    %c0_1 = arith.constant 0 : index
    %c0_2 = arith.constant 0 : index
    %6 = vector.load %arg6[%c0_1, %c0_2] : memref<4x4xf32, #tpu.memory_space<vmem>>, vector<4x4xf32>
    %c0_3 = arith.constant 0 : index
    %c0_4 = arith.constant 0 : index
    %c0_5 = arith.constant 0 : index
    %7 = vector.load %arg9[%c0_3, %c0_4, %c0_5] : memref<9x4x4xf32, #tpu.memory_space<vmem>>, vector<1x4x4xf32>
    %8 = vector.shape_cast %7 : vector<1x4x4xf32> to vector<4x4xf32>
    %c1 = arith.constant 1 : index
    %c0_6 = arith.constant 0 : index
    %c0_7 = arith.constant 0 : index
    %9 = vector.load %arg9[%c1, %c0_6, %c0_7] : memref<9x4x4xf32, #tpu.memory_space<vmem>>, vector<1x4x4xf32>
    %10 = vector.shape_cast %9 : vector<1x4x4xf32> to vector<4x4xf32>
    %c2 = arith.constant 2 : index
    %c0_8 = arith.constant 0 : index
    %c0_9 = arith.constant 0 : index
    %11 = vector.load %arg9[%c2, %c0_8, %c0_9] : memref<9x4x4xf32, #tpu.memory_space<vmem>>, vector<1x4x4xf32>
    %12 = vector.shape_cast %11 : vector<1x4x4xf32> to vector<4x4xf32>
    %c3 = arith.constant 3 : index
    %c0_10 = arith.constant 0 : index
    %c0_11 = arith.constant 0 : index
    %13 = vector.load %arg9[%c3, %c0_10, %c0_11] : memref<9x4x4xf32, #tpu.memory_space<vmem>>, vector<1x4x4xf32>
    %14 = vector.shape_cast %13 : vector<1x4x4xf32> to vector<4x4xf32>
    %c4 = arith.constant 4 : index
    %c0_12 = arith.constant 0 : index
    %c0_13 = arith.constant 0 : index
    %15 = vector.load %arg9[%c4, %c0_12, %c0_13] : memref<9x4x4xf32, #tpu.memory_space<vmem>>, vector<1x4x4xf32>
    %16 = vector.shape_cast %15 : vector<1x4x4xf32> to vector<4x4xf32>
    %c5 = arith.constant 5 : index
    %c0_14 = arith.constant 0 : index
    %c0_15 = arith.constant 0 : index
    %17 = vector.load %arg9[%c5, %c0_14, %c0_15] : memref<9x4x4xf32, #tpu.memory_space<vmem>>, vector<1x4x4xf32>
    %18 = vector.shape_cast %17 : vector<1x4x4xf32> to vector<4x4xf32>
    %c6 = arith.constant 6 : index
    %c0_16 = arith.constant 0 : index
    %c0_17 = arith.constant 0 : index
    %19 = vector.load %arg9[%c6, %c0_16, %c0_17] : memref<9x4x4xf32, #tpu.memory_space<vmem>>, vector<1x4x4xf32>
    %20 = vector.shape_cast %19 : vector<1x4x4xf32> to vector<4x4xf32>
    %c7 = arith.constant 7 : index
    %c0_18 = arith.constant 0 : index
    %c0_19 = arith.constant 0 : index
    %21 = vector.load %arg9[%c7, %c0_18, %c0_19] : memref<9x4x4xf32, #tpu.memory_space<vmem>>, vector<1x4x4xf32>
    %22 = vector.shape_cast %21 : vector<1x4x4xf32> to vector<4x4xf32>
    %c8 = arith.constant 8 : index
    %c0_20 = arith.constant 0 : index
    %c0_21 = arith.constant 0 : index
    %23 = vector.load %arg9[%c8, %c0_20, %c0_21] : memref<9x4x4xf32, #tpu.memory_space<vmem>>, vector<1x4x4xf32>
    %24 = vector.shape_cast %23 : vector<1x4x4xf32> to vector<4x4xf32>
    %c0_22 = arith.constant 0 : index
    %c0_23 = arith.constant 0 : index
    %25 = vector.load %arg12[%c0_22, %c0_23] : memref<4x4xf32, #tpu.memory_space<vmem>>, vector<4x4xf32>
    %c0_24 = arith.constant 0 : index
    %c0_25 = arith.constant 0 : index
    %26 = vector.load %arg18[%c0_24, %c0_25] : memref<4x8xf32, #tpu.memory_space<vmem>>, vector<4x8xf32>
    %c0_26 = arith.constant 0 : index
    %c0_27 = arith.constant 0 : index
    %27 = vector.load %arg19[%c0_26, %c0_27] : memref<4x8xf32, #tpu.memory_space<vmem>>, vector<4x8xf32>
    %c0_28 = arith.constant 0 : index
    %28 = arith.index_cast %3 : i32 to index
    %c0_29 = arith.constant 0 : index
    %c0_30 = arith.constant 0 : index
    %29 = vector.load %arg2[%c0_28, %28, %c0_29, %c0_30] : memref<1x16x16x4xf32, #tpu.memory_space<vmem>>, vector<1x10x16x4xf32>
    %30 = vector.shape_cast %29 : vector<1x10x16x4xf32> to vector<10x16x4xf32>
    %31 = vector.shape_cast %30 : vector<10x16x4xf32> to vector<160x4xf32>
    %c0_31 = arith.constant 0 : index
    %32 = arith.index_cast %0 : i32 to index
    %c0_32 = arith.constant 0 : index
    %c0_33 = arith.constant 0 : index
    %33 = vector.load %arg2[%c0_31, %32, %c0_32, %c0_33] : memref<1x16x16x4xf32, #tpu.memory_space<vmem>>, vector<1x8x16x4xf32>
    %34 = vector.shape_cast %33 : vector<1x8x16x4xf32> to vector<8x16x4xf32>
    %35 = vector.shape_cast %34 : vector<8x16x4xf32> to vector<128x4xf32>
    %cst = arith.constant dense<0.000000e+00> : vector<160x4xf32>
    %36 = tpu.matmul %31, %5, %cst {dimension_numbers = #tpu.dot_dimension_numbers<[1], [0], [0], [1], [0, 0, 1, 1], [], []>} : vector<160x4xf32>, vector<4x4xf32>, vector<160x4xf32> -> vector<160x4xf32>
    %c0_34 = arith.constant 0 : index
    %c0_35 = arith.constant 0 : index
    %37 = vector.load %arg4[%c0_34, %c0_35] : memref<1x4xf32, #tpu.memory_space<vmem>>, vector<1x4xf32>
    %38 = vector.broadcast %37 : vector<1x4xf32> to vector<160x4xf32>
    %39 = arith.mulf %36, %38 : vector<160x4xf32>
    %c0_36 = arith.constant 0 : index
    %c0_37 = arith.constant 0 : index
    %40 = vector.load %arg5[%c0_36, %c0_37] : memref<1x4xf32, #tpu.memory_space<vmem>>, vector<1x4xf32>
    %41 = vector.broadcast %40 : vector<1x4xf32> to vector<160x4xf32>
    %42 = arith.addf %39, %41 : vector<160x4xf32>
    %43 = arith.negf %42 : vector<160x4xf32>
    %44 = math.exp %43 : vector<160x4xf32>
    %cst_38 = arith.constant 1.000000e+00 : f32
    %45 = vector.broadcast %cst_38 : f32 to vector<160x4xf32>
    %46 = arith.addf %45, %44 : vector<160x4xf32>
    %47 = arith.divf %45, %46 : vector<160x4xf32>
    %48 = arith.mulf %42, %47 : vector<160x4xf32>
    %cst_39 = arith.constant 0.000000e+00 : f32
    %49 = vector.broadcast %cst_39 : f32 to vector<1x18x4xf32>
    %c0_40 = arith.constant 0 : index
    %c0_41 = arith.constant 0 : index
    %c0_42 = arith.constant 0 : index
    %50 = vector.load %arg21[%c0_40, %c0_41, %c0_42] : memref<12x18x4xf32, #tpu.memory_space<vmem>>, vector<1x18x4xf32>
    tpu.vector_store %arg21[%c0_40, %c0_41, %c0_42], %49 {strides = array<i32>} : memref<12x18x4xf32, #tpu.memory_space<vmem>>, vector<1x18x4xf32>,
    %cst_43 = arith.constant 0.000000e+00 : f32
    %51 = vector.broadcast %cst_43 : f32 to vector<1x18x4xf32>
    %c11 = arith.constant 11 : index
    %c0_44 = arith.constant 0 : index
    %c0_45 = arith.constant 0 : index
    %52 = vector.load %arg21[%c11, %c0_44, %c0_45] : memref<12x18x4xf32, #tpu.memory_space<vmem>>, vector<1x18x4xf32>
    tpu.vector_store %arg21[%c11, %c0_44, %c0_45], %51 {strides = array<i32>} : memref<12x18x4xf32, #tpu.memory_space<vmem>>, vector<1x18x4xf32>,
    %cst_46 = arith.constant 0.000000e+00 : f32
    %53 = vector.broadcast %cst_46 : f32 to vector<12x1x4xf32>
    %c0_47 = arith.constant 0 : index
    %c0_48 = arith.constant 0 : index
    %c0_49 = arith.constant 0 : index
    %54 = vector.load %arg21[%c0_47, %c0_48, %c0_49] : memref<12x18x4xf32, #tpu.memory_space<vmem>>, vector<12x1x4xf32>
    tpu.vector_store %arg21[%c0_47, %c0_48, %c0_49], %53 {strides = array<i32>} : memref<12x18x4xf32, #tpu.memory_space<vmem>>, vector<12x1x4xf32>,
    %cst_50 = arith.constant 0.000000e+00 : f32
    %55 = vector.broadcast %cst_50 : f32 to vector<12x1x4xf32>
    %c0_51 = arith.constant 0 : index
    %c17 = arith.constant 17 : index
    %c0_52 = arith.constant 0 : index
    %56 = vector.load %arg21[%c0_51, %c17, %c0_52] : memref<12x18x4xf32, #tpu.memory_space<vmem>>, vector<12x1x4xf32>
    tpu.vector_store %arg21[%c0_51, %c17, %c0_52], %55 {strides = array<i32>} : memref<12x18x4xf32, #tpu.memory_space<vmem>>, vector<12x1x4xf32>,
    %cst_53 = arith.constant dense<0.000000e+00> : vector<160x4xf32>
    %57 = tpu.matmul %48, %6, %cst_53 {dimension_numbers = #tpu.dot_dimension_numbers<[1], [0], [0], [1], [0, 0, 1, 1], [], []>} : vector<160x4xf32>, vector<4x4xf32>, vector<160x4xf32> -> vector<160x4xf32>
    %c0_54 = arith.constant 0 : index
    %c0_55 = arith.constant 0 : index
    %58 = vector.load %arg7[%c0_54, %c0_55] : memref<1x4xf32, #tpu.memory_space<vmem>>, vector<1x4xf32>
    %59 = vector.broadcast %58 : vector<1x4xf32> to vector<160x4xf32>
    %60 = arith.mulf %57, %59 : vector<160x4xf32>
    %c0_56 = arith.constant 0 : index
    %c0_57 = arith.constant 0 : index
    %61 = vector.load %arg8[%c0_56, %c0_57] : memref<1x4xf32, #tpu.memory_space<vmem>>, vector<1x4xf32>
    %62 = vector.broadcast %61 : vector<1x4xf32> to vector<160x4xf32>
    %63 = arith.addf %60, %62 : vector<160x4xf32>
    %64 = arith.negf %63 : vector<160x4xf32>
    %65 = math.exp %64 : vector<160x4xf32>
    %cst_58 = arith.constant 1.000000e+00 : f32
    %66 = vector.broadcast %cst_58 : f32 to vector<160x4xf32>
    %67 = arith.addf %66, %65 : vector<160x4xf32>
    %68 = arith.divf %66, %67 : vector<160x4xf32>
    %69 = arith.mulf %63, %68 : vector<160x4xf32>
    %70 = vector.shape_cast %69 : vector<160x4xf32> to vector<10x16x4xf32>
    %c1_59 = arith.constant 1 : index
    %c1_60 = arith.constant 1 : index
    %c0_61 = arith.constant 0 : index
    %71 = vector.load %arg21[%c1_59, %c1_60, %c0_61] : memref<12x18x4xf32, #tpu.memory_space<vmem>>, vector<10x16x4xf32>
    tpu.vector_store %arg21[%c1_59, %c1_60, %c0_61], %70 {strides = array<i32>} : memref<12x18x4xf32, #tpu.memory_space<vmem>>, vector<10x16x4xf32>,
    %cst_62 = arith.constant 0.000000e+00 : f32
    %72 = vector.broadcast %cst_62 : f32 to vector<128x4xf32>
    %c0_i32_63 = arith.constant 0 : i32
    %73 = arith.addi %4, %c0_i32_63 : i32
    %74 = arith.index_cast %73 : i32 to index
    %c0_64 = arith.constant 0 : index
    %c0_65 = arith.constant 0 : index
    %75 = vector.load %arg21[%74, %c0_64, %c0_65] : memref<12x18x4xf32, #tpu.memory_space<vmem>>, vector<8x16x4xf32>
    %76 = vector.shape_cast %75 : vector<8x16x4xf32> to vector<128x4xf32>
    %cst_66 = arith.constant dense<0.000000e+00> : vector<128x4xf32>
    %77 = tpu.matmul %76, %8, %cst_66 {dimension_numbers = #tpu.dot_dimension_numbers<[1], [0], [0], [1], [0, 0, 1, 1], [], []>} : vector<128x4xf32>, vector<4x4xf32>, vector<128x4xf32> -> vector<128x4xf32>
    %78 = arith.addf %72, %77 : vector<128x4xf32>
    %c0_i32_67 = arith.constant 0 : i32
    %79 = arith.addi %4, %c0_i32_67 : i32
    %80 = arith.index_cast %79 : i32 to index
    %c1_68 = arith.constant 1 : index
    %c0_69 = arith.constant 0 : index
    %81 = vector.load %arg21[%80, %c1_68, %c0_69] : memref<12x18x4xf32, #tpu.memory_space<vmem>>, vector<8x16x4xf32>
    %82 = vector.shape_cast %81 : vector<8x16x4xf32> to vector<128x4xf32>
    %cst_70 = arith.constant dense<0.000000e+00> : vector<128x4xf32>
    %83 = tpu.matmul %82, %10, %cst_70 {dimension_numbers = #tpu.dot_dimension_numbers<[1], [0], [0], [1], [0, 0, 1, 1], [], []>} : vector<128x4xf32>, vector<4x4xf32>, vector<128x4xf32> -> vector<128x4xf32>
    %84 = arith.addf %78, %83 : vector<128x4xf32>
    %c0_i32_71 = arith.constant 0 : i32
    %85 = arith.addi %4, %c0_i32_71 : i32
    %86 = arith.index_cast %85 : i32 to index
    %c2_72 = arith.constant 2 : index
    %c0_73 = arith.constant 0 : index
    %87 = vector.load %arg21[%86, %c2_72, %c0_73] : memref<12x18x4xf32, #tpu.memory_space<vmem>>, vector<8x16x4xf32>
    %88 = vector.shape_cast %87 : vector<8x16x4xf32> to vector<128x4xf32>
    %cst_74 = arith.constant dense<0.000000e+00> : vector<128x4xf32>
    %89 = tpu.matmul %88, %12, %cst_74 {dimension_numbers = #tpu.dot_dimension_numbers<[1], [0], [0], [1], [0, 0, 1, 1], [], []>} : vector<128x4xf32>, vector<4x4xf32>, vector<128x4xf32> -> vector<128x4xf32>
    %90 = arith.addf %84, %89 : vector<128x4xf32>
    %c1_i32_75 = arith.constant 1 : i32
    %91 = arith.addi %4, %c1_i32_75 : i32
    %92 = arith.index_cast %91 : i32 to index
    %c0_76 = arith.constant 0 : index
    %c0_77 = arith.constant 0 : index
    %93 = vector.load %arg21[%92, %c0_76, %c0_77] : memref<12x18x4xf32, #tpu.memory_space<vmem>>, vector<8x16x4xf32>
    %94 = vector.shape_cast %93 : vector<8x16x4xf32> to vector<128x4xf32>
    %cst_78 = arith.constant dense<0.000000e+00> : vector<128x4xf32>
    %95 = tpu.matmul %94, %14, %cst_78 {dimension_numbers = #tpu.dot_dimension_numbers<[1], [0], [0], [1], [0, 0, 1, 1], [], []>} : vector<128x4xf32>, vector<4x4xf32>, vector<128x4xf32> -> vector<128x4xf32>
    %96 = arith.addf %90, %95 : vector<128x4xf32>
    %c1_i32_79 = arith.constant 1 : i32
    %97 = arith.addi %4, %c1_i32_79 : i32
    %98 = arith.index_cast %97 : i32 to index
    %c1_80 = arith.constant 1 : index
    %c0_81 = arith.constant 0 : index
    %99 = vector.load %arg21[%98, %c1_80, %c0_81] : memref<12x18x4xf32, #tpu.memory_space<vmem>>, vector<8x16x4xf32>
    %100 = vector.shape_cast %99 : vector<8x16x4xf32> to vector<128x4xf32>
    %cst_82 = arith.constant dense<0.000000e+00> : vector<128x4xf32>
    %101 = tpu.matmul %100, %16, %cst_82 {dimension_numbers = #tpu.dot_dimension_numbers<[1], [0], [0], [1], [0, 0, 1, 1], [], []>} : vector<128x4xf32>, vector<4x4xf32>, vector<128x4xf32> -> vector<128x4xf32>
    %102 = arith.addf %96, %101 : vector<128x4xf32>
    %c1_i32_83 = arith.constant 1 : i32
    %103 = arith.addi %4, %c1_i32_83 : i32
    %104 = arith.index_cast %103 : i32 to index
    %c2_84 = arith.constant 2 : index
    %c0_85 = arith.constant 0 : index
    %105 = vector.load %arg21[%104, %c2_84, %c0_85] : memref<12x18x4xf32, #tpu.memory_space<vmem>>, vector<8x16x4xf32>
    %106 = vector.shape_cast %105 : vector<8x16x4xf32> to vector<128x4xf32>
    %cst_86 = arith.constant dense<0.000000e+00> : vector<128x4xf32>
    %107 = tpu.matmul %106, %18, %cst_86 {dimension_numbers = #tpu.dot_dimension_numbers<[1], [0], [0], [1], [0, 0, 1, 1], [], []>} : vector<128x4xf32>, vector<4x4xf32>, vector<128x4xf32> -> vector<128x4xf32>
    %108 = arith.addf %102, %107 : vector<128x4xf32>
    %c2_i32 = arith.constant 2 : i32
    %109 = arith.addi %4, %c2_i32 : i32
    %110 = arith.index_cast %109 : i32 to index
    %c0_87 = arith.constant 0 : index
    %c0_88 = arith.constant 0 : index
    %111 = vector.load %arg21[%110, %c0_87, %c0_88] : memref<12x18x4xf32, #tpu.memory_space<vmem>>, vector<8x16x4xf32>
    %112 = vector.shape_cast %111 : vector<8x16x4xf32> to vector<128x4xf32>
    %cst_89 = arith.constant dense<0.000000e+00> : vector<128x4xf32>
    %113 = tpu.matmul %112, %20, %cst_89 {dimension_numbers = #tpu.dot_dimension_numbers<[1], [0], [0], [1], [0, 0, 1, 1], [], []>} : vector<128x4xf32>, vector<4x4xf32>, vector<128x4xf32> -> vector<128x4xf32>
    %114 = arith.addf %108, %113 : vector<128x4xf32>
    %c2_i32_90 = arith.constant 2 : i32
    %115 = arith.addi %4, %c2_i32_90 : i32
    %116 = arith.index_cast %115 : i32 to index
    %c1_91 = arith.constant 1 : index
    %c0_92 = arith.constant 0 : index
    %117 = vector.load %arg21[%116, %c1_91, %c0_92] : memref<12x18x4xf32, #tpu.memory_space<vmem>>, vector<8x16x4xf32>
    %118 = vector.shape_cast %117 : vector<8x16x4xf32> to vector<128x4xf32>
    %cst_93 = arith.constant dense<0.000000e+00> : vector<128x4xf32>
    %119 = tpu.matmul %118, %22, %cst_93 {dimension_numbers = #tpu.dot_dimension_numbers<[1], [0], [0], [1], [0, 0, 1, 1], [], []>} : vector<128x4xf32>, vector<4x4xf32>, vector<128x4xf32> -> vector<128x4xf32>
    %120 = arith.addf %114, %119 : vector<128x4xf32>
    %c2_i32_94 = arith.constant 2 : i32
    %121 = arith.addi %4, %c2_i32_94 : i32
    %122 = arith.index_cast %121 : i32 to index
    %c2_95 = arith.constant 2 : index
    %c0_96 = arith.constant 0 : index
    %123 = vector.load %arg21[%122, %c2_95, %c0_96] : memref<12x18x4xf32, #tpu.memory_space<vmem>>, vector<8x16x4xf32>
    %124 = vector.shape_cast %123 : vector<8x16x4xf32> to vector<128x4xf32>
    %cst_97 = arith.constant dense<0.000000e+00> : vector<128x4xf32>
    %125 = tpu.matmul %124, %24, %cst_97 {dimension_numbers = #tpu.dot_dimension_numbers<[1], [0], [0], [1], [0, 0, 1, 1], [], []>} : vector<128x4xf32>, vector<4x4xf32>, vector<128x4xf32> -> vector<128x4xf32>
    %126 = arith.addf %120, %125 : vector<128x4xf32>
    %c0_98 = arith.constant 0 : index
    %c0_99 = arith.constant 0 : index
    %127 = vector.load %arg10[%c0_98, %c0_99] : memref<1x4xf32, #tpu.memory_space<vmem>>, vector<1x4xf32>
    %128 = vector.broadcast %127 : vector<1x4xf32> to vector<128x4xf32>
    %129 = arith.mulf %126, %128 : vector<128x4xf32>
    %c0_100 = arith.constant 0 : index
    %c0_101 = arith.constant 0 : index
    %130 = vector.load %arg11[%c0_100, %c0_101] : memref<1x4xf32, #tpu.memory_space<vmem>>, vector<1x4xf32>
    %131 = vector.broadcast %130 : vector<1x4xf32> to vector<128x4xf32>
    %132 = arith.addf %129, %131 : vector<128x4xf32>
    %133 = arith.negf %132 : vector<128x4xf32>
    %134 = math.exp %133 : vector<128x4xf32>
    %cst_102 = arith.constant 1.000000e+00 : f32
    %135 = vector.broadcast %cst_102 : f32 to vector<128x4xf32>
    %136 = arith.addf %135, %134 : vector<128x4xf32>
    %137 = arith.divf %135, %136 : vector<128x4xf32>
    %138 = arith.mulf %132, %137 : vector<128x4xf32>
    %cst_103 = arith.constant dense<0.000000e+00> : vector<128x4xf32>
    %139 = tpu.matmul %35, %5, %cst_103 {dimension_numbers = #tpu.dot_dimension_numbers<[1], [0], [0], [1], [0, 0, 1, 1], [], []>} : vector<128x4xf32>, vector<4x4xf32>, vector<128x4xf32> -> vector<128x4xf32>
    %c0_104 = arith.constant 0 : index
    %c0_105 = arith.constant 0 : index
    %140 = vector.load %arg4[%c0_104, %c0_105] : memref<1x4xf32, #tpu.memory_space<vmem>>, vector<1x4xf32>
    %141 = vector.broadcast %140 : vector<1x4xf32> to vector<128x4xf32>
    %142 = arith.mulf %139, %141 : vector<128x4xf32>
    %c0_106 = arith.constant 0 : index
    %c0_107 = arith.constant 0 : index
    %143 = vector.load %arg5[%c0_106, %c0_107] : memref<1x4xf32, #tpu.memory_space<vmem>>, vector<1x4xf32>
    %144 = vector.broadcast %143 : vector<1x4xf32> to vector<128x4xf32>
    %145 = arith.addf %142, %144 : vector<128x4xf32>
    %146 = arith.negf %145 : vector<128x4xf32>
    %147 = math.exp %146 : vector<128x4xf32>
    %cst_108 = arith.constant 1.000000e+00 : f32
    %148 = vector.broadcast %cst_108 : f32 to vector<128x4xf32>
    %149 = arith.addf %148, %147 : vector<128x4xf32>
    %150 = arith.divf %148, %149 : vector<128x4xf32>
    %151 = arith.mulf %145, %150 : vector<128x4xf32>
    %152 = arith.addf %151, %138 : vector<128x4xf32>
    %cst_109 = arith.constant dense<0.000000e+00> : vector<128x4xf32>
    %153 = tpu.matmul %35, %25, %cst_109 {dimension_numbers = #tpu.dot_dimension_numbers<[1], [0], [0], [1], [0, 0, 1, 1], [], []>} : vector<128x4xf32>, vector<4x4xf32>, vector<128x4xf32> -> vector<128x4xf32>
    %c0_110 = arith.constant 0 : index
    %c0_111 = arith.constant 0 : index
    %154 = vector.load %arg13[%c0_110, %c0_111] : memref<1x4xf32, #tpu.memory_space<vmem>>, vector<1x4xf32>
    %155 = vector.broadcast %154 : vector<1x4xf32> to vector<128x4xf32>
    %156 = arith.addf %153, %155 : vector<128x4xf32>
    %c0_112 = arith.constant 0 : index
    %c0_113 = arith.constant 0 : index
    %157 = vector.load %arg14[%c0_112, %c0_113] : memref<1x4xf32, #tpu.memory_space<vmem>>, vector<1x4xf32>
    %158 = vector.broadcast %157 : vector<1x4xf32> to vector<128x4xf32>
    %159 = arith.mulf %152, %158 : vector<128x4xf32>
    %c0_114 = arith.constant 0 : index
    %c0_115 = arith.constant 0 : index
    %160 = vector.load %arg15[%c0_114, %c0_115] : memref<1x4xf32, #tpu.memory_space<vmem>>, vector<1x4xf32>
    %161 = vector.broadcast %160 : vector<1x4xf32> to vector<128x4xf32>
    %162 = arith.addf %159, %161 : vector<128x4xf32>
    %cst_116 = arith.constant 0.000000e+00 : f32
    %163 = vector.broadcast %cst_116 : f32 to vector<128x4xf32>
    %164 = arith.cmpf ogt, %162, %163 : vector<128x4xf32>
    %cst_117 = arith.constant 0.00999999977 : f32
    %165 = vector.broadcast %cst_117 : f32 to vector<128x4xf32>
    %166 = arith.mulf %165, %162 : vector<128x4xf32>
    %167 = arith.select %164, %162, %166 : vector<128x4xi1>, vector<128x4xf32>
    %cst_118 = arith.constant dense<0.000000e+00> : vector<128x8xf32>
    %168 = tpu.matmul %167, %26, %cst_118 {dimension_numbers = #tpu.dot_dimension_numbers<[1], [0], [0], [1], [0, 0, 1, 1], [], []>} : vector<128x4xf32>, vector<4x8xf32>, vector<128x8xf32> -> vector<128x8xf32>
    %c0_119 = arith.constant 0 : index
    %c0_120 = arith.constant 0 : index
    %169 = vector.load %arg16[%c0_119, %c0_120] : memref<1x4xf32, #tpu.memory_space<vmem>>, vector<1x4xf32>
    %170 = vector.broadcast %169 : vector<1x4xf32> to vector<128x4xf32>
    %171 = arith.mulf %156, %170 : vector<128x4xf32>
    %c0_121 = arith.constant 0 : index
    %c0_122 = arith.constant 0 : index
    %172 = vector.load %arg17[%c0_121, %c0_122] : memref<1x4xf32, #tpu.memory_space<vmem>>, vector<1x4xf32>
    %173 = vector.broadcast %172 : vector<1x4xf32> to vector<128x4xf32>
    %174 = arith.addf %171, %173 : vector<128x4xf32>
    %cst_123 = arith.constant 0.000000e+00 : f32
    %175 = vector.broadcast %cst_123 : f32 to vector<128x4xf32>
    %176 = arith.cmpf ogt, %174, %175 : vector<128x4xf32>
    %cst_124 = arith.constant 0.00999999977 : f32
    %177 = vector.broadcast %cst_124 : f32 to vector<128x4xf32>
    %178 = arith.mulf %177, %174 : vector<128x4xf32>
    %179 = arith.select %176, %174, %178 : vector<128x4xi1>, vector<128x4xf32>
    %cst_125 = arith.constant dense<0.000000e+00> : vector<128x8xf32>
    %180 = tpu.matmul %179, %27, %cst_125 {dimension_numbers = #tpu.dot_dimension_numbers<[1], [0], [0], [1], [0, 0, 1, 1], [], []>} : vector<128x4xf32>, vector<4x8xf32>, vector<128x8xf32> -> vector<128x8xf32>
    %181 = arith.addf %168, %180 : vector<128x8xf32>
    %c0_126 = arith.constant 0 : index
    %c0_127 = arith.constant 0 : index
    %c0_128 = arith.constant 0 : index
    %182 = vector.load %arg20[%c0_126, %c0_127, %c0_128] : memref<1x128x8xf32, #tpu.memory_space<vmem>>, vector<1x128x8xf32>
    %183 = vector.shape_cast %182 : vector<1x128x8xf32> to vector<128x8xf32>
    %184 = vector.shape_cast %181 : vector<128x8xf32> to vector<1x128x8xf32>
    tpu.vector_store %arg20[%c0_126, %c0_127, %c0_128], %184 {strides = array<i32>} : memref<1x128x8xf32, #tpu.memory_space<vmem>>, vector<1x128x8xf32>,
    return
  }
  func.func @transform_0(%arg0: i32, %arg1: i32) -> (i32, i32, i32, i32) {
    %c0_i32 = arith.constant 0 : i32
    %c0_i32_0 = arith.constant 0 : i32
    %c0_i32_1 = arith.constant 0 : i32
    %c0_i32_2 = arith.constant 0 : i32
    return %arg0, %c0_i32, %c0_i32_0, %c0_i32_1 : i32, i32, i32, i32
  }
  func.func @transform_1(%arg0: i32, %arg1: i32) -> (i32, i32) {
    %c0_i32 = arith.constant 0 : i32
    %c0_i32_0 = arith.constant 0 : i32
    %c0_i32_1 = arith.constant 0 : i32
    return %c0_i32, %c0_i32_0 : i32, i32
  }
  func.func @transform_2(%arg0: i32, %arg1: i32) -> (i32, i32) {
    %c0_i32 = arith.constant 0 : i32
    %c0_i32_0 = arith.constant 0 : i32
    %c0_i32_1 = arith.constant 0 : i32
    return %c0_i32, %c0_i32_0 : i32, i32
  }
  func.func @transform_3(%arg0: i32, %arg1: i32) -> (i32, i32) {
    %c0_i32 = arith.constant 0 : i32
    %c0_i32_0 = arith.constant 0 : i32
    %c0_i32_1 = arith.constant 0 : i32
    return %c0_i32, %c0_i32_0 : i32, i32
  }
  func.func @transform_4(%arg0: i32, %arg1: i32) -> (i32, i32) {
    %c0_i32 = arith.constant 0 : i32
    %c0_i32_0 = arith.constant 0 : i32
    %c0_i32_1 = arith.constant 0 : i32
    return %c0_i32, %c0_i32_0 : i32, i32
  }
  func.func @transform_5(%arg0: i32, %arg1: i32) -> (i32, i32) {
    %c0_i32 = arith.constant 0 : i32
    %c0_i32_0 = arith.constant 0 : i32
    %c0_i32_1 = arith.constant 0 : i32
    return %c0_i32, %c0_i32_0 : i32, i32
  }
  func.func @transform_6(%arg0: i32, %arg1: i32) -> (i32, i32) {
    %c0_i32 = arith.constant 0 : i32
    %c0_i32_0 = arith.constant 0 : i32
    %c0_i32_1 = arith.constant 0 : i32
    return %c0_i32, %c0_i32_0 : i32, i32
  }
  func.func @transform_7(%arg0: i32, %arg1: i32) -> (i32, i32, i32) {
    %c0_i32 = arith.constant 0 : i32
    %c0_i32_0 = arith.constant 0 : i32
    %c0_i32_1 = arith.constant 0 : i32
    %c0_i32_2 = arith.constant 0 : i32
    return %c0_i32, %c0_i32_0, %c0_i32_1 : i32, i32, i32
  }
  func.func @transform_8(%arg0: i32, %arg1: i32) -> (i32, i32) {
    %c0_i32 = arith.constant 0 : i32
    %c0_i32_0 = arith.constant 0 : i32
    %c0_i32_1 = arith.constant 0 : i32
    return %c0_i32, %c0_i32_0 : i32, i32
  }
  func.func @transform_9(%arg0: i32, %arg1: i32) -> (i32, i32) {
    %c0_i32 = arith.constant 0 : i32
    %c0_i32_0 = arith.constant 0 : i32
    %c0_i32_1 = arith.constant 0 : i32
    return %c0_i32, %c0_i32_0 : i32, i32
  }
  func.func @transform_10(%arg0: i32, %arg1: i32) -> (i32, i32) {
    %c0_i32 = arith.constant 0 : i32
    %c0_i32_0 = arith.constant 0 : i32
    %c0_i32_1 = arith.constant 0 : i32
    return %c0_i32, %c0_i32_0 : i32, i32
  }
  func.func @transform_11(%arg0: i32, %arg1: i32) -> (i32, i32) {
    %c0_i32 = arith.constant 0 : i32
    %c0_i32_0 = arith.constant 0 : i32
    %c0_i32_1 = arith.constant 0 : i32
    return %c0_i32, %c0_i32_0 : i32, i32
  }
  func.func @transform_12(%arg0: i32, %arg1: i32) -> (i32, i32) {
    %c0_i32 = arith.constant 0 : i32
    %c0_i32_0 = arith.constant 0 : i32
    %c0_i32_1 = arith.constant 0 : i32
    return %c0_i32, %c0_i32_0 : i32, i32
  }
  func.func @transform_13(%arg0: i32, %arg1: i32) -> (i32, i32) {
    %c0_i32 = arith.constant 0 : i32
    %c0_i32_0 = arith.constant 0 : i32
    %c0_i32_1 = arith.constant 0 : i32
    return %c0_i32, %c0_i32_0 : i32, i32
  }
  func.func @transform_14(%arg0: i32, %arg1: i32) -> (i32, i32) {
    %c0_i32 = arith.constant 0 : i32
    %c0_i32_0 = arith.constant 0 : i32
    %c0_i32_1 = arith.constant 0 : i32
    return %c0_i32, %c0_i32_0 : i32, i32
  }
  func.func @transform_15(%arg0: i32, %arg1: i32) -> (i32, i32) {
    %c0_i32 = arith.constant 0 : i32
    %c0_i32_0 = arith.constant 0 : i32
    %c0_i32_1 = arith.constant 0 : i32
    return %c0_i32, %c0_i32_0 : i32, i32
  }
  func.func @transform_16(%arg0: i32, %arg1: i32) -> (i32, i32) {
    %c0_i32 = arith.constant 0 : i32
    %c0_i32_0 = arith.constant 0 : i32
    %c0_i32_1 = arith.constant 0 : i32
    return %c0_i32, %c0_i32_0 : i32, i32
  }
  func.func @transform_17(%arg0: i32, %arg1: i32) -> (i32, i32) {
    %c0_i32 = arith.constant 0 : i32
    %c0_i32_0 = arith.constant 0 : i32
    %c0_i32_1 = arith.constant 0 : i32
    return %c0_i32, %c0_i32_0 : i32, i32
  }
  func.func @transform_18(%arg0: i32, %arg1: i32) -> (i32, i32, i32) {
    %c0_i32 = arith.constant 0 : i32
    %c0_i32_0 = arith.constant 0 : i32
    return %arg0, %arg1, %c0_i32 : i32, i32, i32
  }
}

</mosaic_0001>

<bundles_post_ra>
// kernel: tpu_custom_call.1
= control target key start
LH: loop header
LB: loop body
LE: loop exit
PB: predicated region body
PF: predicated region fallthrough
CT: control target
= control target key end

     0   :  { %s6579_s27 = smov 0   ;;  %s6581_s28 = smov 0   ;;  %s8214_s0 = inlined_call_operand.vmem [shape: f32[2,16,16,4], index: 0, kind: input, shape index: {}]   ;;  %s8215_s1 = inlined_call_operand.vmem [shape: f32[4,4], index: 1, kind: input, shape index: {}]   ;;  %s8216_s2 = inlined_call_operand.vmem [shape: f32[1,4], index: 2, kind: input, shape index: {}]   ;;  %s8217_s3 = inlined_call_operand.vmem [shape: f32[1,4], index: 3, kind: input, shape index: {}]   ;;  %s8218_s4 = inlined_call_operand.vmem [shape: f32[4,4], index: 4, kind: input, shape index: {}]   ;;  %s8219_s5 = inlined_call_operand.vmem [shape: f32[1,4], index: 5, kind: input, shape index: {}]   ;;  %s8220_s6 = inlined_call_operand.vmem [shape: f32[1,4], index: 6, kind: input, shape index: {}]   ;;  %s8221_s7 = inlined_call_operand.vmem [shape: f32[9,4,4], index: 7, kind: input, shape index: {}]   ;;  %s8222_s8 = inlined_call_operand.vmem [shape: f32[1,4], index: 8, kind: input, shape index: {}]   ;;  %s8223_s9 = inlined_call_operand.vmem [shape: f32[1,4], index: 9, kind: input, shape index: {}]   ;;  %s8224_s10 = inlined_call_operand.vmem [shape: f32[4,4], index: 10, kind: input, shape index: {}]   ;;  %s8225_s11 = inlined_call_operand.vmem [shape: f32[1,4], index: 11, kind: input, shape index: {}]   ;;  %s8226_s12 = inlined_call_operand.vmem [shape: f32[1,4], index: 12, kind: input, shape index: {}]   ;;  %s8227_s13 = inlined_call_operand.vmem [shape: f32[1,4], index: 13, kind: input, shape index: {}]   ;;  %s8228_s14 = inlined_call_operand.vmem [shape: f32[1,4], index: 14, kind: input, shape index: {}]   ;;  %s8229_s15 = inlined_call_operand.vmem [shape: f32[1,4], index: 15, kind: input, shape index: {}]   ;;  %s8230_s16 = inlined_call_operand.vmem [shape: f32[4,8], index: 16, kind: input, shape index: {}]   ;;  %s8231_s17 = inlined_call_operand.vmem [shape: f32[4,8], index: 17, kind: input, shape index: {}]   ;;  %s8232_s18 = inlined_call_operand.vmem [shape: f32[2,256,8], index: 18, kind: output, shape index: {}]  }
   0x1   :  { %8236 = sst [smem:[#allocation6_spill]] %s8214_s0  ;;  %s6583_s29 = smov 0  }
   0x2   :  { %8237 = sst [smem:[#allocation7_spill]] %s8215_s1  ;;  %s6585_s30 = smov 0  }
   0x3   :  { %8238 = sst [smem:[#allocation8_spill]] %s8216_s2  ;;  %s6587_s0 = smov 0  }
   0x4 LB: > { %8239 = sst [smem:[#allocation3_spill]] %s6477_s30  ;;  %s37_s19 = sadd.s32 1, %s6473_s29  ;;  %s6481_s0 = sphi %s6587_s0, %s28_s0   ;;  %s6477_s30 = sphi %s6585_s30, %s8247_s30   ;;  %s6473_s29 = sphi %s6583_s29, %s8249_s29   ;;  %s6469_s28 = sphi %s6581_s28, %s8245_s28   ;;  %s6465_s27 = sphi %s6579_s27, %s8248_s27  }
   0x5   : > { %s40_s1 = sadd.s32 1, %s6477_s30  ;;  %p38_p0 = scmp.ge.s32.totalorder %s37_s19, 2 }
   0x6   : > { %p4973_p1 = scmp.ge.s32.totalorder %s6481_s0, 1  ;;  %p526_p2 = scmp.lt.s32.totalorder %s6481_s0, 5 }
   0x7   : > { %s8251_s19 = smov (%p38_p0, %s37_s19), 0  ;;  %s8253_s1 = smov (!%p38_p0, %s40_s1), %s6477_s30 }
   0x8   : > { %8240 = sst [smem:[#allocation4_spill]] %s8251_s19  ;;  %p527_p3 = pnand %p4973_p1, %p526_p2 }
   0x9   : > { %p42_p4 = scmp.ge.s32.totalorder %s8253_s1, 2  ;;  %s8242_s22 = sld [smem:[#allocation7_spill]] (!%p527_p3) }
   0xa   : > { %530 = sbr.rel (%p527_p3) target bundleno = 1191 (0x4a7), region = 92  ;;  %p584_p5 = scmp.lt.s32.totalorder (!%p527_p3), %s6469_s28, 1 }
   0xb   : > { %s8255_s1 = smov (%p42_p4, %s8253_s1), 0  ;;  %s4979_s2 = sshll.u32 (!%p527_p3), %s6465_s27, 3 }
   0xc   : > { %8241 = sst [smem:[#allocation5_spill]] %s8255_s1  ;;  %s4980_s23 = sadd.s32 (!%p527_p3), 4294967295, %s4979_s2 }
   0xd   : > { %p601_p6 = scmp.gt.s32.totalorder (!%p527_p3), %s4980_s23, 0  ;;  %p4981_p7 = scmp.lt.s32.totalorder (!%p527_p3), %s4980_s23, 6 }
   0xe   : > { %s8243_s20 = sld [smem:[#allocation6_spill]] (!%p527_p3) }
   0xf   : > { %v606_v0 = vld [vmem:[%s8242_s22] sm:$0xf]  ;;  %vm729_vm0 = vcmask 1043456   ;;  %s8257_s28 = smov (!%p584_p5, %s6469_s28), 1  ;;  %s8259_s23 = smov (!%p601_p6, %s4980_s23), 0  ;;  %vm668_vm1 = vcmask 31744  }
  0x10   : > { %5709 = vmatprep.subr.msk.mxu0 %vm729_vm0, %v606_v0  ;;  %6111 = vmatprep.subr.msk.mxu1 %vm729_vm0, %v606_v0  ;;  %s5442_s24 = sshll.u32 %s8257_s28, 8  ;;  %s8261_s23 = smov (!%p4981_p7, %s8259_s23), 6  ;;  %v607_v21 = vld [vmem:[%s8218_s4] sm:$0xf]  ;;  %vm1094_vm2 = vcmask 25600   ;;  %vm1100_vm3 = vcmask 24576  }
  0x11   : > { %5710 = vmatpush3.msk.msra.mxu0 %vm729_vm0, %v606_v0  ;;  %6112 = vmatpush3.msk.msra.mxu1 %vm729_vm0, %v606_v0  ;;  %s6627_s1 = ssub.s32 %s4979_s2, %s8261_s23  ;;  %s4994_s19 = sshll.u32 %s8261_s23, 4  ;;  %v6685_v24 = vld [vmem:[%s8217_s3] ss:$0 sm:$0xff] }
  0x12   : > { %5741 = vmatprep.subr.msk.mxu1 %vm729_vm0, %v607_v21  ;;  %s8244_s25 = sld [smem:[#allocation8_spill]]  ;;  %s1568_s26 = smul.u32 24, %s6627_s1 }
  0x13   : > { %s5445_s1 = sshll.u32 %s6465_s27, 7  ;;  %s4976_s23 = sshll.u32 %s6465_s27, 4 }
  0x14   : > { %s6625_s21 = scalar_lea.vmem %s8243_s20, %s5442_s24  ;;  %s7030_s20 = scalar_lea.vmem [#allocation2], %s1568_s26 }
  0x15   : > { %s6630_s30 = scalar_lea.vmem %s6625_s21, %s4994_s19  ;;  %p592_p8 = scmp.lt.s32.totalorder %s4976_s23, 31 }
  0x16   : > { %v630_v1 = vld [vmem:[%s6630_s30] sm:$0xff]  ;;  %v631_v3 = vld [vmem:[%s6630_s30 + $0x8] sm:$0xff]  ;;  %v632_v5 = vld [vmem:[%s6630_s30 + $0x10] sm:$0xff]  ;;  %s4977_s24 = sshll.u32 %s8257_s28, 5 }
  0x17   : > { %v642_v2 = vld [vmem:[%s6630_s30 + $0x60] sm:$0xff]  ;;  %5711 = vmatprep.mubr.msk.f32.mxu0 %vm668_vm1, %v630_v1  ;;  %v643_v4 = vld [vmem:[%s6630_s30 + $0x68] sm:$0xff]  ;;  %v644_v6 = vld [vmem:[%s6630_s30 + $0x70] sm:$0xff]  ;;  %s8263_s23 = smov (!%p592_p8, %s4976_s23), 31 }
  0x18   : > { %5729 = vmatprep.mubr.msk.f32.mxu1 %vm668_vm1, %v642_v2  ;;  %5712 = vmatmul.mubr.msk.f32.vlgmr.msra.gmra.mxu0 %vm668_vm1, %v631_v3  ;;  %v633_v7 = vld [vmem:[%s6630_s30 + $0x18] sm:$0xff]  ;;  %v634_v9 = vld [vmem:[%s6630_s30 + $0x20] sm:$0xff]  ;;  %v635_v11 = vld [vmem:[%s6630_s30 + $0x28] sm:$0xff]  ;;  %s595_s26 = sadd.s32 %s4977_s24, %s8263_s23 }
  0x19   : > { %5730 = vmatmul.mubr.msk.f32.vlgmr.msra.gmra.mxu1 %vm668_vm1, %v643_v4  ;;  %5714 = vmatprep.mubr.msk.f32.mxu0 %vm668_vm1, %v632_v5  ;;  %v645_v8 = vld [vmem:[%s6630_s30 + $0x78] sm:$0xff]  ;;  %v646_v10 = vld [vmem:[%s6630_s30 + $0x80] sm:$0xff]  ;;  %v647_v12 = vld [vmem:[%s6630_s30 + $0x88] sm:$0xff] }
  0x1a   : > { %5732 = vmatprep.mubr.msk.f32.mxu1 %vm668_vm1, %v644_v6  ;;  %v636_v13 = vld [vmem:[%s6630_s30 + $0x30] sm:$0xff]  ;;  %v637_v15 = vld [vmem:[%s6630_s30 + $0x38] sm:$0xff]  ;;  %v638_v17 = vld [vmem:[%s6630_s30 + $0x40] sm:$0xff]  ;;  %5742 = vmatpush3.msk.msra.mxu1 %vm729_vm0, %v607_v21 }
  0x1b   : > { %v648_v14 = vld [vmem:[%s6630_s30 + $0x90] sm:$0xff]  ;;  %v649_v16 = vld [vmem:[%s6630_s30 + $0x98] sm:$0xff]  ;;  %v639_v18 = vld [vmem:[%s6630_s30 + $0x48] sm:$0xff] }
  0x1c   : > { %5715 = vmatmul.mubr.msk.f32.gmra.mxu0 %vm668_vm1, %v633_v7  ;;  %v640_v19 = vld [vmem:[%s6630_s30 + $0x50] sm:$0xff]  ;;  %v641_v20 = vld [vmem:[%s6630_s30 + $0x58] sm:$0xff]  ;;  %v6680_v22 = vld [vmem:[%s8244_s25] ss:$0 sm:$0xff]  ;;  %s7445_s30 = scalar_lea.vmem %s6625_s21, %s5445_s1  ;;  %s4978_s1 = sshll.u32 %s595_s26, 3 }
  0x1d   : > { %5733 = vmatmul.mubr.msk.f32.gmra.mxu1 %vm668_vm1, %v645_v8  ;;  %5717 = vmatprep.mubr.msk.f32.mxu0 %vm668_vm1, %v634_v9 }
  0x1e   : > { %5735 = vmatprep.mubr.msk.f32.mxu1 %vm668_vm1, %v646_v10 }
  0x20   : > { %5718 = vmatmul.mubr.msk.f32.gmra.mxu0 %vm668_vm1, %v635_v11 }
  0x21   : > { %5736 = vmatmul.mubr.msk.f32.gmra.mxu1 %vm668_vm1, %v647_v12  ;;  %5720 = vmatprep.mubr.msk.f32.mxu0 %vm668_vm1, %v636_v13 }
  0x22   : > { %5738 = vmatprep.mubr.msk.f32.mxu1 %vm668_vm1, %v648_v14 }
  0x24   : > { %5721 = vmatmul.mubr.msk.f32.gmra.mxu0 %vm668_vm1, %v637_v15 }
  0x25   : > { %5739 = vmatmul.mubr.msk.f32.gmra.mxu1 %vm668_vm1, %v649_v16  ;;  %5723 = vmatprep.mubr.msk.f32.mxu0 %vm668_vm1, %v638_v17 }
  0x28   : > { %5724 = vmatmul.mubr.msk.f32.gmra.mxu0 %vm668_vm1, %v639_v18 }
  0x29   : > { %5726 = vmatprep.mubr.msk.f32.mxu0 %vm668_vm1, %v640_v19 }
  0x2c   : > { %5727 = vmatmul.mubr.msk.f32.gmra.mxu0 %vm668_vm1, %v641_v20 }
  0xd8   : > { %v5713_v23 = vpop.f32.mrf.mxu0 }
  0xd9   : > { %v906_v25 = vmul.f32 %v5713_v23, %v6680_v22  ;;  %v5731_v38 = vpop.f32.mrf.mxu1 }
  0xda   : > { %v799_v26 = vpop.f32.mrf.mxu0  ;;  %v918_v14 = vmul.f32 %v5731_v38, %v6680_v22 }
  0xdb   : > { %v6689_v27 = vadd.f32 %v6685_v24, %v906_v25  ;;  %v905_v28 = vmul.f32 %v6680_v22, %v799_v26  ;;  %v859_v47 = vpop.f32.mrf.mxu1 }
  0xdc   : > { %v5716_v29 = vpop.f32.mrf.mxu0  ;;  %v917_v3 = vmul.f32 %v6680_v22, %v859_v47 }
  0xdd   : > { %v5020_v30 = vmul.f32 -1.442695, %v6689_v27  ;;  %v6694_v31 = vadd.f32 %v6685_v24, %v905_v28  ;;  %v908_v32 = vmul.f32 %v5716_v29, %v6680_v22  ;;  %v5734_v56 = vpop.f32.mrf.mxu1  ;;  %v6745_v29 = vadd.f32 %v6685_v24, %v918_v14 }
  0xde   : > { %v809_v33 = vpop.f32.mrf.mxu0  ;;  %v6730_v10 = vadd.f32 %v6685_v24, %v917_v3 }
  0xdf   : > { %6154 = vpow2.f32 %v5020_v30  ;;  %v5019_v34 = vmul.f32 -1.442695, %v6694_v31  ;;  %v907_v35 = vmul.f32 %v6680_v22, %v809_v33  ;;  %v6700_v36 = vadd.f32 %v6685_v24, %v908_v32  ;;  %v869_v63 = vpop.f32.mrf.mxu1 }
  0xe0   : > { %v5719_v37 = vpop.f32.mrf.mxu0  ;;  %v919_v20 = vmul.f32 %v6680_v22, %v869_v63  ;;  %v5031_v23 = vmul.f32 -1.442695, %v6730_v10  ;;  %v920_v33 = vmul.f32 %v5734_v56, %v6680_v22 }
  0xe1   : > { %6156 = vpow2.f32 %v5019_v34  ;;  %v6703_v39 = vadd.f32 %v6685_v24, %v907_v35  ;;  %v910_v40 = vmul.f32 %v5719_v37, %v6680_v22  ;;  %v5022_v41 = vmul.f32 -1.442695, %v6700_v36  ;;  %v5737_v5 = vpop.f32.mrf.mxu1 }
  0xe2   : > { %v819_v42 = vpop.f32.mrf.mxu0  ;;  %v6755_v38 = vadd.f32 %v6685_v24, %v919_v20  ;;  %v922_v56 = vmul.f32 %v5737_v5, %v6680_v22 }
  0xe3   : > { %v5021_v43 = vmul.f32 -1.442695, %v6703_v39  ;;  %v6709_v44 = vadd.f32 %v6685_v24, %v910_v40  ;;  %v909_v45 = vmul.f32 %v6680_v22, %v819_v42  ;;  %6158 = vpow2.f32 %v5022_v41  ;;  %v879_v15 = vpop.f32.mrf.mxu1 }
  0xe4   : > { %v5722_v46 = vpop.f32.mrf.mxu0  ;;  %v921_v41 = vmul.f32 %v6680_v22, %v879_v15 }
  0xe5   : > { %v5024_v48 = vmul.f32 -1.442695, %v6709_v44  ;;  %v6714_v49 = vadd.f32 %v6685_v24, %v909_v45  ;;  %6160 = vpow2.f32 %v5021_v43  ;;  %v912_v50 = vmul.f32 %v5722_v46, %v6680_v22  ;;  %v5740_v30 = vpop.f32.mrf.mxu1 }
  0xe6   : > { %v829_v51 = vpop.f32.mrf.mxu0 }
  0xe7   : > { %v5023_v52 = vmul.f32 -1.442695, %v6714_v49  ;;  %v911_v53 = vmul.f32 %v6680_v22, %v829_v51  ;;  %6162 = vpow2.f32 %v5024_v48  ;;  %v6720_v54 = vadd.f32 %v6685_v24, %v912_v50  ;;  %v889_v46 = vpop.f32.mrf.mxu1 }
  0xe8   : > { %v5725_v55 = vpop.f32.mrf.mxu0  ;;  %v5032_v50 = vmul.f32 -1.442695, %v6745_v29  ;;  %v6763_v51 = vadd.f32 %v6685_v24, %v920_v33 }
  0xe9   : > { %v6723_v57 = vadd.f32 %v6685_v24, %v911_v53  ;;  %6164 = vpow2.f32 %v5023_v52  ;;  %v5026_v58 = vmul.f32 -1.442695, %v6720_v54  ;;  %v914_v8 = vmul.f32 %v5725_v55, %v6680_v22 }
  0xea   : > { %v839_v60 = vpop.f32.mrf.mxu0  ;;  %v5033_v55 = vmul.f32 -1.442695, %v6755_v38  ;;  %v5034_v63 = vmul.f32 -1.442695, %v6763_v51 }
  0xeb   : > { %v5025_v59 = vmul.f32 -1.442695, %v6723_v57  ;;  %6166 = vpow2.f32 %v5026_v58  ;;  %v913_v12 = vmul.f32 %v6680_v22, %v839_v60  ;;  %v6738_v21 = vadd.f32 %v6685_v24, %v914_v8 }
  0xec   : > { %v6155_v61 = vpop.eup %6154  ;;  %v5728_v2 = vpop.f32.mrf.mxu0  ;;  %v923_v60 = vmul.f32 %v6680_v22, %v889_v46 }
  0xed   : > { %v1013_v62 = vadd.f32 1.0, %v6155_v61  ;;  %6168 = vpow2.f32 %v5025_v59  ;;  %v916_v16 = vmul.f32 %v5728_v2, %v6680_v22  ;;  %v6742_v26 = vadd.f32 %v6685_v24, %v913_v12 }
  0xee   : > { %v6157_v0 = vpop.eup %6156  ;;  %v849_v9 = vpop.f32.mrf.mxu0  ;;  %v5028_v40 = vmul.f32 -1.442695, %v6738_v21  ;;  %v6771_v59 = vadd.f32 %v6685_v24, %v921_v41  ;;  %v6784_v2 = vadd.f32 %v6685_v24, %v923_v60 }
  0xef   : > { %v1012_v1 = vadd.f32 1.0, %v6157_v0  ;;  %6170 = vrcp.f32 %v1013_v62  ;;  %v915_v18 = vmul.f32 %v6680_v22, %v849_v9  ;;  %v6748_v32 = vadd.f32 %v6685_v24, %v916_v16 }
  0xf0   : > { %v6159_v4 = vpop.eup %6158  ;;  %v5027_v43 = vmul.f32 -1.442695, %v6742_v26  ;;  %v924_v62 = vmul.f32 %v5740_v30, %v6680_v22 }
  0xf1   : > { %6172 = vrcp.f32 %v1012_v1  ;;  %v1015_v6 = vadd.f32 1.0, %v6159_v4  ;;  %v6752_v35 = vadd.f32 %v6685_v24, %v915_v18  ;;  %v5030_v47 = vmul.f32 -1.442695, %v6748_v32 }
  0xf2   : > { %v6161_v7 = vpop.eup %6160  ;;  %v5035_v1 = vmul.f32 -1.442695, %v6771_v59  ;;  %v6788_v4 = vadd.f32 %v6685_v24, %v924_v62 }
  0xf3   : > { %v1014_v11 = vadd.f32 1.0, %v6161_v7  ;;  %6174 = vrcp.f32 %v1015_v6  ;;  %v5029_v52 = vmul.f32 -1.442695, %v6752_v35  ;;  %v5037_v7 = vmul.f32 -1.442695, %v6784_v2 }
  0xf4   : > { %v6163_v13 = vpop.eup %6162 }
  0xf5   : > { %6176 = vrcp.f32 %v1014_v11  ;;  %v1017_v17 = vadd.f32 1.0, %v6163_v13 }
  0xf6   : > { %v6165_v19 = vpop.eup %6164 }
  0xf7   : > { %v1016_v25 = vadd.f32 1.0, %v6165_v19  ;;  %6178 = vrcp.f32 %v1017_v17 }
  0xf8   : > { %v6167_v28 = vpop.eup %6166 }
  0xf9   : > { %6180 = vrcp.f32 %v1016_v25  ;;  %v1019_v34 = vadd.f32 1.0, %v6167_v28 }
  0xfa   : > { %v6169_v37 = vpop.eup %6168  ;;  %6182 = vpow2.f32 %v5031_v23 }
  0xfb   : > { %v1018_v42 = vadd.f32 1.0, %v6169_v37  ;;  %6184 = vrcp.f32 %v1019_v34 }
  0xfc   : > { %v6171_v45 = vpop.eup %6170 }
  0xfd   : > { %6186 = vrcp.f32 %v1018_v42  ;;  %v1073_v58 = vmul.f32 %v6171_v45, %v6689_v27  ;;  %v6779_v27 = vadd.f32 %v6685_v24, %v922_v56  ;;  %v5038_v24 = vmul.f32 -1.442695, %v6788_v4 }
  0xfe   : > { %v6173_v48 = vpop.eup %6172  ;;  %6188 = vpow2.f32 %v5028_v40 }
  0xff   : > { %v1072_v53 = vmul.f32 %v6173_v48, %v6694_v31  ;;  %6190 = vpow2.f32 %v5027_v43  ;;  %v5036_v6 = vmul.f32 -1.442695, %v6779_v27 }
 0x100   : > { %6192 = vpow2.f32 %v5030_v47  ;;  %v6175_v61 = vpop.eup %6174 }
 0x101   : > { %5743 = vmatprep.mubr.msk.f32.mxu1 %vm668_vm1, %v1072_v53  ;;  %6194 = vpow2.f32 %v5029_v52  ;;  %v1075_v22 = vmul.f32 %v6175_v61, %v6700_v36 }
 0x102   : > { %5744 = vmatmul.mubr.msk.f32.vlgmr.msra.gmra.mxu1 %vm668_vm1, %v1073_v58  ;;  %v6177_v31 = vpop.eup %6176  ;;  %6196 = vpow2.f32 %v5032_v50 }
 0x103   : > { %v1074_v0 = vmul.f32 %v6177_v31, %v6703_v39  ;;  %6198 = vpow2.f32 %v5033_v55 }
 0x104   : > { %v6179_v3 = vpop.eup %6178  ;;  %6200 = vpow2.f32 %v5034_v63 }
 0x105   : > { %5746 = vmatprep.mubr.msk.f32.mxu1 %vm668_vm1, %v1074_v0  ;;  %6202 = vpow2.f32 %v5035_v1  ;;  %v1077_v36 = vmul.f32 %v6179_v3, %v6709_v44  ;;  %v6875_v3 = vld [vmem:[%s8221_s7 + $0xc] sm:$0xf] }
 0x106   : > { %v6181_v5 = vpop.eup %6180  ;;  %5747 = vmatmul.mubr.msk.f32.gmra.mxu1 %vm668_vm1, %v1075_v22  ;;  %6204 = vpow2.f32 %v5036_v6  ;;  %v6887_v6 = vld [vmem:[%s8220_s6] ss:$0 sm:$0xff] }
 0x107   : > { %v1076_v39 = vmul.f32 %v6181_v5, %v6714_v49  ;;  %v6183_v8 = vpop.eup %6182  ;;  %6206 = vpow2.f32 %v5037_v7 }
 0x108   : > { %v6185_v9 = vpop.eup %6184  ;;  %6208 = vpow2.f32 %v5038_v24  ;;  %v1024_v20 = vadd.f32 1.0, %v6183_v8 }
 0x109   : > { %5749 = vmatprep.mubr.msk.f32.mxu1 %vm668_vm1, %v1076_v39  ;;  %v1079_v14 = vmul.f32 %v6185_v9, %v6720_v54 }
 0x10a   : > { %v6187_v11 = vpop.eup %6186  ;;  %5750 = vmatmul.mubr.msk.f32.gmra.mxu1 %vm668_vm1, %v1077_v36 }
 0x10b   : > { %v6189_v12 = vpop.eup %6188  ;;  %v1078_v13 = vmul.f32 %v6187_v11, %v6723_v57 }
 0x10c   : > { %v6191_v49 = vpop.eup %6190  ;;  %v1021_v15 = vadd.f32 1.0, %v6189_v12 }
 0x10d   : > { %v6193_v16 = vpop.eup %6192  ;;  %v1020_v44 = vadd.f32 1.0, %v6191_v49  ;;  %5752 = vmatprep.mubr.msk.f32.mxu1 %vm668_vm1, %v1078_v13 }
 0x10e   : > { %v6195_v17 = vpop.eup %6194  ;;  %6210 = vrcp.f32 %v1021_v15  ;;  %v1023_v18 = vadd.f32 1.0, %v6193_v16  ;;  %5753 = vmatmul.mubr.msk.f32.gmra.mxu1 %vm668_vm1, %v1079_v14 }
 0x10f   : > { %v6197_v19 = vpop.eup %6196  ;;  %6212 = vrcp.f32 %v1020_v44  ;;  %v1022_v23 = vadd.f32 1.0, %v6195_v17 }
 0x110   : > { %v6199_v57 = vpop.eup %6198  ;;  %v1025_v25 = vadd.f32 1.0, %v6197_v19 }
 0x111   : > { %6214 = vrcp.f32 %v1022_v23  ;;  %v6201_v54 = vpop.eup %6200  ;;  %v1026_v28 = vadd.f32 1.0, %v6199_v57 }
 0x112   : > { %6216 = vrcp.f32 %v1023_v18  ;;  %v6203_v30 = vpop.eup %6202  ;;  %v1027_v33 = vadd.f32 1.0, %v6201_v54 }
 0x113   : > { %6218 = vrcp.f32 %v1024_v20  ;;  %v6205_v34 = vpop.eup %6204  ;;  %v1028_v37 = vadd.f32 1.0, %v6203_v30 }
 0x114   : > { %6220 = vrcp.f32 %v1025_v25  ;;  %v6207_v40 = vpop.eup %6206  ;;  %v1029_v42 = vadd.f32 1.0, %v6205_v34 }
 0x115   : > { %6222 = vrcp.f32 %v1026_v28  ;;  %v6209_v41 = vpop.eup %6208  ;;  %v1030_v45 = vadd.f32 1.0, %v6207_v40 }
 0x116   : > { %6224 = vrcp.f32 %v1027_v33  ;;  %v1031_v50 = vadd.f32 1.0, %v6209_v41 }
 0x117   : > { %6226 = vrcp.f32 %v1028_v37 }
 0x118   : > { %6228 = vrcp.f32 %v1029_v42 }
 0x119   : > { %6230 = vrcp.f32 %v1030_v45 }
 0x11a   : > { %6232 = vrcp.f32 %v1031_v50 }
 0x11b   : > { %v6211_v43 = vpop.eup %6210 }
 0x11c   : > { %v6213_v46 = vpop.eup %6212  ;;  %v1081_v52 = vmul.f32 %v6211_v43, %v6738_v21 }
 0x11d   : > { %v1080_v47 = vmul.f32 %v6213_v46, %v6742_v26 }
 0x11e   : > { %v6215_v48 = vpop.eup %6214 }
 0x11f   : > { %v6217_v53 = vpop.eup %6216  ;;  %v1082_v55 = vmul.f32 %v6215_v48, %v6752_v35  ;;  %5755 = vmatprep.mubr.msk.f32.mxu1 %vm668_vm1, %v1080_v47 }
 0x120   : > { %v6219_v56 = vpop.eup %6218  ;;  %5756 = vmatmul.mubr.msk.f32.gmra.mxu1 %vm668_vm1, %v1081_v52  ;;  %v1083_v58 = vmul.f32 %v6217_v53, %v6748_v32 }
 0x121   : > { %5758 = vmatprep.mubr.msk.f32.mxu1 %vm668_vm1, %v1082_v55  ;;  %v6221_v26 = vpop.eup %6220  ;;  %v1084_v60 = vmul.f32 %v6219_v56, %v6730_v10 }
 0x122   : > { %v6223_v61 = vpop.eup %6222  ;;  %v1085_v21 = vmul.f32 %v6221_v26, %v6745_v29 }
 0x123   : > { %v6225_v35 = vpop.eup %6224  ;;  %v1086_v62 = vmul.f32 %v6223_v61, %v6755_v38 }
 0x124   : > { %5759 = vmatmul.mubr.msk.f32.gmra.mxu1 %vm668_vm1, %v1083_v58  ;;  %v6227_v31 = vpop.eup %6226  ;;  %v1087_v32 = vmul.f32 %v6225_v35, %v6763_v51  ;;  %v6483_v51 = vmov 0.0  }
 0x125   : > { %5761 = vmatprep.mubr.msk.f32.mxu1 %vm668_vm1, %v1084_v60  ;;  %v6229_v63 = vpop.eup %6228  ;;  %v1088_v10 = vmul.f32 %v6227_v31, %v6771_v59  ;;  %1092 = vst.msk [vmem:[#allocation2] sm:$0xff] %vm668_vm1, %v6483_v51  ;;  %1093 = vst.msk [vmem:[#allocation2 + $0x8] sm:$0xff] %vm668_vm1, %v6483_v51  ;;  %v608_v59 = vld [vmem:[%s8221_s7] sm:$0xf] }
 0x126   : > { %v6231_v0 = vpop.eup %6230  ;;  %v1089_v29 = vmul.f32 %v6229_v63, %v6779_v27  ;;  %1095 = vst.msk [vmem:[#allocation2 + $0x10] sm:$0x3] %vm1094_vm2, %v6483_v51  ;;  %1099 = vst.msk [vmem:[#allocation2 + $0x118] sm:$0x3] %vm1094_vm2, %v6483_v51  ;;  %v4986_v27 = vld [vmem:[%s8221_s7 + $0x4] sm:$0xf]  ;;  %5799 = vmatprep.subr.msk.mxu1 %vm729_vm0, %v608_v59 }
 0x127   : > { %v6233_v1 = vpop.eup %6232  ;;  %v1090_v38 = vmul.f32 %v6231_v0, %v6784_v2  ;;  %1097 = vst.msk [vmem:[#allocation2 + $0x108] sm:$0xff] %vm668_vm1, %v6483_v51  ;;  %1098 = vst.msk [vmem:[#allocation2 + $0x110] sm:$0xff] %vm668_vm1, %v6483_v51  ;;  %5773 = vmatprep.subr.msk.mxu0 %vm729_vm0, %v4986_v27  ;;  %5800 = vmatpush3.msk.msra.mxu1 %vm729_vm0, %v608_v59  ;;  %v6868_v2 = vld [vmem:[%s8221_s7 + $0x8] sm:$0xf] }
 0x128   : > { %5762 = vmatmul.mubr.msk.f32.gmra.mxu1 %vm668_vm1, %v1085_v21  ;;  %v1091_v22 = vmul.f32 %v6233_v1, %v6788_v4  ;;  %1101 = vst.msk [vmem:[#allocation2] sm:$0x1] %vm1100_vm3, %v6483_v51  ;;  %1102 = vst.msk [vmem:[#allocation2 + $0x18] sm:$0x1] %vm1100_vm3, %v6483_v51  ;;  %5774 = vmatpush3.msk.msra.mxu0 %vm729_vm0, %v4986_v27  ;;  %v6882_v4 = vld [vmem:[%s8219_s5] ss:$0 sm:$0xff] }
 0x129   : > { %5764 = vmatprep.mubr.msk.f32.mxu1 %vm668_vm1, %v1086_v62  ;;  %1103 = vst.msk [vmem:[#allocation2 + $0x30] sm:$0x1] %vm1100_vm3, %v6483_v51  ;;  %1104 = vst.msk [vmem:[#allocation2 + $0x48] sm:$0x1] %vm1100_vm3, %v6483_v51  ;;  %5825 = vmatprep.subr.msk.mxu0 %vm729_vm0, %v6868_v2 }
 0x12a   : > { %1105 = vst.msk [vmem:[#allocation2 + $0x60] sm:$0x1] %vm1100_vm3, %v6483_v51  ;;  %1106 = vst.msk [vmem:[#allocation2 + $0x78] sm:$0x1] %vm1100_vm3, %v6483_v51  ;;  %5851 = vmatprep.subr.msk.mxu1 %vm729_vm0, %v6875_v3 }
 0x12b   : > { %1107 = vst.msk [vmem:[#allocation2 + $0x90] sm:$0x1] %vm1100_vm3, %v6483_v51  ;;  %1108 = vst.msk [vmem:[#allocation2 + $0xa8] sm:$0x1] %vm1100_vm3, %v6483_v51 }
 0x12c   : > { %5765 = vmatmul.mubr.msk.f32.gmra.mxu1 %vm668_vm1, %v1087_v32  ;;  %1109 = vst.msk [vmem:[#allocation2 + $0xc0] sm:$0x1] %vm1100_vm3, %v6483_v51  ;;  %1110 = vst.msk [vmem:[#allocation2 + $0xd8] sm:$0x1] %vm1100_vm3, %v6483_v51 }
 0x12d   : > { %5767 = vmatprep.mubr.msk.f32.mxu1 %vm668_vm1, %v1088_v10  ;;  %1111 = vst.msk [vmem:[#allocation2 + $0xf0] sm:$0x1] %vm1100_vm3, %v6483_v51  ;;  %1112 = vst.msk [vmem:[#allocation2 + $0x108] sm:$0x1] %vm1100_vm3, %v6483_v51 }
 0x12e   : > { %1113 = vst.msk [vmem:[#allocation2 + $0x11] sm:$0x1] %vm1100_vm3, %v6483_v51  ;;  %1114 = vst.msk [vmem:[#allocation2 + $0x29] sm:$0x1] %vm1100_vm3, %v6483_v51 }
 0x12f   : > { %1115 = vst.msk [vmem:[#allocation2 + $0x41] sm:$0x1] %vm1100_vm3, %v6483_v51  ;;  %1116 = vst.msk [vmem:[#allocation2 + $0x59] sm:$0x1] %vm1100_vm3, %v6483_v51 }
 0x130   : > { %5768 = vmatmul.mubr.msk.f32.gmra.mxu1 %vm668_vm1, %v1089_v29  ;;  %1117 = vst.msk [vmem:[#allocation2 + $0x71] sm:$0x1] %vm1100_vm3, %v6483_v51  ;;  %1118 = vst.msk [vmem:[#allocation2 + $0x89] sm:$0x1] %vm1100_vm3, %v6483_v51 }
 0x131   : > { %5770 = vmatprep.mubr.msk.f32.mxu1 %vm668_vm1, %v1090_v38  ;;  %1119 = vst.msk [vmem:[#allocation2 + $0xa1] sm:$0x1] %vm1100_vm3, %v6483_v51  ;;  %1120 = vst.msk [vmem:[#allocation2 + $0xb9] sm:$0x1] %vm1100_vm3, %v6483_v51 }
 0x132   : > { %1121 = vst.msk [vmem:[#allocation2 + $0xd1] sm:$0x1] %vm1100_vm3, %v6483_v51  ;;  %1122 = vst.msk [vmem:[#allocation2 + $0xe9] sm:$0x1] %vm1100_vm3, %v6483_v51 }
 0x133   : > { %1123 = vst.msk [vmem:[#allocation2 + $0x101] sm:$0x1] %vm1100_vm3, %v6483_v51  ;;  %1124 = vst.msk [vmem:[#allocation2 + $0x119] sm:$0x1] %vm1100_vm3, %v6483_v51 }
 0x134   : > { %5771 = vmatmul.mubr.msk.f32.gmra.mxu1 %vm668_vm1, %v1091_v22 }
 0x1c2   : > { %v5745_v5 = vpop.f32.mrf.mxu1 }
 0x1c3   : > { %v1361_v39 = vmul.f32 %v5745_v5, %v6882_v4 }
 0x1c4   : > { %v1254_v7 = vpop.f32.mrf.mxu1 }
 0x1c5   : > { %v6891_v8 = vadd.f32 %v6887_v6, %v1361_v39  ;;  %v1360_v36 = vmul.f32 %v6882_v4, %v1254_v7 }
 0x1c6   : > { %v5748_v11 = vpop.f32.mrf.mxu1 }
 0x1c7   : > { %v5063_v9 = vmul.f32 -1.442695, %v6891_v8  ;;  %v6896_v24 = vadd.f32 %v6887_v6, %v1360_v36  ;;  %v1363_v12 = vmul.f32 %v5748_v11, %v6882_v4 }
 0x1c8   : > { %v1264_v49 = vpop.f32.mrf.mxu1 }
 0x1c9   : > { %6234 = vpow2.f32 %v5063_v9  ;;  %v5062_v13 = vmul.f32 -1.442695, %v6896_v24  ;;  %v6901_v14 = vadd.f32 %v6887_v6, %v1363_v12  ;;  %v1362_v15 = vmul.f32 %v6882_v4, %v1264_v49 }
 0x1ca   : > { %v5751_v16 = vpop.f32.mrf.mxu1 }
 0x1cb   : > { %6236 = vpow2.f32 %v5062_v13  ;;  %v5065_v44 = vmul.f32 -1.442695, %v6901_v14  ;;  %v6906_v17 = vadd.f32 %v6887_v6, %v1362_v15  ;;  %v1365_v18 = vmul.f32 %v5751_v16, %v6882_v4 }
 0x1cc   : > { %v1274_v19 = vpop.f32.mrf.mxu1 }
 0x1cd   : > { %6238 = vpow2.f32 %v5065_v44  ;;  %v5064_v20 = vmul.f32 -1.442695, %v6906_v17  ;;  %v6911_v23 = vadd.f32 %v6887_v6, %v1365_v18  ;;  %v1364_v57 = vmul.f32 %v6882_v4, %v1274_v19 }
 0x1ce   : > { %v5754_v25 = vpop.f32.mrf.mxu1 }
 0x1cf   : > { %6240 = vpow2.f32 %v5064_v20  ;;  %v5067_v54 = vmul.f32 -1.442695, %v6911_v23  ;;  %v6916_v28 = vadd.f32 %v6887_v6, %v1364_v57  ;;  %v1367_v30 = vmul.f32 %v5754_v25, %v6882_v4 }
 0x1d0   : > { %v1284_v33 = vpop.f32.mrf.mxu1 }
 0x1d1   : > { %6242 = vpow2.f32 %v5067_v54  ;;  %v5066_v34 = vmul.f32 -1.442695, %v6916_v28  ;;  %v6921_v37 = vadd.f32 %v6887_v6, %v1367_v30  ;;  %v1366_v40 = vmul.f32 %v6882_v4, %v1284_v33 }
 0x1d3   : > { %6244 = vpow2.f32 %v5066_v34  ;;  %v5069_v41 = vmul.f32 -1.442695, %v6921_v37  ;;  %v6926_v42 = vadd.f32 %v6887_v6, %v1366_v40 }
 0x1d5   : > { %6246 = vpow2.f32 %v5069_v41  ;;  %v5068_v45 = vmul.f32 -1.442695, %v6926_v42 }
 0x1d6   : > { %v6235_v43 = vpop.eup %6234 }
 0x1d7   : > { %v1468_v46 = vadd.f32 1.0, %v6235_v43  ;;  %6248 = vpow2.f32 %v5068_v45 }
 0x1d8   : > { %v6237_v47 = vpop.eup %6236 }
 0x1d9   : > { %6250 = vrcp.f32 %v1468_v46  ;;  %v1467_v48 = vadd.f32 1.0, %v6237_v47 }
 0x1da   : > { %v6239_v50 = vpop.eup %6238 }
 0x1db   : > { %6252 = vrcp.f32 %v1467_v48  ;;  %v1470_v52 = vadd.f32 1.0, %v6239_v50 }
 0x1dc   : > { %v6241_v53 = vpop.eup %6240 }
 0x1dd   : > { %6254 = vrcp.f32 %v1470_v52  ;;  %v1469_v55 = vadd.f32 1.0, %v6241_v53 }
 0x1de   : > { %v6243_v56 = vpop.eup %6242 }
 0x1df   : > { %6256 = vrcp.f32 %v1469_v55  ;;  %v1472_v58 = vadd.f32 1.0, %v6243_v56 }
 0x1e0   : > { %v6245_v26 = vpop.eup %6244  ;;  %v5757_v60 = vpop.f32.mrf.mxu1 }
 0x1e1   : > { %6258 = vrcp.f32 %v1472_v58  ;;  %v1471_v61 = vadd.f32 1.0, %v6245_v26  ;;  %v1369_v21 = vmul.f32 %v5757_v60, %v6882_v4 }
 0x1e2   : > { %v6247_v35 = vpop.eup %6246  ;;  %v1294_v62 = vpop.f32.mrf.mxu1 }
 0x1e3   : > { %6260 = vrcp.f32 %v1471_v61  ;;  %v1474_v31 = vadd.f32 1.0, %v6247_v35  ;;  %v6931_v32 = vadd.f32 %v6887_v6, %v1369_v21  ;;  %v1368_v63 = vmul.f32 %v6882_v4, %v1294_v62 }
 0x1e4   : > { %v6249_v10 = vpop.eup %6248  ;;  %v5760_v0 = vpop.f32.mrf.mxu1 }
 0x1e5   : > { %6262 = vrcp.f32 %v1474_v31  ;;  %v1473_v1 = vadd.f32 1.0, %v6249_v10  ;;  %v5071_v38 = vmul.f32 -1.442695, %v6931_v32  ;;  %v6936_v22 = vadd.f32 %v6887_v6, %v1368_v63 }
 0x1e6   : > { %v6251_v29 = vpop.eup %6250  ;;  %v1371_v59 = vmul.f32 %v5760_v0, %v6882_v4  ;;  %v1304_v27 = vpop.f32.mrf.mxu1 }
 0x1e7   : > { %v1528_v51 = vmul.f32 %v6251_v29, %v6891_v8  ;;  %6264 = vrcp.f32 %v1473_v1  ;;  %v5070_v39 = vmul.f32 -1.442695, %v6936_v22  ;;  %v1370_v7 = vmul.f32 %v6882_v4, %v1304_v27 }
 0x1e8   : > { %v6253_v5 = vpop.eup %6252  ;;  %6266 = vpow2.f32 %v5071_v38  ;;  %v6945_v9 = vadd.f32 %v6887_v6, %v1371_v59  ;;  %v5763_v11 = vpop.f32.mrf.mxu1 }
 0x1e9   : > { %1549 = vst.msk [vmem:[#allocation2 + $0x21] sm:$0xff] %vm668_vm1, %v1528_v51  ;;  %v1527_v36 = vmul.f32 %v6253_v5, %v6896_v24  ;;  %6268 = vpow2.f32 %v5070_v39  ;;  %v6948_v8 = vadd.f32 %v6887_v6, %v1370_v7  ;;  %v1373_v12 = vmul.f32 %v5763_v11, %v6882_v4 }
 0x1ea   : > { %v6255_v13 = vpop.eup %6254  ;;  %v5073_v49 = vmul.f32 -1.442695, %v6945_v9  ;;  %v1314_v15 = vpop.f32.mrf.mxu1 }
 0x1eb   : > { %1548 = vst.msk [vmem:[#allocation2 + $0x19] sm:$0xff] %vm668_vm1, %v1527_v36  ;;  %v1530_v16 = vmul.f32 %v6255_v13, %v6901_v14  ;;  %v5072_v24 = vmul.f32 -1.442695, %v6948_v8  ;;  %v6956_v44 = vadd.f32 %v6887_v6, %v1373_v12  ;;  %v1372_v18 = vmul.f32 %v6882_v4, %v1314_v15 }
 0x1ec   : > { %v6257_v19 = vpop.eup %6256  ;;  %6270 = vpow2.f32 %v5073_v49  ;;  %v5766_v20 = vpop.f32.mrf.mxu1 }
 0x1ed   : > { %1551 = vst.msk [vmem:[#allocation2 + $0x39] sm:$0xff] %vm668_vm1, %v1530_v16  ;;  %v1529_v57 = vmul.f32 %v6257_v19, %v6906_v17  ;;  %6272 = vpow2.f32 %v5072_v24  ;;  %v5075_v25 = vmul.f32 -1.442695, %v6956_v44  ;;  %v6963_v54 = vadd.f32 %v6887_v6, %v1372_v18 }
 0x1ee   : > { %v6259_v14 = vpop.eup %6258  ;;  %v1375_v30 = vmul.f32 %v5766_v20, %v6882_v4  ;;  %v1324_v33 = vpop.f32.mrf.mxu1 }
 0x1ef   : > { %1550 = vst.msk [vmem:[#allocation2 + $0x31] sm:$0xff] %vm668_vm1, %v1529_v57  ;;  %v1532_v34 = vmul.f32 %v6259_v14, %v6911_v23  ;;  %6274 = vpow2.f32 %v5075_v25  ;;  %v5074_v40 = vmul.f32 -1.442695, %v6963_v54  ;;  %v1374_v41 = vmul.f32 %v6882_v4, %v1324_v33 }
 0x1f0   : > { %v6261_v17 = vpop.eup %6260  ;;  %v6971_v43 = vadd.f32 %v6887_v6, %v1375_v30  ;;  %v5769_v45 = vpop.f32.mrf.mxu1 }
 0x1f1   : > { %1553 = vst.msk [vmem:[#allocation2 + $0x51] sm:$0xff] %vm668_vm1, %v1532_v34  ;;  %v1531_v46 = vmul.f32 %v6261_v17, %v6916_v28  ;;  %6276 = vpow2.f32 %v5074_v40  ;;  %v6976_v47 = vadd.f32 %v6887_v6, %v1374_v41  ;;  %v1377_v23 = vmul.f32 %v5769_v45, %v6882_v4 }
 0x1f2   : > { %v6263_v48 = vpop.eup %6262  ;;  %v5077_v50 = vmul.f32 -1.442695, %v6971_v43  ;;  %v1334_v52 = vpop.f32.mrf.mxu1 }
 0x1f3   : > { %1552 = vst.msk [vmem:[#allocation2 + $0x49] sm:$0xff] %vm668_vm1, %v1531_v46  ;;  %v1534_v53 = vmul.f32 %v6263_v48, %v6921_v37  ;;  %v5076_v55 = vmul.f32 -1.442695, %v6976_v47  ;;  %v6984_v56 = vadd.f32 %v6887_v6, %v1377_v23  ;;  %v1376_v28 = vmul.f32 %v6882_v4, %v1334_v52 }
 0x1f4   : > { %v6265_v58 = vpop.eup %6264  ;;  %6278 = vpow2.f32 %v5077_v50  ;;  %v5772_v26 = vpop.f32.mrf.mxu1 }
 0x1f5   : > { %v6267_v60 = vpop.eup %6266  ;;  %1555 = vst.msk [vmem:[#allocation2 + $0x69] sm:$0xff] %vm668_vm1, %v1534_v53  ;;  %v1533_v61 = vmul.f32 %v6265_v58, %v6926_v42  ;;  %6280 = vpow2.f32 %v5076_v55  ;;  %v5079_v21 = vmul.f32 -1.442695, %v6984_v56  ;;  %v6991_v37 = vadd.f32 %v6887_v6, %v1376_v28 }
 0x1f6   : > { %v6269_v35 = vpop.eup %6268  ;;  %v1476_v62 = vadd.f32 1.0, %v6267_v60  ;;  %v1379_v31 = vmul.f32 %v5772_v26, %v6882_v4  ;;  %v1344_v63 = vpop.f32.mrf.mxu1 }
 0x1f7   : > { %1554 = vst.msk [vmem:[#allocation2 + $0x61] sm:$0xff] %vm668_vm1, %v1533_v61  ;;  %v1475_v10 = vadd.f32 1.0, %v6269_v35  ;;  %6282 = vpow2.f32 %v5079_v21  ;;  %v5078_v0 = vmul.f32 -1.442695, %v6991_v37  ;;  %v1378_v29 = vmul.f32 %v6882_v4, %v1344_v63  ;;  %v7046_v21 = vld [vmem:[%s8221_s7 + $0x10] sm:$0xf] }
 0x1f8   : > { %6284 = vrcp.f32 %v1476_v62  ;;  %v6998_v42 = vadd.f32 %v6887_v6, %v1379_v31 }
 0x1f9   : > { %v6271_v1 = vpop.eup %6270  ;;  %6286 = vrcp.f32 %v1475_v10  ;;  %v7001_v38 = vadd.f32 %v6887_v6, %v1378_v29 }
 0x1fa   : > { %v6273_v51 = vpop.eup %6272  ;;  %v1478_v59 = vadd.f32 1.0, %v6271_v1  ;;  %6288 = vpow2.f32 %v5078_v0  ;;  %v5081_v27 = vmul.f32 -1.442695, %v6998_v42 }
 0x1fb   : > { %v1477_v5 = vadd.f32 1.0, %v6273_v51  ;;  %v5080_v7 = vmul.f32 -1.442695, %v7001_v38 }
 0x1fc   : > { %v6275_v39 = vpop.eup %6274  ;;  %6290 = vrcp.f32 %v1478_v59 }
 0x1fd   : > { %6292 = vrcp.f32 %v1477_v5  ;;  %v1480_v4 = vadd.f32 1.0, %v6275_v39 }
 0x1fe   : > { %v6277_v36 = vpop.eup %6276  ;;  %6294 = vpow2.f32 %v5081_v27 }
 0x1ff   : > { %6296 = vrcp.f32 %v1480_v4  ;;  %v1479_v11 = vadd.f32 1.0, %v6277_v36 }
 0x200   : > { %6298 = vpow2.f32 %v5080_v7 }
 0x201   : > { %v6279_v12 = vpop.eup %6278  ;;  %6300 = vrcp.f32 %v1479_v11 }
 0x202   : > { %v6281_v6 = vpop.eup %6280  ;;  %v1482_v13 = vadd.f32 1.0, %v6279_v12 }
 0x203   : > { %v1481_v49 = vadd.f32 1.0, %v6281_v6 }
 0x204   : > { %v6283_v15 = vpop.eup %6282  ;;  %6302 = vrcp.f32 %v1482_v13 }
 0x205   : > { %v6285_v16 = vpop.eup %6284  ;;  %6304 = vrcp.f32 %v1481_v49  ;;  %v1484_v24 = vadd.f32 1.0, %v6283_v15 }
 0x206   : > { %v6287_v18 = vpop.eup %6286  ;;  %v1536_v19 = vmul.f32 %v6285_v16, %v6931_v32 }
 0x207   : > { %v6289_v20 = vpop.eup %6288  ;;  %v1535_v57 = vmul.f32 %v6287_v18, %v6936_v22  ;;  %6306 = vrcp.f32 %v1484_v24 }
 0x208   : > { %1557 = vst.msk [vmem:[#allocation2 + $0x81] sm:$0xff] %vm668_vm1, %v1536_v19  ;;  %v1483_v25 = vadd.f32 1.0, %v6289_v20  ;;  %v4991_v20 = vld [vmem:[%s8221_s7 + $0x18] sm:$0xf] }
 0x209   : > { %v6291_v14 = vpop.eup %6290  ;;  %1556 = vst.msk [vmem:[#allocation2 + $0x79] sm:$0xff] %vm668_vm1, %v1535_v57  ;;  %v4992_v57 = vld [vmem:[%s8221_s7 + $0x1c] sm:$0xf] }
 0x20a   : > { %v6293_v30 = vpop.eup %6292  ;;  %v1538_v33 = vmul.f32 %v6291_v14, %v6945_v9  ;;  %6308 = vrcp.f32 %v1483_v25 }
 0x20b   : > { %v6295_v34 = vpop.eup %6294  ;;  %v1537_v40 = vmul.f32 %v6293_v30, %v6948_v8 }
 0x20c   : > { %v6297_v41 = vpop.eup %6296  ;;  %1559 = vst.msk [vmem:[#allocation2 + $0x99] sm:$0xff] %vm668_vm1, %v1538_v33  ;;  %v1486_v32 = vadd.f32 1.0, %v6295_v34 }
 0x20d   : > { %v6299_v17 = vpop.eup %6298  ;;  %1558 = vst.msk [vmem:[#allocation2 + $0x91] sm:$0xff] %vm668_vm1, %v1537_v40  ;;  %v1540_v22 = vmul.f32 %v6297_v41, %v6956_v44 }
 0x20e   : > { %v6301_v45 = vpop.eup %6300  ;;  %6310 = vrcp.f32 %v1486_v32  ;;  %v1485_v46 = vadd.f32 1.0, %v6299_v17 }
 0x20f   : > { %1561 = vst.msk [vmem:[#allocation2 + $0xb1] sm:$0xff] %vm668_vm1, %v1540_v22  ;;  %v1539_v9 = vmul.f32 %v6301_v45, %v6963_v54 }
 0x210   : > { %6312 = vrcp.f32 %v1485_v46 }
 0x211   : > { %v6303_v23 = vpop.eup %6302  ;;  %1560 = vst.msk [vmem:[#allocation2 + $0xa9] sm:$0xff] %vm668_vm1, %v1539_v9 }
 0x212   : > { %v6305_v8 = vpop.eup %6304  ;;  %v1542_v48 = vmul.f32 %v6303_v23, %v6971_v43 }
 0x213   : > { %v1541_v50 = vmul.f32 %v6305_v8, %v6976_v47 }
 0x214   : > { %v6307_v52 = vpop.eup %6306  ;;  %1563 = vst.msk [vmem:[#allocation2 + $0xc9] sm:$0xff] %vm668_vm1, %v1542_v48  ;;  %v4993_v48 = vld [vmem:[%s8221_s7 + $0x20] sm:$0xf] }
 0x215   : > { %1562 = vst.msk [vmem:[#allocation2 + $0xc1] sm:$0xff] %vm668_vm1, %v1541_v50  ;;  %v1544_v44 = vmul.f32 %v6307_v52, %v6984_v56  ;;  %v6442_v50 = vld [vmem:[%s8242_s22] sm:$0xf] }
 0x217   : > { %v6309_v53 = vpop.eup %6308  ;;  %1565 = vst.msk [vmem:[#allocation2 + $0xe1] sm:$0xff] %vm668_vm1, %v1544_v44 }
 0x218   : > { %v1543_v54 = vmul.f32 %v6309_v53, %v6991_v37  ;;  %v7051_v37 = vld [vmem:[%s8221_s7 + $0x14] sm:$0xf] }
 0x21a   : > { %1564 = vst.msk [vmem:[#allocation2 + $0xd9] sm:$0xff] %vm668_vm1, %v1543_v54 }
 0x21b   : > { %v6311_v55 = vpop.eup %6310 }
 0x21c   : > { %v1546_v28 = vmul.f32 %v6311_v55, %v6998_v42  ;;  %v625_v55 = vld [vmem:[%s8224_s10] sm:$0xf] }
 0x21d   : > { %v6313_v43 = vpop.eup %6312 }
 0x21e   : > { %1567 = vst.msk [vmem:[#allocation2 + $0xf9] sm:$0xff] %vm668_vm1, %v1546_v28  ;;  %v1545_v47 = vmul.f32 %v6313_v43, %v7001_v38 }
 0x220   : > { %1566 = vst.msk [vmem:[#allocation2 + $0xf1] sm:$0xff] %vm668_vm1, %v1545_v47  ;;  %v652_v47 = vld [vmem:[%s7445_s30] sm:$0xff] }
 0x227   : > { %v1586_v56 = vld [vmem:[%s7030_s20 + $0x1] sm:$0xff]  ;;  %v1587_v26 = vld [vmem:[%s7030_s20 + $0x9] sm:$0xff]  ;;  %v7041_v61 = vld [vmem:[%s7030_s20 + $0x19] sm:$0xff] }
 0x228   : > { %v1570_v58 = vld [vmem:[%s7030_s20] sm:$0xff]  ;;  %5775 = vmatprep.mubr.msk.f32.mxu0 %vm668_vm1, %v1586_v56  ;;  %v1571_v60 = vld [vmem:[%s7030_s20 + $0x8] sm:$0xff]  ;;  %v1572_v35 = vld [vmem:[%s7030_s20 + $0x18] sm:$0xff] }
 0x229   : > { %5801 = vmatprep.mubr.msk.f32.mxu1 %vm668_vm1, %v1570_v58  ;;  %5776 = vmatmul.mubr.msk.f32.vlgmr.msra.gmra.mxu0 %vm668_vm1, %v1587_v26  ;;  %v7062_v62 = vld [vmem:[%s7030_s20 + $0x21] sm:$0xff]  ;;  %v7083_v63 = vld [vmem:[%s7030_s20 + $0x39] sm:$0xff]  ;;  %v7093_v0 = vld [vmem:[%s7030_s20 + $0x49] sm:$0xff] }
 0x22a   : > { %5802 = vmatmul.mubr.msk.f32.vlgmr.msra.gmra.mxu1 %vm668_vm1, %v1571_v60  ;;  %5826 = vmatpush3.msk.msra.mxu0 %vm729_vm0, %v6868_v2  ;;  %v1573_v31 = vld [vmem:[%s7030_s20 + $0x20] sm:$0xff]  ;;  %v7073_v2 = vld [vmem:[%s7030_s20 + $0x31] sm:$0xff]  ;;  %v7096_v29 = vld [vmem:[%s7030_s20 + $0x48] sm:$0xff] }
 0x22b   : > { %5778 = vmatprep.mubr.msk.f32.mxu0 %vm668_vm1, %v7041_v61  ;;  %5804 = vmatprep.mubr.msk.f32.mxu1 %vm668_vm1, %v1572_v35  ;;  %v7086_v10 = vld [vmem:[%s7030_s20 + $0x38] sm:$0xff]  ;;  %v7106_v1 = vld [vmem:[%s7030_s20 + $0x50] sm:$0xff]  ;;  %v7113_v38 = vld [vmem:[%s7030_s20 + $0x61] sm:$0xff] }
 0x22c   : > { %5852 = vmatpush3.msk.msra.mxu1 %vm729_vm0, %v6875_v3  ;;  %5877 = vmatprep.subr.msk.mxu0 %vm729_vm0, %v7046_v21  ;;  %v7076_v3 = vld [vmem:[%s7030_s20 + $0x30] sm:$0xff]  ;;  %v7116_v51 = vld [vmem:[%s7030_s20 + $0x60] sm:$0xff]  ;;  %v7126_v27 = vld [vmem:[%s7030_s20 + $0x68] sm:$0xff] }
 0x22d   : > { %5903 = vmatprep.subr.msk.mxu1 %vm729_vm0, %v7051_v37  ;;  %5779 = vmatmul.mubr.msk.f32.gmra.mxu0 %vm668_vm1, %v7062_v62  ;;  %v7103_v42 = vld [vmem:[%s7030_s20 + $0x51] sm:$0xff]  ;;  %v7123_v59 = vld [vmem:[%s7030_s20 + $0x69] sm:$0xff]  ;;  %v7133_v5 = vld [vmem:[%s7030_s20 + $0x79] sm:$0xff] }
 0x22e   : > { %5805 = vmatmul.mubr.msk.f32.gmra.mxu1 %vm668_vm1, %v1573_v31  ;;  %5781 = vmatprep.mubr.msk.f32.mxu0 %vm668_vm1, %v7073_v2  ;;  %v7136_v39 = vld [vmem:[%s7030_s20 + $0x78] sm:$0xff]  ;;  %v7143_v7 = vld [vmem:[%s7030_s20 + $0x81] sm:$0xff]  ;;  %v7156_v11 = vld [vmem:[%s7030_s20 + $0x90] sm:$0xff] }
 0x22f   : > { %5807 = vmatprep.mubr.msk.f32.mxu1 %vm668_vm1, %v7076_v3  ;;  %v7146_v4 = vld [vmem:[%s7030_s20 + $0x80] sm:$0xff]  ;;  %v7153_v36 = vld [vmem:[%s7030_s20 + $0x91] sm:$0xff]  ;;  %v7173_v13 = vld [vmem:[%s7030_s20 + $0xa9] sm:$0xff] }
 0x230   : > { %v7163_v12 = vld [vmem:[%s7030_s20 + $0x99] sm:$0xff]  ;;  %v7176_v49 = vld [vmem:[%s7030_s20 + $0xa8] sm:$0xff]  ;;  %v7183_v15 = vld [vmem:[%s7030_s20 + $0xb1] sm:$0xff] }
 0x231   : > { %5782 = vmatmul.mubr.msk.f32.gmra.mxu0 %vm668_vm1, %v7083_v63  ;;  %v7166_v6 = vld [vmem:[%s7030_s20 + $0x98] sm:$0xff]  ;;  %v7186_v16 = vld [vmem:[%s7030_s20 + $0xb0] sm:$0xff]  ;;  %v1994_v24 = vld [vmem:[%s7030_s20 + $0x2] sm:$0xff] }
 0x232   : > { %5808 = vmatmul.mubr.msk.f32.gmra.mxu1 %vm668_vm1, %v7086_v10  ;;  %5784 = vmatprep.mubr.msk.f32.mxu0 %vm668_vm1, %v7093_v0  ;;  %v1995_v18 = vld [vmem:[%s7030_s20 + $0xa] sm:$0xff]  ;;  %v1996_v19 = vld [vmem:[%s7030_s20 + $0x1a] sm:$0xff]  ;;  %v1997_v25 = vld [vmem:[%s7030_s20 + $0x22] sm:$0xff] }
 0x233   : > { %5810 = vmatprep.mubr.msk.f32.mxu1 %vm668_vm1, %v7096_v29  ;;  %v7219_v14 = vld [vmem:[%s7030_s20 + $0x32] sm:$0xff]  ;;  %v7226_v30 = vld [vmem:[%s7030_s20 + $0x3a] sm:$0xff]  ;;  %v7233_v33 = vld [vmem:[%s7030_s20 + $0x4a] sm:$0xff] }
 0x234   : > { %v7240_v34 = vld [vmem:[%s7030_s20 + $0x52] sm:$0xff]  ;;  %v7247_v40 = vld [vmem:[%s7030_s20 + $0x62] sm:$0xff]  ;;  %v7254_v41 = vld [vmem:[%s7030_s20 + $0x6a] sm:$0xff] }
 0x235   : > { %5785 = vmatmul.mubr.msk.f32.gmra.mxu0 %vm668_vm1, %v7103_v42  ;;  %v7261_v32 = vld [vmem:[%s7030_s20 + $0x7a] sm:$0xff]  ;;  %v7268_v17 = vld [vmem:[%s7030_s20 + $0x82] sm:$0xff]  ;;  %v7275_v22 = vld [vmem:[%s7030_s20 + $0x92] sm:$0xff] }
 0x236   : > { %5811 = vmatmul.mubr.msk.f32.gmra.mxu1 %vm668_vm1, %v7106_v1  ;;  %5787 = vmatprep.mubr.msk.f32.mxu0 %vm668_vm1, %v7113_v38  ;;  %v7282_v45 = vld [vmem:[%s7030_s20 + $0x9a] sm:$0xff]  ;;  %v7289_v46 = vld [vmem:[%s7030_s20 + $0xaa] sm:$0xff]  ;;  %v7299_v23 = vld [vmem:[%s7030_s20 + $0xb2] sm:$0xff] }
 0x237   : > { %5813 = vmatprep.mubr.msk.f32.mxu1 %vm668_vm1, %v7116_v51  ;;  %v7292_v9 = vld [vmem:[%s7030_s20 + $0xc0] sm:$0xff]  ;;  %v7302_v8 = vld [vmem:[%s7030_s20 + $0xc8] sm:$0xff]  ;;  %v5246_v28 = vld [vmem:[%s7030_s20 + $0xd8] sm:$0xff] }
 0x238   : > { %v5180_v52 = vld [vmem:[%s7030_s20 + $0xc1] sm:$0xff]  ;;  %v5181_v53 = vld [vmem:[%s7030_s20 + $0xc9] sm:$0xff]  ;;  %v5279_v43 = vld [vmem:[%s7030_s20 + $0xd9] sm:$0xff] }
 0x239   : > { %5788 = vmatmul.mubr.msk.f32.gmra.mxu0 %vm668_vm1, %v7123_v59  ;;  %v7374_v44 = vld [vmem:[%s7030_s20 + $0xc2] sm:$0xff]  ;;  %v7381_v54 = vld [vmem:[%s7030_s20 + $0xca] sm:$0xff] }
 0x23a   : > { %5814 = vmatmul.mubr.msk.f32.gmra.mxu1 %vm668_vm1, %v7126_v27  ;;  %5790 = vmatprep.mubr.msk.f32.mxu0 %vm668_vm1, %v7133_v5  ;;  %v5247_v56 = vld [vmem:[%s7030_s20 + $0xe0] sm:$0xff]  ;;  %v653_v26 = vld [vmem:[%s7445_s30 + $0x8] sm:$0xff]  ;;  %v654_v60 = vld [vmem:[%s7445_s30 + $0x10] sm:$0xff] }
 0x23b   : > { %5816 = vmatprep.mubr.msk.f32.mxu1 %vm668_vm1, %v7136_v39  ;;  %v5280_v58 = vld [vmem:[%s7030_s20 + $0xe1] sm:$0xff] }
 0x23d   : > { %5791 = vmatmul.mubr.msk.f32.gmra.mxu0 %vm668_vm1, %v7143_v7 }
 0x23e   : > { %5817 = vmatmul.mubr.msk.f32.gmra.mxu1 %vm668_vm1, %v7146_v4  ;;  %5793 = vmatprep.mubr.msk.f32.mxu0 %vm668_vm1, %v7153_v36 }
 0x23f   : > { %5819 = vmatprep.mubr.msk.f32.mxu1 %vm668_vm1, %v7156_v11 }
 0x241   : > { %5794 = vmatmul.mubr.msk.f32.gmra.mxu0 %vm668_vm1, %v7163_v12 }
 0x242   : > { %5820 = vmatmul.mubr.msk.f32.gmra.mxu1 %vm668_vm1, %v7166_v6  ;;  %5796 = vmatprep.mubr.msk.f32.mxu0 %vm668_vm1, %v7173_v13 }
 0x243   : > { %5822 = vmatprep.mubr.msk.f32.mxu1 %vm668_vm1, %v7176_v49 }
 0x245   : > { %5797 = vmatmul.mubr.msk.f32.gmra.mxu0 %vm668_vm1, %v7183_v15 }
 0x246   : > { %5823 = vmatmul.mubr.msk.f32.gmra.mxu1 %vm668_vm1, %v7186_v16  ;;  %5827 = vmatprep.mubr.msk.f32.mxu0 %vm668_vm1, %v1994_v24 }
 0x247   : > { %5853 = vmatprep.mubr.msk.f32.mxu1 %vm668_vm1, %v1572_v35  ;;  %v658_v35 = vld [vmem:[%s7445_s30 + $0x30] sm:$0xff] }
 0x249   : > { %5828 = vmatmul.mubr.msk.f32.vlgmr.msra.gmra.mxu0 %vm668_vm1, %v1995_v18 }
 0x24a   : > { %5854 = vmatmul.mubr.msk.f32.vlgmr.msra.gmra.mxu1 %vm668_vm1, %v1573_v31  ;;  %5878 = vmatpush3.msk.msra.mxu0 %vm729_vm0, %v7046_v21  ;;  %v656_v21 = vld [vmem:[%s7445_s30 + $0x20] sm:$0xff] }
 0x24b   : > { %5830 = vmatprep.mubr.msk.f32.mxu0 %vm668_vm1, %v1996_v19  ;;  %5856 = vmatprep.mubr.msk.f32.mxu1 %vm668_vm1, %v7076_v3  ;;  %v660_v31 = vld [vmem:[%s7445_s30 + $0x40] sm:$0xff] }
 0x24c   : > { %5904 = vmatpush3.msk.msra.mxu1 %vm729_vm0, %v7051_v37  ;;  %5929 = vmatprep.subr.msk.mxu0 %vm729_vm0, %v4991_v20  ;;  %v657_v37 = vld [vmem:[%s7445_s30 + $0x28] sm:$0xff] }
 0x24d   : > { %5955 = vmatprep.subr.msk.mxu1 %vm729_vm0, %v4992_v57  ;;  %5831 = vmatmul.mubr.msk.f32.gmra.mxu0 %vm668_vm1, %v1997_v25 }
 0x24e   : > { %5857 = vmatmul.mubr.msk.f32.gmra.mxu1 %vm668_vm1, %v7086_v10  ;;  %5833 = vmatprep.mubr.msk.f32.mxu0 %vm668_vm1, %v7219_v14 }
 0x24f   : > { %5859 = vmatprep.mubr.msk.f32.mxu1 %vm668_vm1, %v7096_v29 }
 0x251   : > { %5834 = vmatmul.mubr.msk.f32.gmra.mxu0 %vm668_vm1, %v7226_v30 }
 0x252   : > { %5860 = vmatmul.mubr.msk.f32.gmra.mxu1 %vm668_vm1, %v7106_v1  ;;  %5836 = vmatprep.mubr.msk.f32.mxu0 %vm668_vm1, %v7233_v33 }
 0x253   : > { %5862 = vmatprep.mubr.msk.f32.mxu1 %vm668_vm1, %v7116_v51 }
 0x255   : > { %5837 = vmatmul.mubr.msk.f32.gmra.mxu0 %vm668_vm1, %v7240_v34 }
 0x256   : > { %5863 = vmatmul.mubr.msk.f32.gmra.mxu1 %vm668_vm1, %v7126_v27  ;;  %5839 = vmatprep.mubr.msk.f32.mxu0 %vm668_vm1, %v7247_v40 }
 0x257   : > { %5865 = vmatprep.mubr.msk.f32.mxu1 %vm668_vm1, %v7136_v39 }
 0x259   : > { %5840 = vmatmul.mubr.msk.f32.gmra.mxu0 %vm668_vm1, %v7254_v41 }
 0x25a   : > { %5866 = vmatmul.mubr.msk.f32.gmra.mxu1 %vm668_vm1, %v7146_v4  ;;  %5842 = vmatprep.mubr.msk.f32.mxu0 %vm668_vm1, %v7261_v32 }
 0x25b   : > { %5868 = vmatprep.mubr.msk.f32.mxu1 %vm668_vm1, %v7156_v11 }
 0x25d   : > { %5843 = vmatmul.mubr.msk.f32.gmra.mxu0 %vm668_vm1, %v7268_v17 }
 0x25e   : > { %5869 = vmatmul.mubr.msk.f32.gmra.mxu1 %vm668_vm1, %v7166_v6  ;;  %5845 = vmatprep.mubr.msk.f32.mxu0 %vm668_vm1, %v7275_v22 }
 0x25f   : > { %5871 = vmatprep.mubr.msk.f32.mxu1 %vm668_vm1, %v7176_v49 }
 0x261   : > { %5846 = vmatmul.mubr.msk.f32.gmra.mxu0 %vm668_vm1, %v7282_v45 }
 0x262   : > { %5872 = vmatmul.mubr.msk.f32.gmra.mxu1 %vm668_vm1, %v7186_v16  ;;  %5848 = vmatprep.mubr.msk.f32.mxu0 %vm668_vm1, %v7289_v46 }
 0x263   : > { %5874 = vmatprep.mubr.msk.f32.mxu1 %vm668_vm1, %v7292_v9 }
 0x265   : > { %5849 = vmatmul.mubr.msk.f32.gmra.mxu0 %vm668_vm1, %v7299_v23 }
 0x266   : > { %5875 = vmatmul.mubr.msk.f32.gmra.mxu1 %vm668_vm1, %v7302_v8  ;;  %5879 = vmatprep.mubr.msk.f32.mxu0 %vm668_vm1, %v7041_v61  ;;  %v655_v61 = vld [vmem:[%s7445_s30 + $0x18] sm:$0xff] }
 0x267   : > { %5905 = vmatprep.mubr.msk.f32.mxu1 %vm668_vm1, %v1996_v19 }
 0x269   : > { %5880 = vmatmul.mubr.msk.f32.vlgmr.msra.gmra.mxu0 %vm668_vm1, %v7062_v62  ;;  %v659_v62 = vld [vmem:[%s7445_s30 + $0x38] sm:$0xff] }
 0x26a   : > { %5906 = vmatmul.mubr.msk.f32.vlgmr.msra.gmra.mxu1 %vm668_vm1, %v1997_v25  ;;  %5930 = vmatpush3.msk.msra.mxu0 %vm729_vm0, %v4991_v20 }
 0x26b   : > { %5882 = vmatprep.mubr.msk.f32.mxu0 %vm668_vm1, %v7073_v2  ;;  %5908 = vmatprep.mubr.msk.f32.mxu1 %vm668_vm1, %v7219_v14 }
 0x26c   : > { %5956 = vmatpush3.msk.msra.mxu1 %vm729_vm0, %v4992_v57  ;;  %5981 = vmatprep.subr.msk.mxu0 %vm729_vm0, %v4993_v48 }
 0x26d   : > { %6007 = vmatprep.subr.msk.mxu1 %vm729_vm0, %v6442_v50  ;;  %5883 = vmatmul.mubr.msk.f32.gmra.mxu0 %vm668_vm1, %v7083_v63 }
 0x26e   : > { %5909 = vmatmul.mubr.msk.f32.gmra.mxu1 %vm668_vm1, %v7226_v30  ;;  %5885 = vmatprep.mubr.msk.f32.mxu0 %vm668_vm1, %v7093_v0 }
 0x26f   : > { %5911 = vmatprep.mubr.msk.f32.mxu1 %vm668_vm1, %v7233_v33 }
 0x271   : > { %5886 = vmatmul.mubr.msk.f32.gmra.mxu0 %vm668_vm1, %v7103_v42 }
 0x272   : > { %5912 = vmatmul.mubr.msk.f32.gmra.mxu1 %vm668_vm1, %v7240_v34  ;;  %5888 = vmatprep.mubr.msk.f32.mxu0 %vm668_vm1, %v7113_v38 }
 0x273   : > { %5914 = vmatprep.mubr.msk.f32.mxu1 %vm668_vm1, %v7247_v40 }
 0x275   : > { %5889 = vmatmul.mubr.msk.f32.gmra.mxu0 %vm668_vm1, %v7123_v59 }
 0x276   : > { %5915 = vmatmul.mubr.msk.f32.gmra.mxu1 %vm668_vm1, %v7254_v41  ;;  %5891 = vmatprep.mubr.msk.f32.mxu0 %vm668_vm1, %v7133_v5 }
 0x277   : > { %5917 = vmatprep.mubr.msk.f32.mxu1 %vm668_vm1, %v7261_v32 }
 0x279   : > { %5892 = vmatmul.mubr.msk.f32.gmra.mxu0 %vm668_vm1, %v7143_v7 }
 0x27a   : > { %5918 = vmatmul.mubr.msk.f32.gmra.mxu1 %vm668_vm1, %v7268_v17  ;;  %5894 = vmatprep.mubr.msk.f32.mxu0 %vm668_vm1, %v7153_v36 }
 0x27b   : > { %5920 = vmatprep.mubr.msk.f32.mxu1 %vm668_vm1, %v7275_v22 }
 0x27d   : > { %5895 = vmatmul.mubr.msk.f32.gmra.mxu0 %vm668_vm1, %v7163_v12 }
 0x27e   : > { %5921 = vmatmul.mubr.msk.f32.gmra.mxu1 %vm668_vm1, %v7282_v45  ;;  %5897 = vmatprep.mubr.msk.f32.mxu0 %vm668_vm1, %v7173_v13 }
 0x27f   : > { %5923 = vmatprep.mubr.msk.f32.mxu1 %vm668_vm1, %v7289_v46 }
 0x281   : > { %5898 = vmatmul.mubr.msk.f32.gmra.mxu0 %vm668_vm1, %v7183_v15 }
 0x282   : > { %5924 = vmatmul.mubr.msk.f32.gmra.mxu1 %vm668_vm1, %v7299_v23  ;;  %5900 = vmatprep.mubr.msk.f32.mxu0 %vm668_vm1, %v5180_v52 }
 0x283   : > { %5926 = vmatprep.mubr.msk.f32.mxu1 %vm668_vm1, %v7374_v44 }
 0x285   : > { %5901 = vmatmul.mubr.msk.f32.gmra.mxu0 %vm668_vm1, %v5181_v53 }
 0x286   : > { %5927 = vmatmul.mubr.msk.f32.gmra.mxu1 %vm668_vm1, %v7381_v54  ;;  %5931 = vmatprep.mubr.msk.f32.mxu0 %vm668_vm1, %v7076_v3  ;;  %v662_v3 = vld [vmem:[%s7445_s30 + $0x50] sm:$0xff] }
 0x287   : > { %5957 = vmatprep.mubr.msk.f32.mxu1 %vm668_vm1, %v7073_v2  ;;  %v661_v2 = vld [vmem:[%s7445_s30 + $0x48] sm:$0xff] }
 0x289   : > { %5932 = vmatmul.mubr.msk.f32.vlgmr.msra.gmra.mxu0 %vm668_vm1, %v7086_v10  ;;  %v664_v10 = vld [vmem:[%s7445_s30 + $0x60] sm:$0xff] }
 0x28a   : > { %5958 = vmatmul.mubr.msk.f32.vlgmr.msra.gmra.mxu1 %vm668_vm1, %v7083_v63  ;;  %5982 = vmatpush3.msk.msra.mxu0 %vm729_vm0, %v4993_v48  ;;  %v663_v63 = vld [vmem:[%s7445_s30 + $0x58] sm:$0xff] }
 0x28b   : > { %5934 = vmatprep.mubr.msk.f32.mxu0 %vm668_vm1, %v7096_v29  ;;  %5960 = vmatprep.mubr.msk.f32.mxu1 %vm668_vm1, %v7093_v0  ;;  %v665_v0 = vld [vmem:[%s7445_s30 + $0x68] sm:$0xff]  ;;  %v666_v29 = vld [vmem:[%s7445_s30 + $0x70] sm:$0xff] }
 0x28c   : > { %6008 = vmatpush3.msk.msra.mxu1 %vm729_vm0, %v6442_v50  ;;  %6033 = vmatprep.subr.msk.mxu0 %vm729_vm0, %v625_v55 }
 0x28d   : > { %5935 = vmatmul.mubr.msk.f32.gmra.mxu0 %vm668_vm1, %v7106_v1  ;;  %v667_v1 = vld [vmem:[%s7445_s30 + $0x78] sm:$0xff] }
 0x28e   : > { %5961 = vmatmul.mubr.msk.f32.gmra.mxu1 %vm668_vm1, %v7103_v42  ;;  %5937 = vmatprep.mubr.msk.f32.mxu0 %vm668_vm1, %v7116_v51  ;;  %v5312_v42 = vld [vmem:[%s7030_s20 + $0xda] sm:$0xff] }
 0x28f   : > { %5963 = vmatprep.mubr.msk.f32.mxu1 %vm668_vm1, %v7113_v38  ;;  %v5313_v38 = vld [vmem:[%s7030_s20 + $0xe2] sm:$0xff]  ;;  %s8165_s20 = scalar_lea.vmem %s8232_s18, %s4978_s1 }
 0x291   : > { %5938 = vmatmul.mubr.msk.f32.gmra.mxu0 %vm668_vm1, %v7126_v27 }
 0x292   : > { %5964 = vmatmul.mubr.msk.f32.gmra.mxu1 %vm668_vm1, %v7123_v59  ;;  %5940 = vmatprep.mubr.msk.f32.mxu0 %vm668_vm1, %v7136_v39 }
 0x293   : > { %5966 = vmatprep.mubr.msk.f32.mxu1 %vm668_vm1, %v7133_v5 }
 0x295   : > { %5941 = vmatmul.mubr.msk.f32.gmra.mxu0 %vm668_vm1, %v7146_v4 }
 0x296   : > { %5967 = vmatmul.mubr.msk.f32.gmra.mxu1 %vm668_vm1, %v7143_v7  ;;  %5943 = vmatprep.mubr.msk.f32.mxu0 %vm668_vm1, %v7156_v11 }
 0x297   : > { %5969 = vmatprep.mubr.msk.f32.mxu1 %vm668_vm1, %v7153_v36 }
 0x299   : > { %5944 = vmatmul.mubr.msk.f32.gmra.mxu0 %vm668_vm1, %v7166_v6 }
 0x29a   : > { %5970 = vmatmul.mubr.msk.f32.gmra.mxu1 %vm668_vm1, %v7163_v12  ;;  %5946 = vmatprep.mubr.msk.f32.mxu0 %vm668_vm1, %v7176_v49 }
 0x29b   : > { %5972 = vmatprep.mubr.msk.f32.mxu1 %vm668_vm1, %v7173_v13 }
 0x29d   : > { %5947 = vmatmul.mubr.msk.f32.gmra.mxu0 %vm668_vm1, %v7186_v16 }
 0x29e   : > { %5973 = vmatmul.mubr.msk.f32.gmra.mxu1 %vm668_vm1, %v7183_v15  ;;  %5949 = vmatprep.mubr.msk.f32.mxu0 %vm668_vm1, %v7292_v9 }
 0x29f   : > { %5975 = vmatprep.mubr.msk.f32.mxu1 %vm668_vm1, %v5180_v52 }
 0x2a1   : > { %5950 = vmatmul.mubr.msk.f32.gmra.mxu0 %vm668_vm1, %v7302_v8 }
 0x2a2   : > { %5976 = vmatmul.mubr.msk.f32.gmra.mxu1 %vm668_vm1, %v5181_v53  ;;  %5952 = vmatprep.mubr.msk.f32.mxu0 %vm668_vm1, %v5246_v28 }
 0x2a3   : > { %5978 = vmatprep.mubr.msk.f32.mxu1 %vm668_vm1, %v5279_v43 }
 0x2a5   : > { %5953 = vmatmul.mubr.msk.f32.gmra.mxu0 %vm668_vm1, %v5247_v56 }
 0x2a6   : > { %5979 = vmatmul.mubr.msk.f32.gmra.mxu1 %vm668_vm1, %v5280_v58  ;;  %5983 = vmatprep.mubr.msk.f32.mxu0 %vm668_vm1, %v7219_v14 }
 0x2a7   : > { %6009 = vmatprep.mubr.msk.f32.mxu1 %vm668_vm1, %v652_v47 }
 0x2a9   : > { %5984 = vmatmul.mubr.msk.f32.vlgmr.msra.gmra.mxu0 %vm668_vm1, %v7226_v30 }
 0x2aa   : > { %6010 = vmatmul.mubr.msk.f32.vlgmr.msra.gmra.mxu1 %vm668_vm1, %v653_v26  ;;  %5986 = vmatprep.mubr.msk.f32.mxu0 %vm668_vm1, %v7233_v33 }
 0x2ab   : > { %6012 = vmatprep.mubr.msk.f32.mxu1 %vm668_vm1, %v654_v60  ;;  %6034 = vmatpush3.msk.msra.mxu0 %vm729_vm0, %v625_v55 }
 0x2ad   : > { %5987 = vmatmul.mubr.msk.f32.gmra.mxu0 %vm668_vm1, %v7240_v34 }
 0x2ae   : > { %6013 = vmatmul.mubr.msk.f32.gmra.mxu1 %vm668_vm1, %v655_v61  ;;  %5989 = vmatprep.mubr.msk.f32.mxu0 %vm668_vm1, %v7247_v40 }
 0x2af   : > { %6015 = vmatprep.mubr.msk.f32.mxu1 %vm668_vm1, %v656_v21 }
 0x2b1   : > { %5990 = vmatmul.mubr.msk.f32.gmra.mxu0 %vm668_vm1, %v7254_v41 }
 0x2b2   : > { %6016 = vmatmul.mubr.msk.f32.gmra.mxu1 %vm668_vm1, %v657_v37  ;;  %5992 = vmatprep.mubr.msk.f32.mxu0 %vm668_vm1, %v7261_v32 }
 0x2b3   : > { %6018 = vmatprep.mubr.msk.f32.mxu1 %vm668_vm1, %v658_v35 }
 0x2b5   : > { %5993 = vmatmul.mubr.msk.f32.gmra.mxu0 %vm668_vm1, %v7268_v17 }
 0x2b6   : > { %6019 = vmatmul.mubr.msk.f32.gmra.mxu1 %vm668_vm1, %v659_v62  ;;  %5995 = vmatprep.mubr.msk.f32.mxu0 %vm668_vm1, %v7275_v22 }
 0x2b7   : > { %6021 = vmatprep.mubr.msk.f32.mxu1 %vm668_vm1, %v660_v31 }
 0x2b9   : > { %5996 = vmatmul.mubr.msk.f32.gmra.mxu0 %vm668_vm1, %v7282_v45 }
 0x2ba   : > { %6022 = vmatmul.mubr.msk.f32.gmra.mxu1 %vm668_vm1, %v661_v2  ;;  %5998 = vmatprep.mubr.msk.f32.mxu0 %vm668_vm1, %v7289_v46 }
 0x2bb   : > { %6024 = vmatprep.mubr.msk.f32.mxu1 %vm668_vm1, %v662_v3 }
 0x2bd   : > { %5999 = vmatmul.mubr.msk.f32.gmra.mxu0 %vm668_vm1, %v7299_v23 }
 0x2be   : > { %6025 = vmatmul.mubr.msk.f32.gmra.mxu1 %vm668_vm1, %v663_v63  ;;  %6001 = vmatprep.mubr.msk.f32.mxu0 %vm668_vm1, %v7374_v44 }
 0x2bf   : > { %6027 = vmatprep.mubr.msk.f32.mxu1 %vm668_vm1, %v664_v10 }
 0x2c1   : > { %6002 = vmatmul.mubr.msk.f32.gmra.mxu0 %vm668_vm1, %v7381_v54 }
 0x2c2   : > { %6028 = vmatmul.mubr.msk.f32.gmra.mxu1 %vm668_vm1, %v665_v0  ;;  %6004 = vmatprep.mubr.msk.f32.mxu0 %vm668_vm1, %v5312_v42 }
 0x2c3   : > { %6030 = vmatprep.mubr.msk.f32.mxu1 %vm668_vm1, %v666_v29 }
 0x2c5   : > { %6005 = vmatmul.mubr.msk.f32.gmra.mxu0 %vm668_vm1, %v5313_v38 }
 0x2c6   : > { %6031 = vmatmul.mubr.msk.f32.gmra.mxu1 %vm668_vm1, %v667_v1  ;;  %6035 = vmatprep.mubr.msk.f32.mxu0 %vm668_vm1, %v652_v47 }
 0x2c9   : > { %6036 = vmatmul.mubr.msk.f32.vlgmr.msra.gmra.mxu0 %vm668_vm1, %v653_v26 }
 0x2ca   : > { %6038 = vmatprep.mubr.msk.f32.mxu0 %vm668_vm1, %v654_v60 }
 0x2cd   : > { %6039 = vmatmul.mubr.msk.f32.gmra.mxu0 %vm668_vm1, %v655_v61 }
 0x2ce   : > { %6041 = vmatprep.mubr.msk.f32.mxu0 %vm668_vm1, %v656_v21 }
 0x2d1   : > { %6042 = vmatmul.mubr.msk.f32.gmra.mxu0 %vm668_vm1, %v657_v37 }
 0x2d2   : > { %6044 = vmatprep.mubr.msk.f32.mxu0 %vm668_vm1, %v658_v35 }
 0x2d5   : > { %6045 = vmatmul.mubr.msk.f32.gmra.mxu0 %vm668_vm1, %v659_v62 }
 0x2d6   : > { %6047 = vmatprep.mubr.msk.f32.mxu0 %vm668_vm1, %v660_v31 }
 0x2d9   : > { %6048 = vmatmul.mubr.msk.f32.gmra.mxu0 %vm668_vm1, %v661_v2 }
 0x2da   : > { %6050 = vmatprep.mubr.msk.f32.mxu0 %vm668_vm1, %v662_v3 }
 0x2dd   : > { %6051 = vmatmul.mubr.msk.f32.gmra.mxu0 %vm668_vm1, %v663_v63 }
 0x2de   : > { %6053 = vmatprep.mubr.msk.f32.mxu0 %vm668_vm1, %v664_v10 }
 0x2e1   : > { %6054 = vmatmul.mubr.msk.f32.gmra.mxu0 %vm668_vm1, %v665_v0 }
 0x2e2   : > { %6056 = vmatprep.mubr.msk.f32.mxu0 %vm668_vm1, %v666_v29 }
 0x2e5   : > { %6057 = vmatmul.mubr.msk.f32.gmra.mxu0 %vm668_vm1, %v667_v1 }
 0x2e9   : > { %v5777_v51 = vpop.f32.mrf.mxu0 }
 0x2ea   : > { %v5803_v59 = vpop.f32.mrf.mxu1 }
 0x2eb   : > { %v1921_v27 = vadd.f32 %v5803_v59, %v5777_v51  ;;  %v1719_v5 = vpop.f32.mrf.mxu0 }
 0x2ec   : > { %v1915_v39 = vpop.f32.mrf.mxu1 }
 0x2ed   : > { %v1916_v7 = vadd.f32 %v1915_v39, %v1719_v5  ;;  %v5780_v4 = vpop.f32.mrf.mxu0 }
 0x2ee   : > { %v5806_v36 = vpop.f32.mrf.mxu1 }
 0x2ef   : > { %v1931_v11 = vadd.f32 %v5806_v36, %v5780_v4  ;;  %v1729_v12 = vpop.f32.mrf.mxu0 }
 0x2f0   : > { %v1925_v6 = vpop.f32.mrf.mxu1 }
 0x2f1   : > { %v1926_v13 = vadd.f32 %v1925_v6, %v1729_v12  ;;  %v5783_v49 = vpop.f32.mrf.mxu0 }
 0x2f2   : > { %v5809_v15 = vpop.f32.mrf.mxu1 }
 0x2f3   : > { %v1941_v16 = vadd.f32 %v5809_v15, %v5783_v49  ;;  %v1739_v24 = vpop.f32.mrf.mxu0 }
 0x2f4   : > { %v1935_v18 = vpop.f32.mrf.mxu1 }
 0x2f5   : > { %v1936_v19 = vadd.f32 %v1935_v18, %v1739_v24  ;;  %v5786_v20 = vpop.f32.mrf.mxu0 }
 0x2f6   : > { %v5812_v57 = vpop.f32.mrf.mxu1 }
 0x2f7   : > { %v1951_v25 = vadd.f32 %v5812_v57, %v5786_v20  ;;  %v1749_v14 = vpop.f32.mrf.mxu0 }
 0x2f8   : > { %v1945_v30 = vpop.f32.mrf.mxu1 }
 0x2f9   : > { %v1946_v33 = vadd.f32 %v1945_v30, %v1749_v14  ;;  %v5789_v34 = vpop.f32.mrf.mxu0 }
 0x2fa   : > { %v5815_v40 = vpop.f32.mrf.mxu1 }
 0x2fb   : > { %v1961_v41 = vadd.f32 %v5815_v40, %v5789_v34  ;;  %v1759_v32 = vpop.f32.mrf.mxu0 }
 0x2fc   : > { %v1955_v17 = vpop.f32.mrf.mxu1 }
 0x2fd   : > { %v1956_v22 = vadd.f32 %v1955_v17, %v1759_v32  ;;  %v5792_v45 = vpop.f32.mrf.mxu0 }
 0x2fe   : > { %v5818_v46 = vpop.f32.mrf.mxu1 }
 0x2ff   : > { %v1971_v9 = vadd.f32 %v5818_v46, %v5792_v45  ;;  %v1769_v23 = vpop.f32.mrf.mxu0 }
 0x300   : > { %v1965_v8 = vpop.f32.mrf.mxu1 }
 0x301   : > { %v1966_v48 = vadd.f32 %v1965_v8, %v1769_v23  ;;  %v5795_v50 = vpop.f32.mrf.mxu0 }
 0x302   : > { %v5821_v52 = vpop.f32.mrf.mxu1 }
 0x303   : > { %v1981_v44 = vadd.f32 %v5821_v52, %v5795_v50  ;;  %v1779_v53 = vpop.f32.mrf.mxu0 }
 0x304   : > { %v1975_v54 = vpop.f32.mrf.mxu1 }
 0x305   : > { %v1976_v55 = vadd.f32 %v1975_v54, %v1779_v53  ;;  %v5798_v28 = vpop.f32.mrf.mxu0 }
 0x306   : > { %v5824_v43 = vpop.f32.mrf.mxu1 }
 0x307   : > { %v1991_v47 = vadd.f32 %v5824_v43, %v5798_v28  ;;  %v1789_v56 = vpop.f32.mrf.mxu0 }
 0x308   : > { %v1985_v58 = vpop.f32.mrf.mxu1 }
 0x309   : > { %v7539_v26 = vadd.f32 %v1985_v58, %v1789_v56  ;;  %v5829_v60 = vpop.f32.mrf.mxu0 }
 0x30a   : > { %v5855_v61 = vpop.f32.mrf.mxu1  ;;  %v2207_v21 = vadd.f32 %v5829_v60, %v1921_v27 }
 0x30b   : > { %v2127_v37 = vpop.f32.mrf.mxu0 }
 0x30c   : > { %v2358_v35 = vpop.f32.mrf.mxu1  ;;  %v2438_v62 = vadd.f32 %v5855_v61, %v2207_v21  ;;  %v2206_v31 = vadd.f32 %v2127_v37, %v1916_v7 }
 0x30d   : > { %v5832_v2 = vpop.f32.mrf.mxu0 }
 0x30e   : > { %v5858_v3 = vpop.f32.mrf.mxu1  ;;  %v7541_v63 = vadd.f32 %v2358_v35, %v2206_v31  ;;  %v2209_v10 = vadd.f32 %v5832_v2, %v1931_v11 }
 0x30f   : > { %v2137_v0 = vpop.f32.mrf.mxu0 }
 0x310   : > { %v2368_v29 = vpop.f32.mrf.mxu1  ;;  %v2440_v42 = vadd.f32 %v5858_v3, %v2209_v10  ;;  %v2208_v1 = vadd.f32 %v2137_v0, %v1926_v13 }
 0x311   : > { %v5835_v38 = vpop.f32.mrf.mxu0 }
 0x312   : > { %v5861_v51 = vpop.f32.mrf.mxu1  ;;  %v2439_v59 = vadd.f32 %v2368_v29, %v2208_v1  ;;  %v2211_v5 = vadd.f32 %v5835_v38, %v1941_v16 }
 0x313   : > { %v2147_v39 = vpop.f32.mrf.mxu0 }
 0x314   : > { %v2378_v4 = vpop.f32.mrf.mxu1  ;;  %v2442_v27 = vadd.f32 %v5861_v51, %v2211_v5  ;;  %v2210_v36 = vadd.f32 %v2147_v39, %v1936_v19 }
 0x315   : > { %v5838_v12 = vpop.f32.mrf.mxu0 }
 0x316   : > { %v5864_v6 = vpop.f32.mrf.mxu1  ;;  %v2441_v7 = vadd.f32 %v2378_v4, %v2210_v36  ;;  %v2213_v49 = vadd.f32 %v5838_v12, %v1951_v25  ;;  %v626_v36 = vld [vmem:[%s8230_s16] sm:$0xf] }
 0x317   : > { %v2157_v15 = vpop.f32.mrf.mxu0  ;;  %6085 = vmatprep.subr.msk.mxu0 %vm729_vm0, %v626_v36 }
 0x318   : > { %v2388_v24 = vpop.f32.mrf.mxu1  ;;  %v2444_v18 = vadd.f32 %v5864_v6, %v2213_v49  ;;  %v2212_v11 = vadd.f32 %v2157_v15, %v1946_v33  ;;  %6086 = vmatpush3.msk.msra.mxu0 %vm729_vm0, %v626_v36 }
 0x319   : > { %v5841_v20 = vpop.f32.mrf.mxu0 }
 0x31a   : > { %v5867_v57 = vpop.f32.mrf.mxu1  ;;  %v2443_v14 = vadd.f32 %v2388_v24, %v2212_v11  ;;  %v2215_v13 = vadd.f32 %v5841_v20, %v1961_v41 }
 0x31b   : > { %v2167_v30 = vpop.f32.mrf.mxu0 }
 0x31c   : > { %v2398_v34 = vpop.f32.mrf.mxu1  ;;  %v2446_v40 = vadd.f32 %v5867_v57, %v2215_v13  ;;  %v2214_v16 = vadd.f32 %v2167_v30, %v1956_v22 }
 0x31d   : > { %v5844_v32 = vpop.f32.mrf.mxu0 }
 0x31e   : > { %v5870_v17 = vpop.f32.mrf.mxu1  ;;  %v2445_v45 = vadd.f32 %v2398_v34, %v2214_v16  ;;  %v2217_v19 = vadd.f32 %v5844_v32, %v1971_v9 }
 0x31f   : > { %v2177_v46 = vpop.f32.mrf.mxu0 }
 0x320   : > { %v2408_v23 = vpop.f32.mrf.mxu1  ;;  %v2448_v8 = vadd.f32 %v5870_v17, %v2217_v19  ;;  %v2216_v25 = vadd.f32 %v2177_v46, %v1966_v48 }
 0x321   : > { %v5847_v50 = vpop.f32.mrf.mxu0 }
 0x322   : > { %v5873_v52 = vpop.f32.mrf.mxu1  ;;  %v2447_v53 = vadd.f32 %v2408_v23, %v2216_v25  ;;  %v2219_v33 = vadd.f32 %v5847_v50, %v1981_v44 }
 0x323   : > { %v2187_v54 = vpop.f32.mrf.mxu0 }
 0x324   : > { %v2418_v28 = vpop.f32.mrf.mxu1  ;;  %v2450_v43 = vadd.f32 %v5873_v52, %v2219_v33  ;;  %v2218_v41 = vadd.f32 %v2187_v54, %v1976_v55  ;;  %v627_v55 = vld [vmem:[%s8231_s17] sm:$0xf] }
 0x325   : > { %v5850_v56 = vpop.f32.mrf.mxu0  ;;  %6059 = vmatprep.subr.msk.mxu1 %vm729_vm0, %v627_v55 }
 0x326   : > { %v5876_v58 = vpop.f32.mrf.mxu1  ;;  %v2449_v60 = vadd.f32 %v2418_v28, %v2218_v41  ;;  %v2221_v22 = vadd.f32 %v5850_v56, %v1991_v47  ;;  %6060 = vmatpush3.msk.msra.mxu1 %vm729_vm0, %v627_v55 }
 0x327   : > { %v2197_v61 = vpop.f32.mrf.mxu0 }
 0x328   : > { %v2428_v21 = vpop.f32.mrf.mxu1  ;;  %v2452_v37 = vadd.f32 %v5876_v58, %v2221_v22  ;;  %v2220_v9 = vadd.f32 %v2197_v61, %v7539_v26 }
 0x329   : > { %v5881_v35 = vpop.f32.mrf.mxu0 }
 0x32a   : > { %v7544_v31 = vpop.f32.mrf.mxu1  ;;  %v2451_v48 = vadd.f32 %v2428_v21, %v2220_v9  ;;  %v7546_v2 = vadd.f32 %v5881_v35, %v2438_v62 }
 0x32b   : > { %v7548_v44 = vpop.f32.mrf.mxu0 }
 0x32c   : > { %v7550_v3 = vpop.f32.mrf.mxu1 }
 0x32d   : > { %v5884_v47 = vpop.f32.mrf.mxu0 }
 0x32e   : > { %v5910_v10 = vpop.f32.mrf.mxu1  ;;  %v2668_v0 = vadd.f32 %v5884_v47, %v2440_v42 }
 0x32f   : > { %v2596_v26 = vpop.f32.mrf.mxu0 }
 0x330   : > { %v7557_v29 = vpop.f32.mrf.mxu1  ;;  %v7559_v62 = vadd.f32 %v5910_v10, %v2668_v0  ;;  %v7561_v1 = vadd.f32 %v2596_v26, %v2439_v59 }
 0x331   : > { %v5887_v38 = vpop.f32.mrf.mxu0 }
 0x332   : > { %v5913_v51 = vpop.f32.mrf.mxu1  ;;  %v2670_v5 = vadd.f32 %v5887_v38, %v2442_v27 }
 0x333   : > { %v2606_v39 = vpop.f32.mrf.mxu0 }
 0x334   : > { %v7563_v4 = vpop.f32.mrf.mxu1  ;;  %v7568_v42 = vadd.f32 %v5913_v51, %v2670_v5  ;;  %v7570_v12 = vadd.f32 %v2606_v39, %v2441_v7 }
 0x335   : > { %v5890_v6 = vpop.f32.mrf.mxu0 }
 0x336   : > { %v5916_v49 = vpop.f32.mrf.mxu1  ;;  %v2672_v59 = vadd.f32 %v5890_v6, %v2444_v18 }
 0x337   : > { %v2616_v15 = vpop.f32.mrf.mxu0 }
 0x338   : > { %v2844_v27 = vpop.f32.mrf.mxu1  ;;  %v7574_v24 = vadd.f32 %v5916_v49, %v2672_v59  ;;  %v2671_v11 = vadd.f32 %v2616_v15, %v2443_v14 }
 0x339   : > { %v5893_v20 = vpop.f32.mrf.mxu0 }
 0x33a   : > { %v5919_v57 = vpop.f32.mrf.mxu1  ;;  %v7576_v13 = vadd.f32 %v2844_v27, %v2671_v11  ;;  %v2674_v30 = vadd.f32 %v5893_v20, %v2446_v40  ;;  %v2665_v27 = vadd.f32 %v7548_v44, %v7541_v63 }
 0x33b   : > { %v2626_v34 = vpop.f32.mrf.mxu0 }
 0x33c   : > { %v2854_v7 = vpop.f32.mrf.mxu1  ;;  %v7578_v16 = vadd.f32 %v5919_v57, %v2674_v30  ;;  %v2673_v32 = vadd.f32 %v2626_v34, %v2445_v45  ;;  %v2894_v34 = vadd.f32 %v7544_v31, %v7546_v2 }
 0x33d   : > { %v5896_v17 = vpop.f32.mrf.mxu0 }
 0x33e   : > { %v5922_v19 = vpop.f32.mrf.mxu1  ;;  %v7580_v46 = vadd.f32 %v2854_v7, %v2673_v32  ;;  %v2676_v18 = vadd.f32 %v5896_v17, %v2448_v8  ;;  %v2893_v7 = vadd.f32 %v7550_v3, %v2665_v27 }
 0x33f   : > { %v2636_v23 = vpop.f32.mrf.mxu0 }
 0x340   : > { %v2864_v25 = vpop.f32.mrf.mxu1  ;;  %v7582_v50 = vadd.f32 %v5922_v19, %v2676_v18  ;;  %v2675_v14 = vadd.f32 %v2636_v23, %v2447_v53  ;;  %v2895_v19 = vadd.f32 %v7557_v29, %v7561_v1  ;;  %v2897_v18 = vadd.f32 %v7563_v4, %v7570_v12 }
 0x341   : > { %v5899_v52 = vpop.f32.mrf.mxu0 }
 0x342   : > { %v5925_v33 = vpop.f32.mrf.mxu1  ;;  %v2678_v54 = vadd.f32 %v5899_v52, %v2450_v43  ;;  %v2903_v2 = vadd.f32 %v2864_v25, %v2675_v14 }
 0x343   : > { %v2646_v28 = vpop.f32.mrf.mxu0 }
 0x344   : > { %v2874_v40 = vpop.f32.mrf.mxu1  ;;  %v7584_v41 = vadd.f32 %v5925_v33, %v2678_v54  ;;  %v2677_v56 = vadd.f32 %v2646_v28, %v2449_v60 }
 0x345   : > { %v5902_v58 = vpop.f32.mrf.mxu0 }
 0x346   : > { %v5928_v45 = vpop.f32.mrf.mxu1  ;;  %v2680_v22 = vadd.f32 %v5902_v58, %v2452_v37 }
 0x347   : > { %v2656_v61 = vpop.f32.mrf.mxu0 }
 0x348   : > { %v2884_v21 = vpop.f32.mrf.mxu1  ;;  %v7586_v9 = vadd.f32 %v5928_v45, %v2680_v22  ;;  %v2679_v8 = vadd.f32 %v2656_v61, %v2451_v48  ;;  %v2905_v45 = vadd.f32 %v2874_v40, %v2677_v56 }
 0x349   : > { %v5933_v35 = vpop.f32.mrf.mxu0 }
 0x34a   : > { %v5959_v55 = vpop.f32.mrf.mxu1  ;;  %v3125_v23 = vadd.f32 %v5933_v35, %v2894_v34  ;;  %v2907_v22 = vadd.f32 %v2884_v21, %v2679_v8 }
 0x34b   : > { %v3045_v47 = vpop.f32.mrf.mxu0 }
 0x34c   : > { %v3273_v53 = vpop.f32.mrf.mxu1  ;;  %v3124_v52 = vadd.f32 %v3045_v47, %v2893_v7  ;;  %v3353_v4 = vadd.f32 %v5959_v55, %v3125_v23 }
 0x34d   : > { %v5936_v10 = vpop.f32.mrf.mxu0 }
 0x34e   : > { %v5962_v0 = vpop.f32.mrf.mxu1  ;;  %v3127_v33 = vadd.f32 %v5936_v10, %v7559_v62  ;;  %v3352_v12 = vadd.f32 %v3273_v53, %v3124_v52  ;;  %v7620_v53 = vld [vmem:[%s8217_s3] ss:$0 sm:$0xff] }
 0x34f   : > { %v3055_v43 = vpop.f32.mrf.mxu0 }
 0x350   : > { %v3283_v26 = vpop.f32.mrf.mxu1  ;;  %v3126_v54 = vadd.f32 %v3055_v43, %v2895_v19  ;;  %v3355_v25 = vadd.f32 %v5962_v0, %v3127_v33 }
 0x351   : > { %v5939_v38 = vpop.f32.mrf.mxu0 }
 0x352   : > { %v5965_v51 = vpop.f32.mrf.mxu1  ;;  %v3129_v28 = vadd.f32 %v5939_v38, %v7568_v42  ;;  %v7606_v42 = vld [vmem:[%s8244_s25] ss:$0 sm:$0xff]  ;;  %v3354_v14 = vadd.f32 %v3283_v26, %v3126_v54 }
 0x353   : > { %v3065_v5 = vpop.f32.mrf.mxu0 }
 0x354   : > { %v3293_v60 = vpop.f32.mrf.mxu1  ;;  %v3128_v31 = vadd.f32 %v3065_v5, %v2897_v18  ;;  %v3357_v40 = vadd.f32 %v5965_v51, %v3129_v28  ;;  %v7635_v5 = vld [vmem:[%s8223_s9] ss:$0 sm:$0xff] }
 0x355   : > { %v5942_v39 = vpop.f32.mrf.mxu0 }
 0x356   : > { %v5968_v36 = vpop.f32.mrf.mxu1  ;;  %v3131_v29 = vadd.f32 %v5942_v39, %v7574_v24  ;;  %v7608_v56 = vadd.f32 %v3293_v60, %v3128_v31 }
 0x357   : > { %v3075_v37 = vpop.f32.mrf.mxu0 }
 0x358   : > { %v3303_v6 = vpop.f32.mrf.mxu1  ;;  %v3130_v1 = vadd.f32 %v3075_v37, %v7576_v13  ;;  %v7622_v10 = vadd.f32 %v5968_v36, %v3131_v29 }
 0x359   : > { %v5945_v49 = vpop.f32.mrf.mxu0 }
 0x35a   : > { %v5971_v59 = vpop.f32.mrf.mxu1  ;;  %v3133_v61 = vadd.f32 %v5945_v49, %v7578_v16  ;;  %v7624_v0 = vadd.f32 %v3303_v6, %v3130_v1 }
 0x35b   : > { %v3085_v15 = vpop.f32.mrf.mxu0 }
 0x35c   : > { %v3313_v48 = vpop.f32.mrf.mxu1  ;;  %v3132_v35 = vadd.f32 %v3085_v15, %v7580_v46  ;;  %v7615_v46 = vld [vmem:[%s8222_s8] ss:$0 sm:$0xff]  ;;  %v7627_v43 = vadd.f32 %v5971_v59, %v3133_v61 }
 0x35d   : > { %v5948_v11 = vpop.f32.mrf.mxu0 }
 0x35e   : > { %v5974_v20 = vpop.f32.mrf.mxu1  ;;  %v3135_v24 = vadd.f32 %v5948_v11, %v7582_v50  ;;  %v7629_v26 = vadd.f32 %v3313_v48, %v3132_v35 }
 0x35f   : > { %v3095_v57 = vpop.f32.mrf.mxu0 }
 0x360   : > { %v3323_v30 = vpop.f32.mrf.mxu1  ;;  %v3134_v13 = vadd.f32 %v3095_v57, %v2903_v2  ;;  %v7642_v59 = vadd.f32 %v5974_v20, %v3135_v24 }
 0x361   : > { %v5951_v32 = vpop.f32.mrf.mxu0 }
 0x362   : > { %v5977_v17 = vpop.f32.mrf.mxu1  ;;  %v3137_v21 = vadd.f32 %v5951_v32, %v7584_v41  ;;  %v7644_v15 = vadd.f32 %v3323_v30, %v3134_v13 }
 0x363   : > { %v3105_v63 = vpop.f32.mrf.mxu0 }
 0x364   : > { %v3333_v44 = vpop.f32.mrf.mxu1  ;;  %v3136_v16 = vadd.f32 %v3105_v63, %v2905_v45 }
 0x365   : > { %v5954_v3 = vpop.f32.mrf.mxu0 }
 0x366   : > { %v5980_v58 = vpop.f32.mrf.mxu1  ;;  %v3139_v38 = vadd.f32 %v5954_v3, %v7586_v9  ;;  %v7646_v9 = vadd.f32 %v5977_v17, %v3137_v21  ;;  %v7648_v48 = vadd.f32 %v3333_v44, %v3136_v16 }
 0x367   : > { %v3115_v62 = vpop.f32.mrf.mxu0 }
 0x368   : > { %v3343_v47 = vpop.f32.mrf.mxu1  ;;  %v3138_v51 = vadd.f32 %v3115_v62, %v2907_v22  ;;  %v7658_v20 = vadd.f32 %v5980_v58, %v3139_v38 }
 0x369   : > { %v5985_v8 = vpop.f32.mrf.mxu0 }
 0x36a   : > { %v6011_v55 = vpop.f32.mrf.mxu1  ;;  %v3581_v50 = vadd.f32 %v5985_v8, %v3353_v4  ;;  %v7660_v30 = vadd.f32 %v3343_v47, %v3138_v51 }
 0x36b   : > { %v3955_v41 = vmul.f32 %v6011_v55, %v7606_v42  ;;  %v3501_v60 = vpop.f32.mrf.mxu0 }
 0x36c   : > { %v3868_v39 = vpop.f32.mrf.mxu1  ;;  %v3604_v36 = vmul.f32 %v7615_v46, %v3581_v50  ;;  %v3580_v6 = vadd.f32 %v3501_v60, %v3352_v12 }
 0x36d   : > { %v7639_v37 = vadd.f32 %v7620_v53, %v3955_v41  ;;  %v3954_v49 = vmul.f32 %v7606_v42, %v3868_v39  ;;  %v5988_v27 = vpop.f32.mrf.mxu0 }
 0x36e   : > { %v6014_v11 = vpop.f32.mrf.mxu1  ;;  %v7651_v57 = vadd.f32 %v7635_v5, %v3604_v36  ;;  %v3603_v7 = vmul.f32 %v7615_v46, %v3580_v6  ;;  %v3583_v17 = vadd.f32 %v5988_v27, %v3355_v25 }
 0x36f   : > { %v5369_v34 = vmul.f32 -1.442695, %v7639_v37  ;;  %v7656_v32 = vadd.f32 %v7620_v53, %v3954_v49  ;;  %v3957_v19 = vmul.f32 %v6014_v11, %v7606_v42  ;;  %v3511_v18 = vpop.f32.mrf.mxu0 }
 0x370   : > { %v3878_v23 = vpop.f32.mrf.mxu1  ;;  %v5334_v52 = vmul.f32 -1.442695, %v7651_v57  ;;  %v7665_v63 = vadd.f32 %v7635_v5, %v3603_v7  ;;  %v3606_v33 = vmul.f32 %v7615_v46, %v3583_v17  ;;  %v3582_v28 = vadd.f32 %v3511_v18, %v3354_v14 }
 0x371   : > { %6314 = vpow2.f32 %v5369_v34  ;;  %v5368_v44 = vmul.f32 -1.442695, %v7656_v32  ;;  %v7670_v54 = vadd.f32 %v7620_v53, %v3957_v19  ;;  %v3956_v31 = vmul.f32 %v7606_v42, %v3878_v23  ;;  %v5991_v2 = vpop.f32.mrf.mxu0 }
 0x372   : > { %v6017_v3 = vpop.f32.mrf.mxu1  ;;  %6316 = vpow2.f32 %v5334_v52  ;;  %v5333_v58 = vmul.f32 -1.442695, %v7665_v63  ;;  %v3585_v45 = vadd.f32 %v5991_v2, %v3357_v40  ;;  %v7676_v29 = vadd.f32 %v7635_v5, %v3606_v33 }
 0x373   : > { %v3959_v22 = vmul.f32 %v6017_v3, %v7606_v42  ;;  %6318 = vpow2.f32 %v5368_v44  ;;  %v5371_v1 = vmul.f32 -1.442695, %v7670_v54  ;;  %v3605_v4 = vmul.f32 %v7615_v46, %v3582_v28  ;;  %v3521_v12 = vpop.f32.mrf.mxu0 }
 0x374   : > { %v3888_v61 = vpop.f32.mrf.mxu1  ;;  %6320 = vpow2.f32 %v5333_v58  ;;  %v7681_v35 = vadd.f32 %v7620_v53, %v3956_v31  ;;  %v3608_v62 = vmul.f32 %v7615_v46, %v3585_v45  ;;  %v5336_v25 = vmul.f32 -1.442695, %v7676_v29 }
 0x375   : > { %v7685_v47 = vadd.f32 %v7620_v53, %v3959_v22  ;;  %6322 = vpow2.f32 %v5371_v1  ;;  %v7689_v14 = vadd.f32 %v7635_v5, %v3605_v4  ;;  %v3584_v40 = vadd.f32 %v3521_v12, %v7608_v56  ;;  %v5994_v24 = vpop.f32.mrf.mxu0 }
 0x376   : > { %v6020_v13 = vpop.f32.mrf.mxu1  ;;  %v5370_v21 = vmul.f32 -1.442695, %v7681_v35  ;;  %v7694_v16 = vadd.f32 %v7635_v5, %v3608_v62  ;;  %v3958_v55 = vmul.f32 %v7606_v42, %v3888_v61  ;;  %6324 = vpow2.f32 %v5336_v25 }
 0x377   : > { %v5373_v8 = vmul.f32 -1.442695, %v7685_v47  ;;  %v5335_v50 = vmul.f32 -1.442695, %v7689_v14  ;;  %v3607_v41 = vmul.f32 %v7615_v46, %v3584_v40  ;;  %v3587_v38 = vadd.f32 %v5994_v24, %v7622_v10  ;;  %v3531_v51 = vpop.f32.mrf.mxu0 }
 0x378   : > { %v3898_v56 = vpop.f32.mrf.mxu1  ;;  %6326 = vpow2.f32 %v5370_v21  ;;  %v5338_v60 = vmul.f32 -1.442695, %v7694_v16  ;;  %v7703_v39 = vadd.f32 %v7620_v53, %v3958_v55  ;;  %v3961_v36 = vmul.f32 %v6020_v13, %v7606_v42 }
 0x379   : > { %6328 = vpow2.f32 %v5335_v50  ;;  %v7707_v6 = vadd.f32 %v7635_v5, %v3607_v41  ;;  %v3610_v49 = vmul.f32 %v7615_v46, %v3587_v38  ;;  %v3586_v27 = vadd.f32 %v3531_v51, %v7624_v0  ;;  %v5997_v11 = vpop.f32.mrf.mxu0 }
 0x37a   : > { %v6023_v10 = vpop.f32.mrf.mxu1  ;;  %6330 = vpow2.f32 %v5338_v60  ;;  %v5372_v34 = vmul.f32 -1.442695, %v7703_v39  ;;  %v7713_v7 = vadd.f32 %v7620_v53, %v3961_v36  ;;  %v3960_v17 = vmul.f32 %v7606_v42, %v3898_v56 }
 0x37b   : > { %6332 = vpow2.f32 %v5373_v8  ;;  %v5337_v19 = vmul.f32 -1.442695, %v7707_v6  ;;  %v7718_v18 = vadd.f32 %v7635_v5, %v3610_v49  ;;  %v3609_v23 = vmul.f32 %v7615_v46, %v3586_v27  ;;  %v3541_v52 = vpop.f32.mrf.mxu0 }
 0x37c   : > { %v3908_v0 = vpop.f32.mrf.mxu1  ;;  %6334 = vpow2.f32 %v5372_v34  ;;  %v5375_v44 = vmul.f32 -1.442695, %v7713_v7  ;;  %v7723_v33 = vadd.f32 %v7620_v53, %v3960_v17  ;;  %v3589_v28 = vadd.f32 %v5997_v11, %v7627_v43 }
 0x37d   : > { %6336 = vpow2.f32 %v5337_v19  ;;  %v5340_v2 = vmul.f32 -1.442695, %v7718_v18  ;;  %v7728_v3 = vadd.f32 %v7635_v5, %v3609_v23  ;;  %v3963_v58 = vmul.f32 %v6023_v10, %v7606_v42  ;;  %v6000_v45 = vpop.f32.mrf.mxu0 }
 0x37e   : > { %v6315_v31 = vpop.eup %6314  ;;  %6338 = vpow2.f32 %v5375_v44  ;;  %v5374_v1 = vmul.f32 -1.442695, %v7723_v33  ;;  %v3612_v4 = vmul.f32 %v7615_v46, %v3589_v28  ;;  %v6026_v12 = vpop.f32.mrf.mxu1  ;;  %v3588_v25 = vadd.f32 %v3541_v52, %v7629_v26 }
 0x37f   : > { %v4042_v22 = vadd.f32 1.0, %v6315_v31  ;;  %v6317_v61 = vpop.eup %6316  ;;  %6340 = vpow2.f32 %v5340_v2  ;;  %v5339_v43 = vmul.f32 -1.442695, %v7728_v3  ;;  %v7735_v62 = vadd.f32 %v7620_v53, %v3963_v58  ;;  %v3551_v40 = vpop.f32.mrf.mxu0 }
 0x380   : > { %v6319_v24 = vpop.eup %6318  ;;  %v3691_v13 = vadd.f32 1.0, %v6317_v61  ;;  %v7739_v21 = vadd.f32 %v7635_v5, %v3612_v4  ;;  %v3962_v8 = vmul.f32 %v7606_v42, %v3908_v0  ;;  %v3611_v38 = vmul.f32 %v7615_v46, %v3588_v25  ;;  %v3918_v49 = vpop.f32.mrf.mxu1 }
 0x381   : > { %6342 = vrcp.f32 %v4042_v22  ;;  %v6321_v55 = vpop.eup %6320  ;;  %v4041_v50 = vadd.f32 1.0, %v6319_v24  ;;  %v7743_v41 = vmul.f32 -1.442695, %v7735_v62  ;;  %v6003_v51 = vpop.f32.mrf.mxu0  ;;  %v3591_v10 = vadd.f32 %v6000_v45, %v7642_v59 }
 0x382   : > { %6344 = vpow2.f32 %v5339_v43  ;;  %v6323_v56 = vpop.eup %6322  ;;  %v3690_v26 = vadd.f32 1.0, %v6321_v55  ;;  %v7747_v60 = vmul.f32 -1.442695, %v7739_v21  ;;  %v7750_v36 = vadd.f32 %v7620_v53, %v3962_v8  ;;  %v6029_v4 = vpop.f32.mrf.mxu1 }
 0x383   : > { %6346 = vrcp.f32 %v3691_v13  ;;  %v4044_v27 = vadd.f32 1.0, %v6323_v56  ;;  %v7753_v11 = vadd.f32 %v7635_v5, %v3611_v38  ;;  %v3561_v34 = vpop.f32.mrf.mxu0  ;;  %v6325_v17 = vpop.eup %6324  ;;  %v3965_v23 = vmul.f32 %v6026_v12, %v7606_v42 }
 0x384   : > { %6348 = vrcp.f32 %v4041_v50  ;;  %v7757_v19 = vmul.f32 -1.442695, %v7750_v36  ;;  %v3590_v52 = vadd.f32 %v3551_v40, %v7644_v15  ;;  %v3693_v44 = vadd.f32 1.0, %v6325_v17  ;;  %v3928_v17 = vpop.f32.mrf.mxu1 }
 0x385   : > { %6350 = vrcp.f32 %v3690_v26  ;;  %v6327_v0 = vpop.eup %6326  ;;  %v7762_v28 = vmul.f32 -1.442695, %v7753_v11  ;;  %v3614_v31 = vmul.f32 %v7615_v46, %v3591_v10  ;;  %v7765_v2 = vpop.f32.mrf.mxu0  ;;  %v7768_v45 = vadd.f32 %v7620_v53, %v3965_v23 }
 0x386   : > { %6352 = vrcp.f32 %v4044_v27  ;;  %v6329_v59 = vpop.eup %6328  ;;  %v4043_v58 = vadd.f32 1.0, %v6327_v0  ;;  %v3613_v22 = vmul.f32 %v7615_v46, %v3590_v52  ;;  %v3964_v43 = vmul.f32 %v7606_v42, %v3918_v49 }
 0x387   : > { %6354 = vpow2.f32 %v5374_v1  ;;  %v6331_v15 = vpop.eup %6330  ;;  %v3692_v12 = vadd.f32 1.0, %v6329_v59  ;;  %v7772_v61 = vadd.f32 %v7635_v5, %v3614_v31  ;;  %v7775_v25 = vpop.f32.mrf.mxu0  ;;  %v7778_v1 = vmul.f32 -1.442695, %v7768_v45 }
 0x388   : > { %6356 = vrcp.f32 %v3693_v44  ;;  %v6333_v40 = vpop.eup %6332  ;;  %v3695_v24 = vadd.f32 1.0, %v6331_v15  ;;  %v7781_v13 = vadd.f32 %v7635_v5, %v3613_v22  ;;  %v7787_v38 = vadd.f32 %v7620_v53, %v3964_v43 }
 0x389   : > { %6358 = vrcp.f32 %v4043_v58  ;;  %v6335_v8 = vpop.eup %6334  ;;  %v4046_v55 = vadd.f32 1.0, %v6333_v40  ;;  %v7784_v50 = vmul.f32 -1.442695, %v7772_v61  ;;  %v7789_v56 = vpop.f32.mrf.mxu0  ;;  %v3593_v10 = vadd.f32 %v6003_v51, %v7646_v9 }
 0x38a   : > { %6360 = vrcp.f32 %v3692_v12  ;;  %v6337_v26 = vpop.eup %6336  ;;  %v4045_v49 = vadd.f32 1.0, %v6335_v8  ;;  %v7792_v27 = vmul.f32 -1.442695, %v7781_v13  ;;  %v7796_v0 = vmul.f32 -1.442695, %v7787_v38 }
 0x38b   : > { %6362 = vrcp.f32 %v3695_v24  ;;  %v6339_v23 = vpop.eup %6338  ;;  %v3694_v52 = vadd.f32 1.0, %v6337_v26  ;;  %v3967_v44 = vmul.f32 %v6029_v4, %v7606_v42  ;;  %v3616_v58 = vmul.f32 %v7615_v46, %v3593_v10  ;;  %v7805_v43 = vpop.f32.mrf.mxu0 }
 0x38c   : > { %6364 = vrcp.f32 %v4046_v55  ;;  %v6341_v31 = vpop.eup %6340  ;;  %v4048_v59 = vadd.f32 1.0, %v6339_v23  ;;  %v3592_v22 = vadd.f32 %v3561_v34, %v7648_v48  ;;  %v3966_v51 = vmul.f32 %v7606_v42, %v3928_v17  ;;  %v6032_v23 = vpop.f32.mrf.mxu1 }
 0x38d   : > { %6366 = vrcp.f32 %v4045_v49  ;;  %v3697_v12 = vadd.f32 1.0, %v6341_v31  ;;  %v7802_v9 = vadd.f32 %v7620_v53, %v3967_v44  ;;  %v7809_v24 = vadd.f32 %v7635_v5, %v3616_v58  ;;  %v7827_v44 = vld [vmem:[%s8226_s12] ss:$0 sm:$0xff] }
 0x38e   : > { %v6343_v15 = vpop.eup %6342  ;;  %6368 = vrcp.f32 %v3694_v52  ;;  %v3615_v8 = vmul.f32 %v7615_v46, %v3592_v22  ;;  %v7816_v26 = vadd.f32 %v7620_v53, %v3966_v51 }
 0x38f   : > { %v6345_v40 = vpop.eup %6344  ;;  %v4090_v4 = vmul.f32 %v6343_v15, %v7639_v37  ;;  %6370 = vrcp.f32 %v4048_v59  ;;  %v7813_v55 = vmul.f32 -1.442695, %v7802_v9  ;;  %v5346_v37 = vmul.f32 -1.442695, %v7809_v24 }
 0x390   : > { %v6347_v48 = vpop.eup %6346  ;;  %6372 = vrcp.f32 %v3697_v12  ;;  %v3696_v34 = vadd.f32 1.0, %v6345_v40  ;;  %v7822_v17 = vadd.f32 %v7635_v5, %v3615_v8  ;;  %v7831_v59 = vmul.f32 -1.442695, %v7816_v26 }
 0x391   : > { %v6349_v49 = vpop.eup %6348  ;;  %v3739_v10 = vmul.f32 %v6347_v48, %v7651_v57  ;;  %6374 = vpow2.f32 %v7747_v60  ;;  %v3595_v57 = vadd.f32 %v7765_v2, %v7658_v20  ;;  %v7835_v60 = vpop.f32.mrf.mxu0  ;;  %v3969_v2 = vmul.f32 %v6032_v23, %v7606_v42 }
 0x392   : > { %v6351_v52 = vpop.eup %6350  ;;  %v4089_v31 = vmul.f32 %v6349_v49, %v7656_v32  ;;  %6376 = vrcp.f32 %v3696_v34  ;;  %v5345_v12 = vmul.f32 -1.442695, %v7822_v17  ;;  %v7843_v32 = vld [vmem:[%s8227_s13] ss:$0 sm:$0xff] }
 0x393   : > { %v6353_v58 = vpop.eup %6352  ;;  %v4106_v22 = vadd.f32 %v4090_v4, %v3739_v10  ;;  %v3738_v15 = vmul.f32 %v6351_v52, %v7665_v63  ;;  %6378 = vpow2.f32 %v7743_v41  ;;  %v3618_v20 = vmul.f32 %v7615_v46, %v3595_v57  ;;  %v7859_v49 = vpop.f32.mrf.mxu0 }
 0x394   : > { %v6355_v51 = vpop.eup %6354  ;;  %v4092_v40 = vmul.f32 %v6353_v58, %v7670_v54  ;;  %6380 = vpow2.f32 %v7762_v28  ;;  %v7857_v28 = vadd.f32 %v7620_v53, %v3969_v2  ;;  %v3938_v58 = vpop.f32.mrf.mxu1 }
 0x395   : > { %v6357_v4 = vpop.eup %6356  ;;  %v4284_v63 = vmul.f32 %v7827_v44, %v4106_v22  ;;  %v4105_v41 = vadd.f32 %v4089_v31, %v3738_v15  ;;  %v4047_v8 = vadd.f32 1.0, %v6355_v51  ;;  %6382 = vpow2.f32 %v7757_v19  ;;  %v7881_v2 = vpop.f32.mrf.mxu0 }
 0x396   : > { %v6359_v48 = vpop.eup %6358  ;;  %v3741_v34 = vmul.f32 %v6357_v4, %v7676_v29  ;;  %6384 = vpow2.f32 %v7784_v50  ;;  %v7854_v54 = vadd.f32 %v7635_v5, %v3618_v20  ;;  %v5383_v51 = vmul.f32 -1.442695, %v7857_v28 }
 0x397   : > { %v6361_v10 = vpop.eup %6360  ;;  %v7862_v23 = vadd.f32 %v7843_v32, %v4284_v63  ;;  %v7865_v52 = vmul.f32 %v7827_v44, %v4105_v41  ;;  %v4091_v19 = vmul.f32 %v6359_v48, %v7681_v35  ;;  %6386 = vrcp.f32 %v4047_v8 }
 0x398   : > { %v6363_v29 = vpop.eup %6362  ;;  %v4108_v50 = vadd.f32 %v4092_v40, %v3741_v34  ;;  %v3740_v31 = vmul.f32 %v6361_v10, %v7689_v14  ;;  %6388 = vpow2.f32 %v7778_v1  ;;  %v5348_v57 = vmul.f32 -1.442695, %v7854_v54 }
 0x399   : > { %v6365_v22 = vpop.eup %6364  ;;  %v3743_v15 = vmul.f32 %v6363_v29, %v7694_v16  ;;  %6390 = vpow2.f32 %v7792_v27  ;;  %v3594_v35 = vadd.f32 %v7775_v25, %v7660_v30  ;;  %v3968_v63 = vmul.f32 %v7606_v42, %v3938_v58  ;;  %v7919_v29 = vld [vmem:[%s8228_s14] ss:$0 sm:$0xff] }
 0x39a   : > { %v6367_v20 = vpop.eup %6366  ;;  %v7877_v40 = vmul.f32 %v7827_v44, %v4108_v50  ;;  %v4107_v14 = vadd.f32 %v4091_v19, %v3740_v31  ;;  %v4094_v1 = vmul.f32 %v6365_v22, %v7685_v47  ;;  %6392 = vpow2.f32 %v7796_v0 }
 0x39b   : > { %v6369_v4 = vpop.eup %6368  ;;  %v4093_v16 = vmul.f32 %v6367_v20, %v7703_v39  ;;  %6394 = vpow2.f32 %v5346_v37  ;;  %v3617_v27 = vmul.f32 %v7615_v46, %v3594_v35  ;;  %v7896_v46 = vadd.f32 %v7620_v53, %v3968_v63 }
 0x39c   : > { %v6371_v30 = vpop.eup %6370  ;;  %v7887_v25 = vmul.f32 %v7827_v44, %v4107_v14  ;;  %v4110_v41 = vadd.f32 %v4094_v1, %v3743_v15  ;;  %v3742_v8 = vmul.f32 %v6369_v4, %v7707_v6  ;;  %6396 = vpow2.f32 %v7813_v55  ;;  %v7906_v6 = vld [vmem:[%s8225_s11] ss:$0 sm:$0xff] }
 0x39d   : > { %v6373_v47 = vpop.eup %6372  ;;  %v4096_v0 = vmul.f32 %v6371_v30, %v7713_v7  ;;  %6398 = vpow2.f32 %v5345_v12  ;;  %v7893_v39 = vadd.f32 %v7635_v5, %v3617_v27  ;;  %v7908_v7 = vpop.f32.mrf.mxu0  ;;  %v5382_v12 = vmul.f32 -1.442695, %v7896_v46 }
 0x39e   : > { %v6375_v42 = vpop.eup %6374  ;;  %v7899_v37 = vmul.f32 %v7827_v44, %v4110_v41  ;;  %v4109_v48 = vadd.f32 %v4093_v16, %v3742_v8  ;;  %v3745_v34 = vmul.f32 %v6373_v47, %v7718_v18  ;;  %6400 = vpow2.f32 %v7831_v59 }
 0x39f   : > { %v6377_v5 = vpop.eup %6376  ;;  %v3699_v55 = vadd.f32 1.0, %v6375_v42  ;;  %6402 = vpow2.f32 %v5348_v57  ;;  %v5347_v53 = vmul.f32 -1.442695, %v7893_v39  ;;  %v4203_v57 = vadd.f32 %v7789_v56, %v7906_v6  ;;  %v6046_v20 = vpop.f32.mrf.mxu0 }
 0x3a0   : > { %v6379_v10 = vpop.eup %6378  ;;  %v7913_v19 = vmul.f32 %v7827_v44, %v4109_v48  ;;  %v4112_v18 = vadd.f32 %v4096_v0, %v3745_v34  ;;  %v3744_v59 = vmul.f32 %v6377_v5, %v7728_v3  ;;  %6404 = vpow2.f32 %v5383_v51  ;;  %v7931_v51 = vld [vmem:[%s8229_s15] ss:$0 sm:$0xff] }
 0x3a1   : > { %v6381_v50 = vpop.eup %6380  ;;  %6406 = vrcp.f32 %v3699_v55  ;;  %v4050_v31 = vadd.f32 1.0, %v6379_v10  ;;  %v4198_v58 = vadd.f32 %v7906_v6, %v7805_v43  ;;  %v4213_v35 = vadd.f32 %v7835_v60, %v7906_v6  ;;  %v4227_v34 = vpop.f32.mrf.mxu0 }
 0x3a2   : > { %v6383_v22 = vpop.eup %6382  ;;  %v7926_v15 = vmul.f32 %v7827_v44, %v4112_v18  ;;  %v3698_v3 = vadd.f32 1.0, %v6381_v50  ;;  %6408 = vpow2.f32 %v5347_v53  ;;  %v4378_v43 = vmul.f32 %v7919_v29, %v4203_v57 }
 0x3a3   : > { %v6385_v14 = vpop.eup %6384  ;;  %6410 = vrcp.f32 %v4050_v31  ;;  %v4049_v56 = vadd.f32 1.0, %v6383_v22  ;;  %v4377_v1 = vmul.f32 %v7919_v29, %v4198_v58  ;;  %v4380_v27 = vmul.f32 %v7919_v29, %v4213_v35  ;;  %v6049_v35 = vpop.f32.mrf.mxu0 }
 0x3a4   : > { %v6387_v4 = vpop.eup %6386  ;;  %6412 = vrcp.f32 %v3698_v3  ;;  %v3701_v16 = vadd.f32 1.0, %v6385_v14  ;;  %v4208_v63 = vadd.f32 %v7906_v6, %v7859_v49  ;;  %v4401_v60 = vadd.f32 %v7931_v51, %v4378_v43 }
 0x3a5   : > { %v6389_v30 = vpop.eup %6388  ;;  %v4095_v41 = vmul.f32 %v6387_v4, %v7723_v33  ;;  %6414 = vrcp.f32 %v4049_v56  ;;  %v4400_v8 = vadd.f32 %v7931_v51, %v4377_v1  ;;  %v7944_v42 = vadd.f32 %v7931_v51, %v4380_v27 }
 0x3a6   : > { %v6391_v47 = vpop.eup %6390  ;;  %6416 = vrcp.f32 %v3701_v16  ;;  %v4052_v0 = vadd.f32 1.0, %v6389_v30  ;;  %v4379_v48 = vmul.f32 %v7919_v29, %v4208_v63  ;;  %vm4417_vm4 = vcmp.gt.f32.partialorder %v4401_v60, 0.0 }
 0x3a7   : > { %v6393_v5 = vpop.eup %6392  ;;  %v4111_v55 = vadd.f32 %v4095_v41, %v3744_v59  ;;  %v3700_v49 = vadd.f32 1.0, %v6391_v47  ;;  %6418 = vpow2.f32 %v5382_v12  ;;  %v4433_v10 = vmul.f32 0.01, %v4401_v60 }
 0x3a8   : > { %v6395_v33 = vpop.eup %6394  ;;  %6420 = vrcp.f32 %v4052_v0  ;;  %v4051_v53 = vadd.f32 1.0, %v6393_v5  ;;  %v7948_v18 = vadd.f32 %v7931_v51, %v4379_v48  ;;  %v4223_v58 = vadd.f32 %v7881_v2, %v7906_v6  ;;  %v4237_v48 = vpop.f32.mrf.mxu0 }
 0x3a9   : > { %v6397_v50 = vpop.eup %6396  ;;  %v7951_v31 = vmul.f32 %v7827_v44, %v4111_v55  ;;  %6422 = vrcp.f32 %v3700_v49  ;;  %v3703_v57 = vadd.f32 1.0, %v6395_v33  ;;  %v4218_v22 = vadd.f32 %v7906_v6, %v7908_v7 }
 0x3aa   : > { %v6399_v59 = vpop.eup %6398  ;;  %6424 = vrcp.f32 %v4051_v53  ;;  %v4054_v12 = vadd.f32 1.0, %v6397_v50  ;;  %v4233_v3 = vadd.f32 %v6046_v20, %v7906_v6  ;;  %v4382_v43 = vmul.f32 %v7919_v29, %v4223_v58 }
 0x3ab   : > { %v6401_v14 = vpop.eup %6400  ;;  %6426 = vrcp.f32 %v3703_v57  ;;  %v3702_v56 = vadd.f32 1.0, %v6399_v59  ;;  %vm4416_vm5 = vcmp.gt.f32.partialorder %v4400_v8, 0.0  ;;  %v4381_v2 = vmul.f32 %v7919_v29, %v4218_v22 }
 0x3ac   : > { %v6403_v1 = vpop.eup %6402  ;;  %6428 = vrcp.f32 %v4054_v12  ;;  %v4053_v4 = vadd.f32 1.0, %v6401_v14  ;;  %v4384_v16 = vmul.f32 %v7919_v29, %v4233_v3  ;;  %v7962_v7 = vadd.f32 %v7931_v51, %v4382_v43 }
 0x3ad   : > { %v6405_v27 = vpop.eup %6404  ;;  %6430 = vrcp.f32 %v3702_v56  ;;  %v3705_v63 = vadd.f32 1.0, %v6403_v1  ;;  %v4432_v20 = vmul.f32 0.01, %v4400_v8  ;;  %v7965_v47 = vadd.f32 %v7931_v51, %v4381_v2 }
 0x3ae   : > { %v6407_v30 = vpop.eup %6406  ;;  %6432 = vrcp.f32 %v4053_v4  ;;  %v4056_v41 = vadd.f32 1.0, %v6405_v27  ;;  %v7968_v0 = vadd.f32 %v7931_v51, %v4384_v16  ;;  %v7972_v49 = vmul.f32 0.01, %v7962_v7 }
 0x3af   : > { %v6409_v5 = vpop.eup %6408  ;;  %v3747_v55 = vmul.f32 %v6407_v30, %v7739_v21  ;;  %6434 = vrcp.f32 %v3705_v63  ;;  %v4448_v33 = vsel %vm4416_vm5, %v4400_v8, %v4432_v20  ;;  %v4449_v58 = vsel %vm4417_vm4, %v4401_v60, %v4433_v10  ;;  %v6052_v60 = vpop.f32.mrf.mxu0 }
 0x3b0   : > { %v6411_v53 = vpop.eup %6410  ;;  %6436 = vrcp.f32 %v4056_v41  ;;  %v3704_v50 = vadd.f32 1.0, %v6409_v5  ;;  %v7976_v57 = vmul.f32 0.01, %v7968_v0  ;;  %6061 = vmatprep.mubr.msk.f32.mxu1 %vm668_vm1, %v4448_v33  ;;  %v4228_v21 = vadd.f32 %v7906_v6, %v4227_v34 }
 0x3b1   : > { %v6413_v59 = vpop.eup %6412  ;;  %v4098_v12 = vmul.f32 %v6411_v53, %v7735_v62  ;;  %6062 = vmatmul.mubr.msk.f32.vlgmr.msra.gmra.mxu1 %vm668_vm1, %v4449_v58  ;;  %v4243_v22 = vadd.f32 %v6049_v35, %v7906_v6  ;;  %vm4418_vm6 = vcmp.gt.f32.partialorder %v7948_v18, 0.0  ;;  %v4434_v14 = vmul.f32 0.01, %v7948_v18  ;;  %v4247_v5 = vpop.f32.mrf.mxu0 }
 0x3b2   : > { %v6415_v8 = vpop.eup %6414  ;;  %v3746_v3 = vmul.f32 %v6413_v59, %v7753_v11  ;;  %6438 = vrcp.f32 %v3704_v50  ;;  %vm4419_vm7 = vcmp.gt.f32.partialorder %v7944_v42, 0.0  ;;  %v4383_v43 = vmul.f32 %v7919_v29, %v4228_v21 }
 0x3b3   : > { %v6417_v10 = vpop.eup %6416  ;;  %v4114_v56 = vadd.f32 %v4098_v12, %v3747_v55  ;;  %v4097_v62 = vmul.f32 %v6415_v8, %v7750_v36  ;;  %v4386_v34 = vmul.f32 %v7919_v29, %v4243_v22  ;;  %v4450_v4 = vsel %vm4418_vm6, %v7948_v18, %v4434_v14 }
 0x3b4   : > { %v6419_v35 = vpop.eup %6418  ;;  %v3749_v1 = vmul.f32 %v6417_v10, %v7772_v61  ;;  %v4435_v11 = vmul.f32 0.01, %v7944_v42  ;;  %v4238_v2 = vadd.f32 %v7906_v6, %v4237_v48  ;;  %v7999_v36 = vadd.f32 %v7931_v51, %v4383_v43  ;;  %6064 = vmatprep.mubr.msk.f32.mxu1 %vm668_vm1, %v4450_v4  ;;  %v6055_v10 = vpop.f32.mrf.mxu0 }
 0x3b5   : > { %v6421_v16 = vpop.eup %6420  ;;  %v7996_v27 = vmul.f32 %v7827_v44, %v4114_v56  ;;  %v4113_v63 = vadd.f32 %v4097_v62, %v3746_v3  ;;  %v4055_v20 = vadd.f32 1.0, %v6419_v35  ;;  %v8004_v18 = vadd.f32 %v7931_v51, %v4386_v34 }
 0x3b6   : > { %v6423_v30 = vpop.eup %6422  ;;  %v4100_v61 = vmul.f32 %v6421_v16, %v7768_v45  ;;  %v4451_v41 = vsel %vm4419_vm7, %v7944_v42, %v4435_v11  ;;  %v4385_v48 = vmul.f32 %v7919_v29, %v4238_v2  ;;  %v4306_v45 = vadd.f32 %v7843_v32, %v7865_v52 }
 0x3b7   : > { %v6425_v55 = vpop.eup %6424  ;;  %v8011_v33 = vmul.f32 %v7827_v44, %v4113_v63  ;;  %v3748_v53 = vmul.f32 %v6423_v30, %v7781_v13  ;;  %6440 = vrcp.f32 %v4055_v20  ;;  %6065 = vmatmul.mubr.msk.f32.gmra.mxu1 %vm668_vm1, %v4451_v41  ;;  %v8019_v42 = vmul.f32 0.01, %v8004_v18 }
 0x3b8   : > { %v6427_v50 = vpop.eup %6426  ;;  %v4116_v58 = vadd.f32 %v4100_v61, %v3749_v1  ;;  %v4099_v59 = vmul.f32 %v6425_v55, %v7787_v38  ;;  %v8022_v12 = vadd.f32 %v7931_v51, %v4385_v48  ;;  %vm4322_vm8 = vcmp.gt.f32.partialorder %v4306_v45, 0.0 }
 0x3b9   : > { %v6429_v21 = vpop.eup %6428  ;;  %v3751_v22 = vmul.f32 %v6427_v50, %v7809_v24  ;;  %v4338_v13 = vmul.f32 0.01, %v4306_v45  ;;  %v4253_v8 = vadd.f32 %v6052_v60, %v7906_v6  ;;  %vm4420_vm9 = vcmp.gt.f32.partialorder %v7965_v47, 0.0 }
 0x3ba   : > { %v6431_v3 = vpop.eup %6430  ;;  %v8027_v52 = vmul.f32 %v7827_v44, %v4116_v58  ;;  %v4115_v14 = vadd.f32 %v4099_v59, %v3748_v53  ;;  %v4102_v38 = vmul.f32 %v6429_v21, %v7802_v9  ;;  %v4436_v34 = vmul.f32 0.01, %v7965_v47 }
 0x3bb   : > { %v6433_v56 = vpop.eup %6432  ;;  %v3750_v62 = vmul.f32 %v6431_v3, %v7822_v17  ;;  %v4354_v43 = vsel %vm4322_vm8, %v4306_v45, %v4338_v13  ;;  %v4388_v24 = vmul.f32 %v7919_v29, %v4253_v8  ;;  %vm4323_vm10 = vcmp.gt.f32.partialorder %v7862_v23, 0.0 }
 0x3bc   : > { %v6435_v35 = vpop.eup %6434  ;;  %v8035_v60 = vmul.f32 %v7827_v44, %v4115_v14  ;;  %v4118_v1 = vadd.f32 %v4102_v38, %v3751_v22  ;;  %v4101_v4 = vmul.f32 %v6433_v56, %v7816_v26  ;;  %6087 = vmatprep.mubr.msk.f32.mxu0 %vm668_vm1, %v4354_v43  ;;  %v4452_v2 = vsel %vm4420_vm9, %v7965_v47, %v4436_v34 }
 0x3bd   : > { %v6437_v9 = vpop.eup %6436  ;;  %v3753_v11 = vmul.f32 %v6435_v35, %v7854_v54  ;;  %v8042_v17 = vadd.f32 %v7931_v51, %v4388_v24  ;;  %v4339_v16 = vmul.f32 0.01, %v7862_v23  ;;  %6067 = vmatprep.mubr.msk.f32.mxu1 %vm668_vm1, %v4452_v2  ;;  %vm4421_vm11 = vcmp.gt.f32.partialorder %v7962_v7, 0.0  ;;  %v4257_v54 = vpop.f32.mrf.mxu0 }
 0x3be   : > { %v8049_v63 = vmul.f32 %v7827_v44, %v4118_v1  ;;  %v4117_v26 = vadd.f32 %v4101_v4, %v3750_v62  ;;  %v4104_v20 = vmul.f32 %v6437_v9, %v7857_v28  ;;  %v4453_v47 = vsel %vm4421_vm11, %v7962_v7, %v7972_v49 }
 0x3bf   : > { %v6439_v30 = vpop.eup %6438  ;;  %v8055_v61 = vmul.f32 0.01, %v8042_v17  ;;  %v4355_v41 = vsel %vm4323_vm10, %v7862_v23, %v4339_v16  ;;  %v4248_v48 = vadd.f32 %v7906_v6, %v4247_v5  ;;  %6068 = vmatmul.mubr.msk.f32.gmra.mxu1 %vm668_vm1, %v4453_v47  ;;  %vm4422_vm12 = vcmp.gt.f32.partialorder %v7999_v36, 0.0  ;;  %v6058_v58 = vpop.f32.mrf.mxu0 }
 0x3c0   : > { %v8062_v55 = vmul.f32 %v7827_v44, %v4117_v26  ;;  %v4120_v28 = vadd.f32 %v4104_v20, %v3753_v11  ;;  %v3752_v53 = vmul.f32 %v6439_v30, %v7893_v39  ;;  %6088 = vmatmul.mubr.msk.f32.vlgmr.msra.gmra.mxu0 %vm668_vm1, %v4355_v41  ;;  %v4308_v23 = vadd.f32 %v7843_v32, %v7887_v25 }
 0x3c1   : > { %v4387_v45 = vmul.f32 %v7919_v29, %v4248_v48  ;;  %v4263_v7 = vadd.f32 %v6055_v10, %v7906_v6  ;;  %v4438_v49 = vmul.f32 0.01, %v7999_v36  ;;  %v4309_v39 = vadd.f32 %v7843_v32, %v7877_v40 }
 0x3c2   : > { %v8074_v5 = vmul.f32 %v7827_v44, %v4120_v28  ;;  %vm4423_vm13 = vcmp.gt.f32.partialorder %v7968_v0, 0.0  ;;  %v4258_v50 = vadd.f32 %v7906_v6, %v4257_v54  ;;  %vm4324_vm14 = vcmp.gt.f32.partialorder %v4308_v23, 0.0 }
 0x3c3   : > { %v4410_v59 = vadd.f32 %v7931_v51, %v4387_v45  ;;  %v4340_v21 = vmul.f32 0.01, %v4308_v23  ;;  %v4390_v25 = vmul.f32 %v7919_v29, %v4263_v7  ;;  %v4454_v13 = vsel %vm4422_vm12, %v7999_v36, %v4438_v49 }
 0x3c4   : > { %v6441_v22 = vpop.eup %6440  ;;  %vm4325_vm15 = vcmp.gt.f32.partialorder %v4309_v39, 0.0  ;;  %v4341_v8 = vmul.f32 0.01, %v4309_v39  ;;  %v4455_v3 = vsel %vm4423_vm13, %v7968_v0, %v7976_v57  ;;  %6070 = vmatprep.mubr.msk.f32.mxu1 %vm668_vm1, %v4454_v13  ;;  %v4389_v10 = vmul.f32 %v7919_v29, %v4258_v50 }
 0x3c5   : > { %v4103_v40 = vmul.f32 %v6441_v22, %v7896_v46  ;;  %v4356_v14 = vsel %vm4324_vm14, %v4308_v23, %v4340_v21  ;;  %v8087_v38 = vadd.f32 %v7931_v51, %v4390_v25  ;;  %6071 = vmatmul.mubr.msk.f32.gmra.mxu1 %vm668_vm1, %v4455_v3  ;;  %v4310_v36 = vadd.f32 %v7843_v32, %v7913_v19  ;;  %v4267_v46 = vpop.f32.mrf.mxu0 }
 0x3c6   : > { %6090 = vmatprep.mubr.msk.f32.mxu0 %vm668_vm1, %v4356_v14  ;;  %v4357_v56 = vsel %vm4325_vm15, %v4309_v39, %v4341_v8  ;;  %v4273_v0 = vadd.f32 %v6058_v58, %v7906_v6  ;;  %vm4424_vm0 = vcmp.gt.f32.partialorder %v8022_v12, 0.0  ;;  %v4412_v43 = vadd.f32 %v7931_v51, %v4389_v10 }
 0x3c7   : > { %v4119_v57 = vadd.f32 %v4103_v40, %v3752_v53  ;;  %v4445_v62 = vmul.f32 0.01, %v8087_v38  ;;  %6091 = vmatmul.mubr.msk.f32.gmra.mxu0 %vm668_vm1, %v4357_v56  ;;  %v4440_v24 = vmul.f32 0.01, %v8022_v12  ;;  %vm4326_vm2 = vcmp.gt.f32.partialorder %v4310_v36, 0.0 }
 0x3c8   : > { %v4342_v34 = vmul.f32 0.01, %v4310_v36  ;;  %v4392_v35 = vmul.f32 %v7919_v29, %v4273_v0  ;;  %v4311_v19 = vadd.f32 %v7843_v32, %v7899_v37  ;;  %vm4425_vm3 = vcmp.gt.f32.partialorder %v8004_v18, 0.0 }
 0x3c9   : > { %v8105_v1 = vmul.f32 %v7827_v44, %v4119_v57  ;;  %v4456_v4 = vsel %vm4424_vm0, %v8022_v12, %v4440_v24  ;;  %v4268_v9 = vadd.f32 %v7906_v6, %v4267_v46  ;;  %v4457_v37 = vsel %vm4425_vm3, %v8004_v18, %v8019_v42 }
 0x3ca   : > { %v4358_v11 = vsel %vm4326_vm2, %v4310_v36, %v4342_v34  ;;  %v4415_v2 = vadd.f32 %v7931_v51, %v4392_v35  ;;  %6073 = vmatprep.mubr.msk.f32.mxu1 %vm668_vm1, %v4456_v4  ;;  %vm4327_vm4 = vcmp.gt.f32.partialorder %v4311_v19, 0.0  ;;  %v4343_v16 = vmul.f32 0.01, %v4311_v19 }
 0x3cb   : > { %6093 = vmatprep.mubr.msk.f32.mxu0 %vm668_vm1, %v4358_v11  ;;  %v4391_v44 = vmul.f32 %v7919_v29, %v4268_v9  ;;  %v4312_v12 = vadd.f32 %v7843_v32, %v7951_v31  ;;  %vm4426_vm5 = vcmp.gt.f32.partialorder %v4410_v59, 0.0  ;;  %6074 = vmatmul.mubr.msk.f32.gmra.mxu1 %vm668_vm1, %v4457_v37  ;;  %v4442_v20 = vmul.f32 0.01, %v4410_v59 }
 0x3cc   : > { %v4447_v26 = vmul.f32 0.01, %v4415_v2  ;;  %v4359_v6 = vsel %vm4327_vm4, %v4311_v19, %v4343_v16  ;;  %v4313_v54 = vadd.f32 %v7843_v32, %v7926_v15  ;;  %vm4427_vm7 = vcmp.gt.f32.partialorder %v8042_v17, 0.0 }
 0x3cd   : > { %6094 = vmatmul.mubr.msk.f32.gmra.mxu0 %vm668_vm1, %v4359_v6  ;;  %v4414_v30 = vadd.f32 %v7931_v51, %v4391_v44  ;;  %vm4328_vm6 = vcmp.gt.f32.partialorder %v4312_v12, 0.0  ;;  %v4344_v18 = vmul.f32 0.01, %v4312_v12  ;;  %v4458_v29 = vsel %vm4426_vm5, %v4410_v59, %v4442_v20 }
 0x3ce   : > { %vm4329_vm8 = vcmp.gt.f32.partialorder %v4313_v54, 0.0  ;;  %v4345_v31 = vmul.f32 0.01, %v4313_v54  ;;  %v4459_v42 = vsel %vm4427_vm7, %v8042_v17, %v8055_v61  ;;  %6076 = vmatprep.mubr.msk.f32.mxu1 %vm668_vm1, %v4458_v29  ;;  %v4314_v15 = vadd.f32 %v7843_v32, %v8011_v33 }
 0x3cf   : > { %v4360_v41 = vsel %vm4328_vm6, %v4312_v12, %v4344_v18  ;;  %vm4428_vm9 = vcmp.gt.f32.partialorder %v4412_v43, 0.0  ;;  %v4444_v47 = vmul.f32 0.01, %v4412_v43  ;;  %6077 = vmatmul.mubr.msk.f32.gmra.mxu1 %vm668_vm1, %v4459_v42  ;;  %v4315_v48 = vadd.f32 %v7843_v32, %v7996_v27 }
 0x3d0   : > { %6096 = vmatprep.mubr.msk.f32.mxu0 %vm668_vm1, %v4360_v41  ;;  %v4361_v51 = vsel %vm4329_vm8, %v4313_v54, %v4345_v31  ;;  %vm4429_vm10 = vcmp.gt.f32.partialorder %v8087_v38, 0.0  ;;  %v4316_v17 = vadd.f32 %v7843_v32, %v8035_v60  ;;  %vm4330_vm11 = vcmp.gt.f32.partialorder %v4314_v15, 0.0 }
 0x3d1   : > { %6097 = vmatmul.mubr.msk.f32.gmra.mxu0 %vm668_vm1, %v4361_v51  ;;  %v4346_v61 = vmul.f32 0.01, %v4314_v15  ;;  %v4460_v33 = vsel %vm4428_vm9, %v4412_v43, %v4444_v47  ;;  %v4461_v28 = vsel %vm4429_vm10, %v8087_v38, %v4445_v62  ;;  %vm4331_vm12 = vcmp.gt.f32.partialorder %v4315_v48, 0.0 }
 0x3d2   : > { %6079 = vmatprep.mubr.msk.f32.mxu1 %vm668_vm1, %v4460_v33  ;;  %v4347_v53 = vmul.f32 0.01, %v4315_v48  ;;  %vm4332_vm13 = vcmp.gt.f32.partialorder %v4316_v17, 0.0  ;;  %v4348_v45 = vmul.f32 0.01, %v4316_v17  ;;  %vm4430_vm14 = vcmp.gt.f32.partialorder %v4414_v30, 0.0 }
 0x3d3   : > { %v4362_v23 = vsel %vm4330_vm11, %v4314_v15, %v4346_v61  ;;  %v4446_v27 = vmul.f32 0.01, %v4414_v30  ;;  %v4317_v7 = vadd.f32 %v7843_v32, %v8027_v52  ;;  %6080 = vmatmul.mubr.msk.f32.gmra.mxu1 %vm668_vm1, %v4461_v28  ;;  %vm4431_vm15 = vcmp.gt.f32.partialorder %v4415_v2, 0.0 }
 0x3d4   : > { %6099 = vmatprep.mubr.msk.f32.mxu0 %vm668_vm1, %v4362_v23  ;;  %v4363_v60 = vsel %vm4331_vm12, %v4315_v48, %v4347_v53  ;;  %v4364_v49 = vsel %vm4332_vm13, %v4316_v17, %v4348_v45  ;;  %v4318_v39 = vadd.f32 %v7843_v32, %v8062_v55  ;;  %v4463_v59 = vsel %vm4431_vm15, %v4415_v2, %v4447_v26 }
 0x3d5   : > { %6100 = vmatmul.mubr.msk.f32.gmra.mxu0 %vm668_vm1, %v4363_v60  ;;  %v4462_v50 = vsel %vm4430_vm14, %v4414_v30, %v4446_v27  ;;  %vm4333_vm0 = vcmp.gt.f32.partialorder %v4317_v7, 0.0  ;;  %v4349_v58 = vmul.f32 0.01, %v4317_v7  ;;  %v4319_v21 = vadd.f32 %v7843_v32, %v8049_v63 }
 0x3d6   : > { %6102 = vmatprep.mubr.msk.f32.mxu0 %vm668_vm1, %v4364_v49  ;;  %6082 = vmatprep.mubr.msk.f32.mxu1 %vm668_vm1, %v4462_v50  ;;  %vm4334_vm2 = vcmp.gt.f32.partialorder %v4318_v39, 0.0  ;;  %v4350_v52 = vmul.f32 0.01, %v4318_v39  ;;  %v4320_v25 = vadd.f32 %v7843_v32, %v8105_v1  ;;  %v4321_v8 = vadd.f32 %v7843_v32, %v8074_v5 }
 0x3d7   : > { %v4365_v22 = vsel %vm4333_vm0, %v4317_v7, %v4349_v58  ;;  %6083 = vmatmul.mubr.msk.f32.gmra.mxu1 %vm668_vm1, %v4463_v59  ;;  %v4351_v13 = vmul.f32 0.01, %v4319_v21  ;;  %vm4335_vm4 = vcmp.gt.f32.partialorder %v4319_v21, 0.0 }
 0x3d8   : > { %v4366_v55 = vsel %vm4334_vm2, %v4318_v39, %v4350_v52  ;;  %vm4336_vm3 = vcmp.gt.f32.partialorder %v4320_v25, 0.0  ;;  %v4352_v3 = vmul.f32 0.01, %v4320_v25  ;;  %v4353_v14 = vmul.f32 0.01, %v4321_v8 }
 0x3d9   : > { %6103 = vmatmul.mubr.msk.f32.gmra.mxu0 %vm668_vm1, %v4365_v22  ;;  %v4367_v40 = vsel %vm4335_vm4, %v4319_v21, %v4351_v13  ;;  %vm4337_vm5 = vcmp.gt.f32.partialorder %v4321_v8, 0.0 }
 0x3da   : > { %6105 = vmatprep.mubr.msk.f32.mxu0 %vm668_vm1, %v4366_v55  ;;  %v4368_v63 = vsel %vm4336_vm3, %v4320_v25, %v4352_v3  ;;  %v4369_v38 = vsel %vm4337_vm5, %v4321_v8, %v4353_v14 }
 0x3dd   : > { %6106 = vmatmul.mubr.msk.f32.gmra.mxu0 %vm668_vm1, %v4367_v40 }
 0x3de   : > { %6108 = vmatprep.mubr.msk.f32.mxu0 %vm668_vm1, %v4368_v63 }
 0x3e1   : > { %6109 = vmatmul.mubr.msk.f32.gmra.mxu0 %vm668_vm1, %v4369_v38  ;;  %vm4856_vm1 = vcmask 64512  }
 0x471   : > { %v6063_v32 = vpop.f32.mrf.mxu1 }
 0x473   : > { %v4581_v5 = vpop.f32.mrf.mxu1 }
 0x477   : > { %v6066_v10 = vpop.f32.mrf.mxu1 }
 0x479   : > { %v4591_v56 = vpop.f32.mrf.mxu1 }
 0x47f   : > { %v6069_v0 = vpop.f32.mrf.mxu1 }
 0x480   : > { %v6089_v36 = vpop.f32.mrf.mxu0 }
 0x481   : > { %v4783_v46 = vadd.f32 %v6089_v36, %v6063_v32  ;;  %v4601_v62 = vpop.f32.mrf.mxu1 }
 0x482   : > { %v4777_v57 = vpop.f32.mrf.mxu0 }
 0x483   : > { %4858 = vst.msk [vmem:[%s8165_s20 + $0x8] sm:$0xff] %vm4856_vm1, %v4783_v46  ;;  %v4778_v43 = vadd.f32 %v4777_v57, %v4581_v5 }
 0x485   : > { %4857 = vst.msk [vmem:[%s8165_s20] sm:$0xff] %vm4856_vm1, %v4778_v43  ;;  %v6072_v24 = vpop.f32.mrf.mxu1 }
 0x487   : > { %v6092_v34 = vpop.f32.mrf.mxu0  ;;  %v4611_v19 = vpop.f32.mrf.mxu1 }
 0x488   : > { %v4793_v35 = vadd.f32 %v6092_v34, %v6066_v10 }
 0x489   : > { %v4787_v1 = vpop.f32.mrf.mxu0 }
 0x48a   : > { %4860 = vst.msk [vmem:[%s8165_s20 + $0x18] sm:$0xff] %vm4856_vm1, %v4793_v35  ;;  %v4788_v4 = vadd.f32 %v4787_v1, %v4591_v56 }
 0x48b   : > { %v6075_v9 = vpop.f32.mrf.mxu1 }
 0x48c   : > { %4859 = vst.msk [vmem:[%s8165_s20 + $0x10] sm:$0xff] %vm4856_vm1, %v4788_v4 }
 0x48d   : > { %v6095_v11 = vpop.f32.mrf.mxu0  ;;  %v4621_v16 = vpop.f32.mrf.mxu1 }
 0x48e   : > { %v4803_v2 = vadd.f32 %v6095_v11, %v6069_v0 }
 0x48f   : > { %v4797_v37 = vpop.f32.mrf.mxu0  ;;  %v6078_v12 = vpop.f32.mrf.mxu1 }
 0x490   : > { %4862 = vst.msk [vmem:[%s8165_s20 + $0x28] sm:$0xff] %vm4856_vm1, %v4803_v2  ;;  %v4798_v44 = vadd.f32 %v4797_v37, %v4601_v62 }
 0x491   : > { %v6098_v26 = vpop.f32.mrf.mxu0  ;;  %v4631_v54 = vpop.f32.mrf.mxu1 }
 0x492   : > { %4861 = vst.msk [vmem:[%s8165_s20 + $0x20] sm:$0xff] %vm4856_vm1, %v4798_v44  ;;  %v4813_v6 = vadd.f32 %v6098_v26, %v6072_v24 }
 0x493   : > { %v4807_v20 = vpop.f32.mrf.mxu0  ;;  %v6081_v31 = vpop.f32.mrf.mxu1 }
 0x494   : > { %4864 = vst.msk [vmem:[%s8165_s20 + $0x38] sm:$0xff] %vm4856_vm1, %v4813_v6  ;;  %v4808_v30 = vadd.f32 %v4807_v20, %v4611_v19 }
 0x495   : > { %v6101_v18 = vpop.f32.mrf.mxu0  ;;  %v4641_v51 = vpop.f32.mrf.mxu1 }
 0x496   : > { %4863 = vst.msk [vmem:[%s8165_s20 + $0x30] sm:$0xff] %vm4856_vm1, %v4808_v30  ;;  %v4823_v29 = vadd.f32 %v6101_v18, %v6075_v9 }
 0x497   : > { %v4817_v42 = vpop.f32.mrf.mxu0  ;;  %v6084_v28 = vpop.f32.mrf.mxu1 }
 0x498   : > { %4866 = vst.msk [vmem:[%s8165_s20 + $0x48] sm:$0xff] %vm4856_vm1, %v4823_v29  ;;  %v4818_v41 = vadd.f32 %v4817_v42, %v4621_v16 }
 0x499   : > { %v6104_v15 = vpop.f32.mrf.mxu0  ;;  %v4651_v7 = vpop.f32.mrf.mxu1 }
 0x49a   : > { %4865 = vst.msk [vmem:[%s8165_s20 + $0x40] sm:$0xff] %vm4856_vm1, %v4818_v41  ;;  %v4833_v47 = vadd.f32 %v6104_v15, %v6078_v12 }
 0x49b   : > { %v4827_v48 = vpop.f32.mrf.mxu0 }
 0x49c   : > { %4868 = vst.msk [vmem:[%s8165_s20 + $0x58] sm:$0xff] %vm4856_vm1, %v4833_v47  ;;  %v4828_v17 = vadd.f32 %v4827_v48, %v4631_v54 }
 0x49d   : > { %v6107_v61 = vpop.f32.mrf.mxu0 }
 0x49e   : > { %4867 = vst.msk [vmem:[%s8165_s20 + $0x50] sm:$0xff] %vm4856_vm1, %v4828_v17  ;;  %v4843_v33 = vadd.f32 %v6107_v61, %v6081_v31 }
 0x49f   : > { %v4837_v53 = vpop.f32.mrf.mxu0 }
 0x4a0   : > { %4870 = vst.msk [vmem:[%s8165_s20 + $0x68] sm:$0xff] %vm4856_vm1, %v4843_v33  ;;  %v4838_v45 = vadd.f32 %v4837_v53, %v4641_v51 }
 0x4a1   : > { %v6110_v23 = vpop.f32.mrf.mxu0 }
 0x4a2   : > { %4869 = vst.msk [vmem:[%s8165_s20 + $0x60] sm:$0xff] %vm4856_vm1, %v4838_v45  ;;  %v4853_v27 = vadd.f32 %v6110_v23, %v6084_v28 }
 0x4a3   : > { %v4847_v60 = vpop.f32.mrf.mxu0 }
 0x4a4   : > { %4872 = vst.msk [vmem:[%s8165_s20 + $0x78] sm:$0xff] %vm4856_vm1, %v4853_v27  ;;  %v4848_v49 = vadd.f32 %v4847_v60, %v4651_v7 }
 0x4a6   : > { %4871 = vst.msk [vmem:[%s8165_s20 + $0x70] sm:$0xff] %vm4856_vm1, %v4848_v49 }
 0x4a7 PF: > { %s28_s0 = sadd.s32 1, %s6481_s0   ;;  %s8245_s28 = sld [smem:[#allocation3_spill]] }
 0x4a8   : > { %p25_p9 = scmp.ge.s32.totalorder %s28_s0, 6   ;;  %s8246_s19 = sld [smem:[#allocation4_spill]] }
 0x4a9   : > { %s8247_s30 = sld [smem:[#allocation5_spill]]  ;;  %s8248_s27 = smov %s6473_s29 }
 0x4aa   :  { %27 = sbr.rel (!%p25_p9) target bundleno = 4 (0x4), region = 137 }
 0x4ae   : > { %s8249_s29 = smov %s8246_s19 }

</bundles_post_ra>
